<compile_context>
chip_gen: v5e
topology: v5e:2x2
jax: 0.10.0
libtpu: 0.0.40
codegen_flags: <defaults>
</compile_context>

<pallas_src>
import jax
import jax.numpy as jnp
from jax import lax
from jax.experimental import pallas as pl
from jax.experimental.pallas import tpu as pltpu

_EPS = 1e-5


# -----------------------------------------------------------------------------
# Fused dense-BLOCK kernel factory (all layers in one kernel).
# Inputs  : x (1,H,W,C0) and, per layer l:
#             s1 (1,cin_l), b1 (1,cin_l)          folded BN1 scale / shift (f32)
#             w1 (cin_l,cmid)  bf16               1x1 conv weight * BN2 scale
#             b2 (1,cmid)      f32                folded BN2 shift
#             w2 (9*cmid,G)    bf16               3x3 conv taps (im2col layout)
# Output  : (1, H*W, C_total) — input channels + every layer's new channels.
# Scratch : feature stack (H*W, C_total), padded bottleneck (H+2, W+2, cmid),
#           im2col patches (H*W, 9*cmid), all f32 VMEM.
# -----------------------------------------------------------------------------
def _make_block_kernel(num_layers, c0, growth, cmid, H, W):
    HW = H * W
    c_total = c0 + num_layers * growth

    def kernel(*refs):
        x_ref = refs[0]
        params = refs[1:1 + 5 * num_layers]
        o_ref = refs[1 + 5 * num_layers]
        feat_ref = refs[2 + 5 * num_layers]     # (HW, c_total) resident feature stack
        zpad_ref = refs[3 + 5 * num_layers]     # (H+2, W+2, cmid) padded bottleneck
        col_ref = refs[4 + 5 * num_layers]      # (HW, 9*cmid) im2col patches

        # Input features -> channels [0:c0] of the resident feature stack.
        feat_ref[:, 0:c0] = x_ref[...].reshape(HW, c0)

        # Zero only the 1-pixel pad border once per grid step; the interior is
        # fully overwritten by every layer below.
        zpad_ref[0:1, :, :] = jnp.zeros((1, W + 2, cmid), jnp.float32)
        zpad_ref[H + 1:H + 2, :, :] = jnp.zeros((1, W + 2, cmid), jnp.float32)
        zpad_ref[:, 0:1, :] = jnp.zeros((H + 2, 1, cmid), jnp.float32)
        zpad_ref[:, W + 1:W + 2, :] = jnp.zeros((H + 2, 1, cmid), jnp.float32)

        off = c0
        for l in range(num_layers):
            cin = c0 + l * growth
            s1, b1, w1, b2, w2 = params[5 * l:5 * l + 5]

            # BN1 -> ReLU on the [0:cin] slice of the stack (f32 VPU), then ONE
            # 1x1-conv matmul with K = cin (bf16 MXU operands, f32 accumulate).
            # BN2's scale is already folded into w1.
            h = jnp.maximum(feat_ref[:, 0:cin] * s1[...] + b1[...], 0.0)
            z = jnp.dot(h.astype(jnp.bfloat16), w1[...],
                        preferred_element_type=jnp.float32)
            z = jnp.maximum(z + b2[...], 0.0)          # + BN2 shift, ReLU

            # Zero-padded bottleneck (post-ReLU zero pad == PyTorch padding=1).
            zpad_ref[1:H + 1, 1:W + 1, :] = z.reshape(H, W, cmid)

            # im2col: copy the 9 shifted patches once, then ONE 3x3-conv matmul
            # with K = 9*cmid on the MXU.
            for dy in range(3):
                for dx in range(3):
                    k = dy * 3 + dx
                    col_ref[:, k * cmid:(k + 1) * cmid] = (
                        zpad_ref[dy:dy + H, dx:dx + W, :].reshape(HW, cmid))
            new = jnp.dot(col_ref[...].astype(jnp.bfloat16), w2[...],
                          preferred_element_type=jnp.float32)   # (HW, G)

            # New features -> their channel slice of the resident stack.
            feat_ref[:, off:off + growth] = new
            off += growth

        # Single HBM store of the whole stack (== the final torch.cat).
        o_ref[...] = feat_ref[...].reshape(1, HW, c_total)

    return kernel


# -----------------------------------------------------------------------------
# Dense block forward (Pallas) — NCHW in / NCHW out like PyTorch.
# -----------------------------------------------------------------------------
def dense_block_forward(x_nchw, layer_params):
    x = jnp.transpose(x_nchw, (0, 2, 3, 1)).astype(jnp.float32)   # NCHW -> NHWC
    N, H, W, c0 = x.shape
    num_layers = len(layer_params)
    cmid = layer_params[0]["w1"].shape[1]
    growth = layer_params[0]["w2"].shape[-1]
    c_total = c0 + num_layers * growth

    kernel = _make_block_kernel(num_layers, c0, growth, cmid, H, W)

    in_specs = [pl.BlockSpec((1, H, W, c0), lambda n: (n, 0, 0, 0))]
    flat_params = []
    for l, p in enumerate(layer_params):
        cin = c0 + l * growth
        in_specs += [
            pl.BlockSpec((1, cin), lambda n: (0, 0)),             # s1
            pl.BlockSpec((1, cin), lambda n: (0, 0)),             # b1
            pl.BlockSpec((cin, cmid), lambda n: (0, 0)),          # w1 (bf16, BN2 scale folded)
            pl.BlockSpec((1, cmid), lambda n: (0, 0)),            # b2
            pl.BlockSpec((9 * cmid, growth), lambda n: (0, 0)),   # w2 taps (bf16)
        ]
        flat_params += [p["s1"], p["b1"], p["w1"], p["b2"], p["w2"]]

    out_flat = pl.pallas_call(
        kernel,
        out_shape=jax.ShapeDtypeStruct((N, H * W, c_total), jnp.float32),
        grid=(N,),
        in_specs=in_specs,
        out_specs=pl.BlockSpec((1, H * W, c_total), lambda n: (n, 0, 0)),
        scratch_shapes=[
            pltpu.VMEM((H * W, c_total), jnp.float32),            # feature stack
            pltpu.VMEM((H + 2, W + 2, cmid), jnp.float32),        # padded bottleneck
            pltpu.VMEM((H * W, 9 * cmid), jnp.float32),           # im2col patches
        ],
        compiler_params=pltpu.CompilerParams(
            dimension_semantics=("parallel",),        # megacore split over batch
            vmem_limit_bytes=32 * 1024 * 1024,        # actual use <1 MiB here;
                                                      # re-derive per generation
        ),
    )(x, *flat_params)

    out = out_flat.reshape(N, H, W, c_total)
    return jnp.transpose(out, (0, 3, 1, 2))                       # -> NCHW


# -----------------------------------------------------------------------------
# Parameter construction (deterministic, synthetic) + BN folding (eval mode).
# -----------------------------------------------------------------------------
def _fold_bn(gamma, beta, mean, var):
    scale = gamma / jnp.sqrt(var + _EPS)
    shift = beta - mean * scale
    return scale.astype(jnp.float32), shift.astype(jnp.float32)


def init_dense_layer_params(key, c_in, bn_size, growth_rate):
    cmid = bn_size * growth_rate
    ks = jax.random.split(key, 10)
    # BatchNorm2d(c_in): affine + running stats (eval mode)
    g1 = 1.0 + 0.1 * jax.random.normal(ks[0], (c_in,), jnp.float32)
    b1 = 0.1 * jax.random.normal(ks[1], (c_in,), jnp.float32)
    m1 = 0.1 * jax.random.normal(ks[2], (c_in,), jnp.float32)
    v1 = jax.random.uniform(ks[3], (c_in,), jnp.float32, 0.5, 1.5)
    # Conv2d(c_in, cmid, 1, bias=False): PyTorch weight (cmid, c_in)
    w1 = 0.1 * jax.random.normal(ks[4], (cmid, c_in), jnp.float32)
    # BatchNorm2d(cmid)
    g2 = 1.0 + 0.1 * jax.random.normal(ks[5], (cmid,), jnp.float32)
    b2 = 0.1 * jax.random.normal(ks[6], (cmid,), jnp.float32)
    m2 = 0.1 * jax.random.normal(ks[7], (cmid,), jnp.float32)
    v2 = jax.random.uniform(ks[8], (cmid,), jnp.float32, 0.5, 1.5)
    # Conv2d(cmid, growth_rate, 3, padding=1, bias=False): weight (G, cmid, 3, 3)
    w2 = 0.1 * jax.random.normal(ks[9], (growth_rate, cmid, 3, 3), jnp.float32)

    s1, sh1 = _fold_bn(g1, b1, m1, v1)
    s2, sh2 = _fold_bn(g2, b2, m2, v2)
    # 1x1 conv as (c_in, cmid) matmul with BN2 scale folded in; bf16 MXU operand.
    w1_eff = (jnp.transpose(w1, (1, 0)) * s2[None, :]).astype(jnp.bfloat16)
    # 3x3 conv in im2col layout: (G,Cmid,3,3) -> (3,3,Cmid,G) -> (9*Cmid, G); bf16.
    w2_cols = jnp.transpose(w2, (2, 3, 1, 0)).reshape(9 * cmid, growth_rate)
    w2_cols = w2_cols.astype(jnp.bfloat16)

    return dict(
        s1=s1.reshape(1, -1), b1=sh1.reshape(1, -1),
        w1=w1_eff, b2=sh2.reshape(1, -1), w2=w2_cols,
        # raw params kept for the pure-JAX reference check
        raw=dict(g1=g1, b1=b1, m1=m1, v1=v1, w1=w1,
                 g2=g2, b2=b2, m2=m2, v2=v2, w2=w2),
    )


# -----------------------------------------------------------------------------
# Pure-JAX reference (NCHW, mirrors the PyTorch module in eval mode, f32).
# -----------------------------------------------------------------------------
def _ref_bn(x, g, b, m, v):
    return (x - m[None, :, None, None]) / jnp.sqrt(v + _EPS)[None, :, None, None] \
        * g[None, :, None, None] + b[None, :, None, None]


def _ref_layer(x_cat, raw):
    h = jax.nn.relu(_ref_bn(x_cat, raw["g1"], raw["b1"], raw["m1"], raw["v1"]))
    b = lax.conv_general_dilated(h, raw["w1"][:, :, None, None], (1, 1), "VALID",
                                 dimension_numbers=("NCHW", "OIHW", "NCHW"))
    h2 = jax.nn.relu(_ref_bn(b, raw["g2"], raw["b2"], raw["m2"], raw["v2"]))
    return lax.conv_general_dilated(h2, raw["w2"], (1, 1), ((1, 1), (1, 1)),
                                    dimension_numbers=("NCHW", "OIHW", "NCHW"))


def ref_dense_block(x_nchw, layer_params):
    feats = [x_nchw]
    for p in layer_params:
        cat = jnp.concatenate(feats, axis=1)
        feats.append(_ref_layer(cat, p["raw"]))
    return jnp.concatenate(feats, axis=1)


# -----------------------------------------------------------------------------
if __name__ == "__main__":
    # _DenseBlock(num_layers=2, num_input_features=8, bn_size=2, growth_rate=8,
    #             drop_rate=0.0) applied to x of shape (N=2, C=8, H=16, W=16).
    num_layers = 2
    num_input_features = 8
    bn_size = 2
    growth_rate = 8
    N, H, W = 2, 16, 16

    root = jax.random.PRNGKey(0)
    kx, *kls = jax.random.split(root, 1 + num_layers)
    x = jax.random.normal(kx, (N, num_input_features, H, W), jnp.float32)

    layer_params = []
    for i in range(num_layers):
        c_in = num_input_features + i * growth_rate
        layer_params.append(init_dense_layer_params(kls[i], c_in, bn_size, growth_rate))

    out = jax.block_until_ready(dense_block_forward(x, layer_params))

    expected_channels = num_input_features + num_layers * growth_rate
    assert out.shape == (N, expected_channels, H, W), out.shape

    ref = jax.block_until_ready(ref_dense_block(x, layer_params))
    max_err = float(jnp.max(jnp.abs(out - ref)))
    # bf16 MXU operands (f32 accumulation) vs the f32 reference -> loosened tolerance.
    assert jnp.allclose(out, ref, atol=2e-2, rtol=2e-2), max_err

    print("KERNEL_OK")
</pallas_src>

<mosaic_0001>
module attributes {stable_mosaic.version = 11 : i64} {
  func.func @kernel(%arg0: i32, %arg1: memref<1x16x16x8xf32, #tpu.memory_space<vmem>>, %arg2: memref<1x8xf32, #tpu.memory_space<vmem>>, %arg3: memref<1x8xf32, #tpu.memory_space<vmem>>, %arg4: memref<8x16xbf16, #tpu.memory_space<vmem>>, %arg5: memref<1x16xf32, #tpu.memory_space<vmem>>, %arg6: memref<144x8xbf16, #tpu.memory_space<vmem>>, %arg7: memref<1x16xf32, #tpu.memory_space<vmem>>, %arg8: memref<1x16xf32, #tpu.memory_space<vmem>>, %arg9: memref<16x16xbf16, #tpu.memory_space<vmem>>, %arg10: memref<1x16xf32, #tpu.memory_space<vmem>>, %arg11: memref<144x8xbf16, #tpu.memory_space<vmem>>, %arg12: memref<1x256x24xf32, #tpu.memory_space<vmem>>, %arg13: memref<256x24xf32, #tpu.memory_space<vmem>>, %arg14: memref<18x18x16xf32, #tpu.memory_space<vmem>>, %arg15: memref<256x144xf32, #tpu.memory_space<vmem>>) attributes {dimension_semantics = [#tpu.dimension_semantics<parallel>], iteration_bounds = array<i64: 2>, scalar_prefetch = 0 : i64, scratch_operands = 3 : i64, tpu.core_type = #tpu.core_type<tc>, window_params = [{transform_indices = @transform_0, window_bounds = array<i64: 1, 16, 16, 8>}, {pipeline_mode = #tpu.pipeline_mode<synchronous>, transform_indices = @transform_1, window_bounds = array<i64: 1, 8>}, {pipeline_mode = #tpu.pipeline_mode<synchronous>, transform_indices = @transform_2, window_bounds = array<i64: 1, 8>}, {pipeline_mode = #tpu.pipeline_mode<synchronous>, transform_indices = @transform_3, window_bounds = array<i64: 8, 16>}, {pipeline_mode = #tpu.pipeline_mode<synchronous>, transform_indices = @transform_4, window_bounds = array<i64: 1, 16>}, {pipeline_mode = #tpu.pipeline_mode<synchronous>, transform_indices = @transform_5, window_bounds = array<i64: 144, 8>}, {pipeline_mode = #tpu.pipeline_mode<synchronous>, transform_indices = @transform_6, window_bounds = array<i64: 1, 16>}, {pipeline_mode = #tpu.pipeline_mode<synchronous>, transform_indices = @transform_7, window_bounds = array<i64: 1, 16>}, {pipeline_mode = #tpu.pipeline_mode<synchronous>, transform_indices = @transform_8, window_bounds = array<i64: 16, 16>}, {pipeline_mode = #tpu.pipeline_mode<synchronous>, transform_indices = @transform_9, window_bounds = array<i64: 1, 16>}, {pipeline_mode = #tpu.pipeline_mode<synchronous>, transform_indices = @transform_10, window_bounds = array<i64: 144, 8>}, {transform_indices = @transform_11, window_bounds = array<i64: 1, 256, 24>}]} {
    %c0 = arith.constant 0 : index
    %c0_0 = arith.constant 0 : index
    %c0_1 = arith.constant 0 : index
    %c0_2 = arith.constant 0 : index
    %0 = vector.load %arg1[%c0, %c0_0, %c0_1, %c0_2] : memref<1x16x16x8xf32, #tpu.memory_space<vmem>>, vector<1x16x16x8xf32>
    %1 = vector.shape_cast %0 : vector<1x16x16x8xf32> to vector<256x8xf32>
    %c0_3 = arith.constant 0 : index
    %c0_4 = arith.constant 0 : index
    %2 = vector.load %arg13[%c0_3, %c0_4] : memref<256x24xf32, #tpu.memory_space<vmem>>, vector<256x8xf32>
    tpu.vector_store %arg13[%c0_3, %c0_4], %1 {strides = array<i32>} : memref<256x24xf32, #tpu.memory_space<vmem>>, vector<256x8xf32>,
    %cst = arith.constant 0.000000e+00 : f32
    %3 = vector.broadcast %cst : f32 to vector<1x18x16xf32>
    %c0_5 = arith.constant 0 : index
    %c0_6 = arith.constant 0 : index
    %c0_7 = arith.constant 0 : index
    %4 = vector.load %arg14[%c0_5, %c0_6, %c0_7] : memref<18x18x16xf32, #tpu.memory_space<vmem>>, vector<1x18x16xf32>
    tpu.vector_store %arg14[%c0_5, %c0_6, %c0_7], %3 {strides = array<i32>} : memref<18x18x16xf32, #tpu.memory_space<vmem>>, vector<1x18x16xf32>,
    %cst_8 = arith.constant 0.000000e+00 : f32
    %5 = vector.broadcast %cst_8 : f32 to vector<1x18x16xf32>
    %c17 = arith.constant 17 : index
    %c0_9 = arith.constant 0 : index
    %c0_10 = arith.constant 0 : index
    %6 = vector.load %arg14[%c17, %c0_9, %c0_10] : memref<18x18x16xf32, #tpu.memory_space<vmem>>, vector<1x18x16xf32>
    tpu.vector_store %arg14[%c17, %c0_9, %c0_10], %5 {strides = array<i32>} : memref<18x18x16xf32, #tpu.memory_space<vmem>>, vector<1x18x16xf32>,
    %cst_11 = arith.constant 0.000000e+00 : f32
    %7 = vector.broadcast %cst_11 : f32 to vector<18x1x16xf32>
    %c0_12 = arith.constant 0 : index
    %c0_13 = arith.constant 0 : index
    %c0_14 = arith.constant 0 : index
    %8 = vector.load %arg14[%c0_12, %c0_13, %c0_14] : memref<18x18x16xf32, #tpu.memory_space<vmem>>, vector<18x1x16xf32>
    tpu.vector_store %arg14[%c0_12, %c0_13, %c0_14], %7 {strides = array<i32>} : memref<18x18x16xf32, #tpu.memory_space<vmem>>, vector<18x1x16xf32>,
    %cst_15 = arith.constant 0.000000e+00 : f32
    %9 = vector.broadcast %cst_15 : f32 to vector<18x1x16xf32>
    %c0_16 = arith.constant 0 : index
    %c17_17 = arith.constant 17 : index
    %c0_18 = arith.constant 0 : index
    %10 = vector.load %arg14[%c0_16, %c17_17, %c0_18] : memref<18x18x16xf32, #tpu.memory_space<vmem>>, vector<18x1x16xf32>
    tpu.vector_store %arg14[%c0_16, %c17_17, %c0_18], %9 {strides = array<i32>} : memref<18x18x16xf32, #tpu.memory_space<vmem>>, vector<18x1x16xf32>,
    %c0_19 = arith.constant 0 : index
    %c0_20 = arith.constant 0 : index
    %11 = vector.load %arg13[%c0_19, %c0_20] : memref<256x24xf32, #tpu.memory_space<vmem>>, vector<256x8xf32>
    %c0_21 = arith.constant 0 : index
    %c0_22 = arith.constant 0 : index
    %12 = vector.load %arg2[%c0_21, %c0_22] : memref<1x8xf32, #tpu.memory_space<vmem>>, vector<1x8xf32>
    %13 = vector.broadcast %12 : vector<1x8xf32> to vector<256x8xf32>
    %14 = arith.mulf %11, %13 : vector<256x8xf32>
    %c0_23 = arith.constant 0 : index
    %c0_24 = arith.constant 0 : index
    %15 = vector.load %arg3[%c0_23, %c0_24] : memref<1x8xf32, #tpu.memory_space<vmem>>, vector<1x8xf32>
    %16 = vector.broadcast %15 : vector<1x8xf32> to vector<256x8xf32>
    %17 = arith.addf %14, %16 : vector<256x8xf32>
    %cst_25 = arith.constant 0.000000e+00 : f32
    %18 = vector.broadcast %cst_25 : f32 to vector<256x8xf32>
    %19 = arith.maximumf %17, %18 : vector<256x8xf32>
    %20 = arith.truncf %19 : vector<256x8xf32> to vector<256x8xbf16>
    %c0_26 = arith.constant 0 : index
    %c0_27 = arith.constant 0 : index
    %21 = vector.load %arg4[%c0_26, %c0_27] : memref<8x16xbf16, #tpu.memory_space<vmem>>, vector<8x16xbf16>
    %cst_28 = arith.constant dense<0.000000e+00> : vector<256x16xf32>
    %22 = tpu.matmul %20, %21, %cst_28 {dimension_numbers = #tpu.dot_dimension_numbers<[1], [0], [0], [1], [0, 0, 1, 1], [], []>} : vector<256x8xbf16>, vector<8x16xbf16>, vector<256x16xf32> -> vector<256x16xf32>
    %c0_29 = arith.constant 0 : index
    %c0_30 = arith.constant 0 : index
    %23 = vector.load %arg5[%c0_29, %c0_30] : memref<1x16xf32, #tpu.memory_space<vmem>>, vector<1x16xf32>
    %24 = vector.broadcast %23 : vector<1x16xf32> to vector<256x16xf32>
    %25 = arith.addf %22, %24 : vector<256x16xf32>
    %cst_31 = arith.constant 0.000000e+00 : f32
    %26 = vector.broadcast %cst_31 : f32 to vector<256x16xf32>
    %27 = arith.maximumf %25, %26 : vector<256x16xf32>
    %28 = vector.shape_cast %27 : vector<256x16xf32> to vector<16x16x16xf32>
    %c1 = arith.constant 1 : index
    %c1_32 = arith.constant 1 : index
    %c0_33 = arith.constant 0 : index
    %29 = vector.load %arg14[%c1, %c1_32, %c0_33] : memref<18x18x16xf32, #tpu.memory_space<vmem>>, vector<16x16x16xf32>
    tpu.vector_store %arg14[%c1, %c1_32, %c0_33], %28 {strides = array<i32>} : memref<18x18x16xf32, #tpu.memory_space<vmem>>, vector<16x16x16xf32>,
    %c0_34 = arith.constant 0 : index
    %c0_35 = arith.constant 0 : index
    %c0_36 = arith.constant 0 : index
    %30 = vector.load %arg14[%c0_34, %c0_35, %c0_36] : memref<18x18x16xf32, #tpu.memory_space<vmem>>, vector<16x16x16xf32>
    %31 = vector.shape_cast %30 : vector<16x16x16xf32> to vector<256x16xf32>
    %c0_37 = arith.constant 0 : index
    %c0_38 = arith.constant 0 : index
    %32 = vector.load %arg15[%c0_37, %c0_38] : memref<256x144xf32, #tpu.memory_space<vmem>>, vector<256x16xf32>
    tpu.vector_store %arg15[%c0_37, %c0_38], %31 {strides = array<i32>} : memref<256x144xf32, #tpu.memory_space<vmem>>, vector<256x16xf32>,
    %c0_39 = arith.constant 0 : index
    %c1_40 = arith.constant 1 : index
    %c0_41 = arith.constant 0 : index
    %33 = vector.load %arg14[%c0_39, %c1_40, %c0_41] : memref<18x18x16xf32, #tpu.memory_space<vmem>>, vector<16x16x16xf32>
    %34 = vector.shape_cast %33 : vector<16x16x16xf32> to vector<256x16xf32>
    %c0_42 = arith.constant 0 : index
    %c16 = arith.constant 16 : index
    %35 = vector.load %arg15[%c0_42, %c16] : memref<256x144xf32, #tpu.memory_space<vmem>>, vector<256x16xf32>
    tpu.vector_store %arg15[%c0_42, %c16], %34 {strides = array<i32>} : memref<256x144xf32, #tpu.memory_space<vmem>>, vector<256x16xf32>,
    %c0_43 = arith.constant 0 : index
    %c2 = arith.constant 2 : index
    %c0_44 = arith.constant 0 : index
    %36 = vector.load %arg14[%c0_43, %c2, %c0_44] : memref<18x18x16xf32, #tpu.memory_space<vmem>>, vector<16x16x16xf32>
    %37 = vector.shape_cast %36 : vector<16x16x16xf32> to vector<256x16xf32>
    %c0_45 = arith.constant 0 : index
    %c32 = arith.constant 32 : index
    %38 = vector.load %arg15[%c0_45, %c32] : memref<256x144xf32, #tpu.memory_space<vmem>>, vector<256x16xf32>
    tpu.vector_store %arg15[%c0_45, %c32], %37 {strides = array<i32>} : memref<256x144xf32, #tpu.memory_space<vmem>>, vector<256x16xf32>,
    %c1_46 = arith.constant 1 : index
    %c0_47 = arith.constant 0 : index
    %c0_48 = arith.constant 0 : index
    %39 = vector.load %arg14[%c1_46, %c0_47, %c0_48] : memref<18x18x16xf32, #tpu.memory_space<vmem>>, vector<16x16x16xf32>
    %40 = vector.shape_cast %39 : vector<16x16x16xf32> to vector<256x16xf32>
    %c0_49 = arith.constant 0 : index
    %c48 = arith.constant 48 : index
    %41 = vector.load %arg15[%c0_49, %c48] : memref<256x144xf32, #tpu.memory_space<vmem>>, vector<256x16xf32>
    tpu.vector_store %arg15[%c0_49, %c48], %40 {strides = array<i32>} : memref<256x144xf32, #tpu.memory_space<vmem>>, vector<256x16xf32>,
    %c1_50 = arith.constant 1 : index
    %c1_51 = arith.constant 1 : index
    %c0_52 = arith.constant 0 : index
    %42 = vector.load %arg14[%c1_50, %c1_51, %c0_52] : memref<18x18x16xf32, #tpu.memory_space<vmem>>, vector<16x16x16xf32>
    %43 = vector.shape_cast %42 : vector<16x16x16xf32> to vector<256x16xf32>
    %c0_53 = arith.constant 0 : index
    %c64 = arith.constant 64 : index
    %44 = vector.load %arg15[%c0_53, %c64] : memref<256x144xf32, #tpu.memory_space<vmem>>, vector<256x16xf32>
    tpu.vector_store %arg15[%c0_53, %c64], %43 {strides = array<i32>} : memref<256x144xf32, #tpu.memory_space<vmem>>, vector<256x16xf32>,
    %c1_54 = arith.constant 1 : index
    %c2_55 = arith.constant 2 : index
    %c0_56 = arith.constant 0 : index
    %45 = vector.load %arg14[%c1_54, %c2_55, %c0_56] : memref<18x18x16xf32, #tpu.memory_space<vmem>>, vector<16x16x16xf32>
    %46 = vector.shape_cast %45 : vector<16x16x16xf32> to vector<256x16xf32>
    %c0_57 = arith.constant 0 : index
    %c80 = arith.constant 80 : index
    %47 = vector.load %arg15[%c0_57, %c80] : memref<256x144xf32, #tpu.memory_space<vmem>>, vector<256x16xf32>
    tpu.vector_store %arg15[%c0_57, %c80], %46 {strides = array<i32>} : memref<256x144xf32, #tpu.memory_space<vmem>>, vector<256x16xf32>,
    %c2_58 = arith.constant 2 : index
    %c0_59 = arith.constant 0 : index
    %c0_60 = arith.constant 0 : index
    %48 = vector.load %arg14[%c2_58, %c0_59, %c0_60] : memref<18x18x16xf32, #tpu.memory_space<vmem>>, vector<16x16x16xf32>
    %49 = vector.shape_cast %48 : vector<16x16x16xf32> to vector<256x16xf32>
    %c0_61 = arith.constant 0 : index
    %c96 = arith.constant 96 : index
    %50 = vector.load %arg15[%c0_61, %c96] : memref<256x144xf32, #tpu.memory_space<vmem>>, vector<256x16xf32>
    tpu.vector_store %arg15[%c0_61, %c96], %49 {strides = array<i32>} : memref<256x144xf32, #tpu.memory_space<vmem>>, vector<256x16xf32>,
    %c2_62 = arith.constant 2 : index
    %c1_63 = arith.constant 1 : index
    %c0_64 = arith.constant 0 : index
    %51 = vector.load %arg14[%c2_62, %c1_63, %c0_64] : memref<18x18x16xf32, #tpu.memory_space<vmem>>, vector<16x16x16xf32>
    %52 = vector.shape_cast %51 : vector<16x16x16xf32> to vector<256x16xf32>
    %c0_65 = arith.constant 0 : index
    %c112 = arith.constant 112 : index
    %53 = vector.load %arg15[%c0_65, %c112] : memref<256x144xf32, #tpu.memory_space<vmem>>, vector<256x16xf32>
    tpu.vector_store %arg15[%c0_65, %c112], %52 {strides = array<i32>} : memref<256x144xf32, #tpu.memory_space<vmem>>, vector<256x16xf32>,
    %c2_66 = arith.constant 2 : index
    %c2_67 = arith.constant 2 : index
    %c0_68 = arith.constant 0 : index
    %54 = vector.load %arg14[%c2_66, %c2_67, %c0_68] : memref<18x18x16xf32, #tpu.memory_space<vmem>>, vector<16x16x16xf32>
    %55 = vector.shape_cast %54 : vector<16x16x16xf32> to vector<256x16xf32>
    %c0_69 = arith.constant 0 : index
    %c128 = arith.constant 128 : index
    %56 = vector.load %arg15[%c0_69, %c128] : memref<256x144xf32, #tpu.memory_space<vmem>>, vector<256x16xf32>
    tpu.vector_store %arg15[%c0_69, %c128], %55 {strides = array<i32>} : memref<256x144xf32, #tpu.memory_space<vmem>>, vector<256x16xf32>,
    %c0_70 = arith.constant 0 : index
    %c0_71 = arith.constant 0 : index
    %57 = vector.load %arg15[%c0_70, %c0_71] : memref<256x144xf32, #tpu.memory_space<vmem>>, vector<256x144xf32>
    %58 = arith.truncf %57 : vector<256x144xf32> to vector<256x144xbf16>
    %c0_72 = arith.constant 0 : index
    %c0_73 = arith.constant 0 : index
    %59 = vector.load %arg6[%c0_72, %c0_73] : memref<144x8xbf16, #tpu.memory_space<vmem>>, vector<144x8xbf16>
    %cst_74 = arith.constant dense<0.000000e+00> : vector<256x8xf32>
    %60 = tpu.matmul %58, %59, %cst_74 {dimension_numbers = #tpu.dot_dimension_numbers<[1], [0], [0], [1], [0, 0, 1, 1], [], []>} : vector<256x144xbf16>, vector<144x8xbf16>, vector<256x8xf32> -> vector<256x8xf32>
    %c0_75 = arith.constant 0 : index
    %c8 = arith.constant 8 : index
    %61 = vector.load %arg13[%c0_75, %c8] : memref<256x24xf32, #tpu.memory_space<vmem>>, vector<256x8xf32>
    tpu.vector_store %arg13[%c0_75, %c8], %60 {strides = array<i32>} : memref<256x24xf32, #tpu.memory_space<vmem>>, vector<256x8xf32>,
    %c0_76 = arith.constant 0 : index
    %c0_77 = arith.constant 0 : index
    %62 = vector.load %arg13[%c0_76, %c0_77] : memref<256x24xf32, #tpu.memory_space<vmem>>, vector<256x16xf32>
    %c0_78 = arith.constant 0 : index
    %c0_79 = arith.constant 0 : index
    %63 = vector.load %arg7[%c0_78, %c0_79] : memref<1x16xf32, #tpu.memory_space<vmem>>, vector<1x16xf32>
    %64 = vector.broadcast %63 : vector<1x16xf32> to vector<256x16xf32>
    %65 = arith.mulf %62, %64 : vector<256x16xf32>
    %c0_80 = arith.constant 0 : index
    %c0_81 = arith.constant 0 : index
    %66 = vector.load %arg8[%c0_80, %c0_81] : memref<1x16xf32, #tpu.memory_space<vmem>>, vector<1x16xf32>
    %67 = vector.broadcast %66 : vector<1x16xf32> to vector<256x16xf32>
    %68 = arith.addf %65, %67 : vector<256x16xf32>
    %cst_82 = arith.constant 0.000000e+00 : f32
    %69 = vector.broadcast %cst_82 : f32 to vector<256x16xf32>
    %70 = arith.maximumf %68, %69 : vector<256x16xf32>
    %71 = arith.truncf %70 : vector<256x16xf32> to vector<256x16xbf16>
    %c0_83 = arith.constant 0 : index
    %c0_84 = arith.constant 0 : index
    %72 = vector.load %arg9[%c0_83, %c0_84] : memref<16x16xbf16, #tpu.memory_space<vmem>>, vector<16x16xbf16>
    %cst_85 = arith.constant dense<0.000000e+00> : vector<256x16xf32>
    %73 = tpu.matmul %71, %72, %cst_85 {dimension_numbers = #tpu.dot_dimension_numbers<[1], [0], [0], [1], [0, 0, 1, 1], [], []>} : vector<256x16xbf16>, vector<16x16xbf16>, vector<256x16xf32> -> vector<256x16xf32>
    %c0_86 = arith.constant 0 : index
    %c0_87 = arith.constant 0 : index
    %74 = vector.load %arg10[%c0_86, %c0_87] : memref<1x16xf32, #tpu.memory_space<vmem>>, vector<1x16xf32>
    %75 = vector.broadcast %74 : vector<1x16xf32> to vector<256x16xf32>
    %76 = arith.addf %73, %75 : vector<256x16xf32>
    %cst_88 = arith.constant 0.000000e+00 : f32
    %77 = vector.broadcast %cst_88 : f32 to vector<256x16xf32>
    %78 = arith.maximumf %76, %77 : vector<256x16xf32>
    %79 = vector.shape_cast %78 : vector<256x16xf32> to vector<16x16x16xf32>
    %c1_89 = arith.constant 1 : index
    %c1_90 = arith.constant 1 : index
    %c0_91 = arith.constant 0 : index
    %80 = vector.load %arg14[%c1_89, %c1_90, %c0_91] : memref<18x18x16xf32, #tpu.memory_space<vmem>>, vector<16x16x16xf32>
    tpu.vector_store %arg14[%c1_89, %c1_90, %c0_91], %79 {strides = array<i32>} : memref<18x18x16xf32, #tpu.memory_space<vmem>>, vector<16x16x16xf32>,
    %c0_92 = arith.constant 0 : index
    %c0_93 = arith.constant 0 : index
    %c0_94 = arith.constant 0 : index
    %81 = vector.load %arg14[%c0_92, %c0_93, %c0_94] : memref<18x18x16xf32, #tpu.memory_space<vmem>>, vector<16x16x16xf32>
    %82 = vector.shape_cast %81 : vector<16x16x16xf32> to vector<256x16xf32>
    %c0_95 = arith.constant 0 : index
    %c0_96 = arith.constant 0 : index
    %83 = vector.load %arg15[%c0_95, %c0_96] : memref<256x144xf32, #tpu.memory_space<vmem>>, vector<256x16xf32>
    tpu.vector_store %arg15[%c0_95, %c0_96], %82 {strides = array<i32>} : memref<256x144xf32, #tpu.memory_space<vmem>>, vector<256x16xf32>,
    %c0_97 = arith.constant 0 : index
    %c1_98 = arith.constant 1 : index
    %c0_99 = arith.constant 0 : index
    %84 = vector.load %arg14[%c0_97, %c1_98, %c0_99] : memref<18x18x16xf32, #tpu.memory_space<vmem>>, vector<16x16x16xf32>
    %85 = vector.shape_cast %84 : vector<16x16x16xf32> to vector<256x16xf32>
    %c0_100 = arith.constant 0 : index
    %c16_101 = arith.constant 16 : index
    %86 = vector.load %arg15[%c0_100, %c16_101] : memref<256x144xf32, #tpu.memory_space<vmem>>, vector<256x16xf32>
    tpu.vector_store %arg15[%c0_100, %c16_101], %85 {strides = array<i32>} : memref<256x144xf32, #tpu.memory_space<vmem>>, vector<256x16xf32>,
    %c0_102 = arith.constant 0 : index
    %c2_103 = arith.constant 2 : index
    %c0_104 = arith.constant 0 : index
    %87 = vector.load %arg14[%c0_102, %c2_103, %c0_104] : memref<18x18x16xf32, #tpu.memory_space<vmem>>, vector<16x16x16xf32>
    %88 = vector.shape_cast %87 : vector<16x16x16xf32> to vector<256x16xf32>
    %c0_105 = arith.constant 0 : index
    %c32_106 = arith.constant 32 : index
    %89 = vector.load %arg15[%c0_105, %c32_106] : memref<256x144xf32, #tpu.memory_space<vmem>>, vector<256x16xf32>
    tpu.vector_store %arg15[%c0_105, %c32_106], %88 {strides = array<i32>} : memref<256x144xf32, #tpu.memory_space<vmem>>, vector<256x16xf32>,
    %c1_107 = arith.constant 1 : index
    %c0_108 = arith.constant 0 : index
    %c0_109 = arith.constant 0 : index
    %90 = vector.load %arg14[%c1_107, %c0_108, %c0_109] : memref<18x18x16xf32, #tpu.memory_space<vmem>>, vector<16x16x16xf32>
    %91 = vector.shape_cast %90 : vector<16x16x16xf32> to vector<256x16xf32>
    %c0_110 = arith.constant 0 : index
    %c48_111 = arith.constant 48 : index
    %92 = vector.load %arg15[%c0_110, %c48_111] : memref<256x144xf32, #tpu.memory_space<vmem>>, vector<256x16xf32>
    tpu.vector_store %arg15[%c0_110, %c48_111], %91 {strides = array<i32>} : memref<256x144xf32, #tpu.memory_space<vmem>>, vector<256x16xf32>,
    %c1_112 = arith.constant 1 : index
    %c1_113 = arith.constant 1 : index
    %c0_114 = arith.constant 0 : index
    %93 = vector.load %arg14[%c1_112, %c1_113, %c0_114] : memref<18x18x16xf32, #tpu.memory_space<vmem>>, vector<16x16x16xf32>
    %94 = vector.shape_cast %93 : vector<16x16x16xf32> to vector<256x16xf32>
    %c0_115 = arith.constant 0 : index
    %c64_116 = arith.constant 64 : index
    %95 = vector.load %arg15[%c0_115, %c64_116] : memref<256x144xf32, #tpu.memory_space<vmem>>, vector<256x16xf32>
    tpu.vector_store %arg15[%c0_115, %c64_116], %94 {strides = array<i32>} : memref<256x144xf32, #tpu.memory_space<vmem>>, vector<256x16xf32>,
    %c1_117 = arith.constant 1 : index
    %c2_118 = arith.constant 2 : index
    %c0_119 = arith.constant 0 : index
    %96 = vector.load %arg14[%c1_117, %c2_118, %c0_119] : memref<18x18x16xf32, #tpu.memory_space<vmem>>, vector<16x16x16xf32>
    %97 = vector.shape_cast %96 : vector<16x16x16xf32> to vector<256x16xf32>
    %c0_120 = arith.constant 0 : index
    %c80_121 = arith.constant 80 : index
    %98 = vector.load %arg15[%c0_120, %c80_121] : memref<256x144xf32, #tpu.memory_space<vmem>>, vector<256x16xf32>
    tpu.vector_store %arg15[%c0_120, %c80_121], %97 {strides = array<i32>} : memref<256x144xf32, #tpu.memory_space<vmem>>, vector<256x16xf32>,
    %c2_122 = arith.constant 2 : index
    %c0_123 = arith.constant 0 : index
    %c0_124 = arith.constant 0 : index
    %99 = vector.load %arg14[%c2_122, %c0_123, %c0_124] : memref<18x18x16xf32, #tpu.memory_space<vmem>>, vector<16x16x16xf32>
    %100 = vector.shape_cast %99 : vector<16x16x16xf32> to vector<256x16xf32>
    %c0_125 = arith.constant 0 : index
    %c96_126 = arith.constant 96 : index
    %101 = vector.load %arg15[%c0_125, %c96_126] : memref<256x144xf32, #tpu.memory_space<vmem>>, vector<256x16xf32>
    tpu.vector_store %arg15[%c0_125, %c96_126], %100 {strides = array<i32>} : memref<256x144xf32, #tpu.memory_space<vmem>>, vector<256x16xf32>,
    %c2_127 = arith.constant 2 : index
    %c1_128 = arith.constant 1 : index
    %c0_129 = arith.constant 0 : index
    %102 = vector.load %arg14[%c2_127, %c1_128, %c0_129] : memref<18x18x16xf32, #tpu.memory_space<vmem>>, vector<16x16x16xf32>
    %103 = vector.shape_cast %102 : vector<16x16x16xf32> to vector<256x16xf32>
    %c0_130 = arith.constant 0 : index
    %c112_131 = arith.constant 112 : index
    %104 = vector.load %arg15[%c0_130, %c112_131] : memref<256x144xf32, #tpu.memory_space<vmem>>, vector<256x16xf32>
    tpu.vector_store %arg15[%c0_130, %c112_131], %103 {strides = array<i32>} : memref<256x144xf32, #tpu.memory_space<vmem>>, vector<256x16xf32>,
    %c2_132 = arith.constant 2 : index
    %c2_133 = arith.constant 2 : index
    %c0_134 = arith.constant 0 : index
    %105 = vector.load %arg14[%c2_132, %c2_133, %c0_134] : memref<18x18x16xf32, #tpu.memory_space<vmem>>, vector<16x16x16xf32>
    %106 = vector.shape_cast %105 : vector<16x16x16xf32> to vector<256x16xf32>
    %c0_135 = arith.constant 0 : index
    %c128_136 = arith.constant 128 : index
    %107 = vector.load %arg15[%c0_135, %c128_136] : memref<256x144xf32, #tpu.memory_space<vmem>>, vector<256x16xf32>
    tpu.vector_store %arg15[%c0_135, %c128_136], %106 {strides = array<i32>} : memref<256x144xf32, #tpu.memory_space<vmem>>, vector<256x16xf32>,
    %c0_137 = arith.constant 0 : index
    %c0_138 = arith.constant 0 : index
    %108 = vector.load %arg15[%c0_137, %c0_138] : memref<256x144xf32, #tpu.memory_space<vmem>>, vector<256x144xf32>
    %109 = arith.truncf %108 : vector<256x144xf32> to vector<256x144xbf16>
    %c0_139 = arith.constant 0 : index
    %c0_140 = arith.constant 0 : index
    %110 = vector.load %arg11[%c0_139, %c0_140] : memref<144x8xbf16, #tpu.memory_space<vmem>>, vector<144x8xbf16>
    %cst_141 = arith.constant dense<0.000000e+00> : vector<256x8xf32>
    %111 = tpu.matmul %109, %110, %cst_141 {dimension_numbers = #tpu.dot_dimension_numbers<[1], [0], [0], [1], [0, 0, 1, 1], [], []>} : vector<256x144xbf16>, vector<144x8xbf16>, vector<256x8xf32> -> vector<256x8xf32>
    %c0_142 = arith.constant 0 : index
    %c16_143 = arith.constant 16 : index
    %112 = vector.load %arg13[%c0_142, %c16_143] : memref<256x24xf32, #tpu.memory_space<vmem>>, vector<256x8xf32>
    tpu.vector_store %arg13[%c0_142, %c16_143], %111 {strides = array<i32>} : memref<256x24xf32, #tpu.memory_space<vmem>>, vector<256x8xf32>,
    %c0_144 = arith.constant 0 : index
    %c0_145 = arith.constant 0 : index
    %113 = vector.load %arg13[%c0_144, %c0_145] : memref<256x24xf32, #tpu.memory_space<vmem>>, vector<256x24xf32>
    %114 = vector.shape_cast %113 : vector<256x24xf32> to vector<1x256x24xf32>
    %c0_146 = arith.constant 0 : index
    %c0_147 = arith.constant 0 : index
    %c0_148 = arith.constant 0 : index
    %115 = vector.load %arg12[%c0_146, %c0_147, %c0_148] : memref<1x256x24xf32, #tpu.memory_space<vmem>>, vector<1x256x24xf32>
    tpu.vector_store %arg12[%c0_146, %c0_147, %c0_148], %114 {strides = array<i32>} : memref<1x256x24xf32, #tpu.memory_space<vmem>>, vector<1x256x24xf32>,
    return
  }
  func.func @transform_0(%arg0: i32) -> (i32, i32, i32, i32) {
    %c0_i32 = arith.constant 0 : i32
    %c0_i32_0 = arith.constant 0 : i32
    %c0_i32_1 = arith.constant 0 : i32
    %c0_i32_2 = arith.constant 0 : i32
    return %arg0, %c0_i32, %c0_i32_0, %c0_i32_1 : i32, i32, i32, i32
  }
  func.func @transform_1(%arg0: i32) -> (i32, i32) {
    %c0_i32 = arith.constant 0 : i32
    %c0_i32_0 = arith.constant 0 : i32
    %c0_i32_1 = arith.constant 0 : i32
    return %c0_i32, %c0_i32_0 : i32, i32
  }
  func.func @transform_2(%arg0: i32) -> (i32, i32) {
    %c0_i32 = arith.constant 0 : i32
    %c0_i32_0 = arith.constant 0 : i32
    %c0_i32_1 = arith.constant 0 : i32
    return %c0_i32, %c0_i32_0 : i32, i32
  }
  func.func @transform_3(%arg0: i32) -> (i32, i32) {
    %c0_i32 = arith.constant 0 : i32
    %c0_i32_0 = arith.constant 0 : i32
    %c0_i32_1 = arith.constant 0 : i32
    return %c0_i32, %c0_i32_0 : i32, i32
  }
  func.func @transform_4(%arg0: i32) -> (i32, i32) {
    %c0_i32 = arith.constant 0 : i32
    %c0_i32_0 = arith.constant 0 : i32
    %c0_i32_1 = arith.constant 0 : i32
    return %c0_i32, %c0_i32_0 : i32, i32
  }
  func.func @transform_5(%arg0: i32) -> (i32, i32) {
    %c0_i32 = arith.constant 0 : i32
    %c0_i32_0 = arith.constant 0 : i32
    %c0_i32_1 = arith.constant 0 : i32
    return %c0_i32, %c0_i32_0 : i32, i32
  }
  func.func @transform_6(%arg0: i32) -> (i32, i32) {
    %c0_i32 = arith.constant 0 : i32
    %c0_i32_0 = arith.constant 0 : i32
    %c0_i32_1 = arith.constant 0 : i32
    return %c0_i32, %c0_i32_0 : i32, i32
  }
  func.func @transform_7(%arg0: i32) -> (i32, i32) {
    %c0_i32 = arith.constant 0 : i32
    %c0_i32_0 = arith.constant 0 : i32
    %c0_i32_1 = arith.constant 0 : i32
    return %c0_i32, %c0_i32_0 : i32, i32
  }
  func.func @transform_8(%arg0: i32) -> (i32, i32) {
    %c0_i32 = arith.constant 0 : i32
    %c0_i32_0 = arith.constant 0 : i32
    %c0_i32_1 = arith.constant 0 : i32
    return %c0_i32, %c0_i32_0 : i32, i32
  }
  func.func @transform_9(%arg0: i32) -> (i32, i32) {
    %c0_i32 = arith.constant 0 : i32
    %c0_i32_0 = arith.constant 0 : i32
    %c0_i32_1 = arith.constant 0 : i32
    return %c0_i32, %c0_i32_0 : i32, i32
  }
  func.func @transform_10(%arg0: i32) -> (i32, i32) {
    %c0_i32 = arith.constant 0 : i32
    %c0_i32_0 = arith.constant 0 : i32
    %c0_i32_1 = arith.constant 0 : i32
    return %c0_i32, %c0_i32_0 : i32, i32
  }
  func.func @transform_11(%arg0: i32) -> (i32, i32, i32) {
    %c0_i32 = arith.constant 0 : i32
    %c0_i32_0 = arith.constant 0 : i32
    %c0_i32_1 = arith.constant 0 : i32
    return %arg0, %c0_i32, %c0_i32_0 : i32, i32, i32
  }
}

</mosaic_0001>

<bundles_post_ra>
// kernel: tpu_custom_call.1
= control target key start
LH: loop header
LB: loop body
LE: loop exit
PB: predicated region body
PF: predicated region fallthrough
CT: control target
= control target key end

     0   :  { %s5685_s17 = smov 0   ;;  %s8185_s0 = inlined_call_operand.vmem [shape: f32[2,16,16,8], index: 0, kind: input, shape index: {}]   ;;  %s8186_s1 = inlined_call_operand.vmem [shape: f32[1,8], index: 1, kind: input, shape index: {}]   ;;  %s8187_s2 = inlined_call_operand.vmem [shape: f32[1,8], index: 2, kind: input, shape index: {}]   ;;  %s8188_s3 = inlined_call_operand.vmem [shape: bf16[8,16], index: 3, kind: input, shape index: {}]   ;;  %s8189_s4 = inlined_call_operand.vmem [shape: f32[1,16], index: 4, kind: input, shape index: {}]   ;;  %s8190_s5 = inlined_call_operand.vmem [shape: bf16[144,8], index: 5, kind: input, shape index: {}]   ;;  %s8191_s6 = inlined_call_operand.vmem [shape: f32[1,16], index: 6, kind: input, shape index: {}]   ;;  %s8192_s7 = inlined_call_operand.vmem [shape: f32[1,16], index: 7, kind: input, shape index: {}]   ;;  %s8193_s8 = inlined_call_operand.vmem [shape: bf16[16,16], index: 8, kind: input, shape index: {}]   ;;  %s8194_s9 = inlined_call_operand.vmem [shape: f32[1,16], index: 9, kind: input, shape index: {}]   ;;  %s8195_s10 = inlined_call_operand.vmem [shape: bf16[144,8], index: 10, kind: input, shape index: {}]   ;;  %s8196_s11 = inlined_call_operand.vmem [shape: f32[2,256,24], index: 11, kind: output, shape index: {}]  }
   0x1 LB: > { %s5409_s18 = sadd.s32 4294967295, %s5614_s17   ;;  %p5413_p0 = scmp.ge.s32.totalorder %s5614_s17, 1  ;;  %s5614_s17 = sphi %s5685_s17, %s21_s17  }
   0x2   : > { %p337_p1 = scmp.lt.s32.totalorder %s5614_s17, 3 }
   0x4   : > { %p338_p2 = pnand %p5413_p0, %p337_p1 }
   0x5   : > { %p377_p3 = scmp.lt.s32.totalorder (!%p338_p2), %s5409_s18, 1  ;;  %s5617_s29 = smov (!%p338_p2), 16  }
   0x6   : > { %341 = sbr.rel (%p338_p2) target bundleno = 2287 (0x8ef), region = 64  ;;  %s5618_s30 = smov (!%p338_p2), 32  }
   0x7   : > { %s5619_s14 = smov (!%p338_p2), 64   ;;  %s5620_s15 = smov (!%p338_p2), 48  }
   0x8   : > { %s5621_s20 = smov (!%p338_p2), 80   ;;  %s5622_s22 = smov (!%p338_p2), 112  }
   0x9   : > { %s5623_s23 = smov (!%p338_p2), 96  }
   0xb   : > { %v651_v0 = vld [vmem:[%s8188_s3] sm:$0xf]  ;;  %vm704_vm0 = vcmask 1043456   ;;  %s8198_s18 = smov (!%p377_p3, %s5409_s18), 1  ;;  %vm420_vm1 = vcmask 64512   ;;  %vm453_vm2 = vcmask 130048  }
   0xc   : > { %v706_v1 = vsel %vm704_vm0, %v651_v0, 0  ;;  %s5560_s21 = sshll.u32 %s8198_s18, 8  ;;  %v5720_v9 = vld [vmem:[%s8186_s1] ss:$0 sm:$0xff]  ;;  %vm456_vm3 = vcmask 123904   ;;  %vm462_vm4 = vcmask 122880  }
   0xd   : > { %715 = vmatpush.bf16.msra.mxu0 %v706_v1  ;;  %5581 = vmatpush.bf16.msra.mxu3 %v706_v1  ;;  %s5704_s24 = scalar_lea.vmem %s8185_s0, %s5560_s21  ;;  %v5729_v12 = vld [vmem:[%s8187_s2] ss:$0 sm:$0xff]  ;;  %vm1086_vm5 = vcmask 261248   ;;  %vm1279_vm6 = vcmask 392448   ;;  %vm1472_vm7 = vcmask 523648   ;;  %vm1665_vm8 = vcmask 654848  }
   0xe   : > { %v388_v2 = vld [vmem:[%s5704_s24] sm:$0xff]  ;;  %v389_v3 = vld [vmem:[%s5704_s24 + $0x8] sm:$0xff]  ;;  %v406_v4 = vld [vmem:[%s5704_s24 + $0x90] sm:$0xff]  ;;  %vm1858_vm9 = vcmask 786048   ;;  %vm2052_vm10 = vcmask 917248   ;;  %vm2245_vm11 = vcmask 1048448  }
   0xf   : > { %421 = vst.msk [vmem:[#allocation2] sm:$0xff] %vm420_vm1, %v388_v2  ;;  %v407_v5 = vld [vmem:[%s5704_s24 + $0x98] sm:$0xff]  ;;  %v390_v6 = vld [vmem:[%s5704_s24 + $0x10] sm:$0xff]  ;;  %v408_v8 = vld [vmem:[%s5704_s24 + $0xa0] sm:$0xff]  ;;  %vm2864_vm12 = vcmask 130112   ;;  %vm5256_vm13 = vcmask 195712  }
  0x10   : > { %422 = vst.msk [vmem:[#allocation2 + $0x8] sm:$0xff] %vm420_vm1, %v389_v3  ;;  %v391_v7 = vld [vmem:[%s5704_s24 + $0x18] sm:$0xff]  ;;  %v409_v10 = vld [vmem:[%s5704_s24 + $0xa8] sm:$0xff]  ;;  %v392_v11 = vld [vmem:[%s5704_s24 + $0x20] sm:$0xff]  ;;  %vm5321_vm14 = vcmask 195584  }
  0x11   : > { %439 = vst.msk [vmem:[#allocation2 + $0x90] sm:$0xff] %vm420_vm1, %v406_v4  ;;  %v393_v13 = vld [vmem:[%s5704_s24 + $0x28] sm:$0xff]  ;;  %v394_v38 = vld [vmem:[%s5704_s24 + $0x30] sm:$0xff]  ;;  %v395_v39 = vld [vmem:[%s5704_s24 + $0x38] sm:$0xff] }
  0x12   : > { %440 = vst.msk [vmem:[#allocation2 + $0x98] sm:$0xff] %vm420_vm1, %v407_v5  ;;  %v396_v56 = vld [vmem:[%s5704_s24 + $0x40] sm:$0xff]  ;;  %v397_v57 = vld [vmem:[%s5704_s24 + $0x48] sm:$0xff]  ;;  %v410_v58 = vld [vmem:[%s5704_s24 + $0xb0] sm:$0xff] }
  0x13   : > { %423 = vst.msk [vmem:[#allocation2 + $0x10] sm:$0xff] %vm420_vm1, %v390_v6  ;;  %v411_v59 = vld [vmem:[%s5704_s24 + $0xb8] sm:$0xff] }
  0x14   : > { %424 = vst.msk [vmem:[#allocation2 + $0x18] sm:$0xff] %vm420_vm1, %v391_v7 }
  0x15   : > { %441 = vst.msk [vmem:[#allocation2 + $0xa0] sm:$0xff] %vm420_vm1, %v408_v8 }
  0x16   : > { %v499_v14 = vld [vmem:[#allocation2] sm:$0xff]  ;;  %442 = vst.msk [vmem:[#allocation2 + $0xa8] sm:$0xff] %vm420_vm1, %v409_v10 }
  0x17   : > { %v500_v15 = vld [vmem:[#allocation2 + $0x8] sm:$0xff]  ;;  %v535_v16 = vmul.f32 %v5720_v9, %v499_v14  ;;  %425 = vst.msk [vmem:[#allocation2 + $0x20] sm:$0xff] %vm420_vm1, %v392_v11 }
  0x18   : > { %v536_v17 = vmul.f32 %v5720_v9, %v500_v15  ;;  %v517_v18 = vld [vmem:[#allocation2 + $0x90] sm:$0xff]  ;;  %426 = vst.msk [vmem:[#allocation2 + $0x28] sm:$0xff] %vm420_vm1, %v393_v13 }
  0x19   : > { %v571_v19 = vadd.f32 %v5729_v12, %v535_v16  ;;  %v518_v20 = vld [vmem:[#allocation2 + $0x98] sm:$0xff]  ;;  %v553_v21 = vmul.f32 %v5720_v9, %v517_v18  ;;  %427 = vst.msk [vmem:[#allocation2 + $0x30] sm:$0xff] %vm420_vm1, %v394_v38  ;;  %v398_v15 = vld [vmem:[%s5704_s24 + $0x50] sm:$0xff] }
  0x1a   : > { %v572_v22 = vadd.f32 %v5729_v12, %v536_v17  ;;  %v554_v23 = vmul.f32 %v5720_v9, %v518_v20  ;;  %v501_v29 = vld [vmem:[#allocation2 + $0x10] sm:$0xff]  ;;  %428 = vst.msk [vmem:[#allocation2 + $0x38] sm:$0xff] %vm420_vm1, %v395_v39  ;;  %v399_v16 = vld [vmem:[%s5704_s24 + $0x58] sm:$0xff] }
  0x1b   : > { %v603_v24 = vmax.f32 %v571_v19, 0.0  ;;  %v589_v25 = vadd.f32 %v5729_v12, %v553_v21  ;;  %v502_v30 = vld [vmem:[#allocation2 + $0x18] sm:$0xff]  ;;  %v537_v36 = vmul.f32 %v5720_v9, %v501_v29  ;;  %429 = vst.msk [vmem:[#allocation2 + $0x40] sm:$0xff] %vm420_vm1, %v396_v56  ;;  %v402_v38 = vld [vmem:[%s5704_s24 + $0x70] sm:$0xff] }
  0x1c   : > { %v604_v26 = vmax.f32 %v572_v22, 0.0  ;;  %v590_v27 = vadd.f32 %v5729_v12, %v554_v23  ;;  %v519_v33 = vld [vmem:[#allocation2 + $0xa0] sm:$0xff]  ;;  %v538_v37 = vmul.f32 %v5720_v9, %v502_v30  ;;  %430 = vst.msk [vmem:[#allocation2 + $0x48] sm:$0xff] %vm420_vm1, %v397_v57  ;;  %v403_v39 = vld [vmem:[%s5704_s24 + $0x78] sm:$0xff] }
  0x1d   : > { %v621_v28 = vmax.f32 %v589_v25, 0.0  ;;  %v520_v34 = vld [vmem:[#allocation2 + $0xa8] sm:$0xff]  ;;  %v555_v40 = vmul.f32 %v5720_v9, %v519_v33  ;;  %v573_v42 = vadd.f32 %v5729_v12, %v537_v36  ;;  %443 = vst.msk [vmem:[#allocation2 + $0xb0] sm:$0xff] %vm420_vm1, %v410_v58 }
  0x1e   : > { %v635_v31 = vpack.c.bf16 %v604_v26, %v603_v24  ;;  %v622_v32 = vmax.f32 %v590_v27, 0.0  ;;  %v556_v41 = vmul.f32 %v5720_v9, %v520_v34  ;;  %v574_v43 = vadd.f32 %v5729_v12, %v538_v37  ;;  %v503_v51 = vld [vmem:[#allocation2 + $0x20] sm:$0xff]  ;;  %444 = vst.msk [vmem:[#allocation2 + $0xb8] sm:$0xff] %vm420_vm1, %v411_v59 }
  0x1f   : > { %v591_v44 = vadd.f32 %v5729_v12, %v555_v40  ;;  %v605_v46 = vmax.f32 %v573_v42, 0.0  ;;  %v504_v52 = vld [vmem:[#allocation2 + $0x28] sm:$0xff]  ;;  %v539_v54 = vmul.f32 %v5720_v9, %v503_v51  ;;  %431 = vst.msk [vmem:[#allocation2 + $0x50] sm:$0xff] %vm420_vm1, %v398_v15  ;;  %v400_v27 = vld [vmem:[%s5704_s24 + $0x60] sm:$0xff]  ;;  %v5616_v51 = vmov 0.0  }
  0x20   : > { %5418 = vmatmul.msk.bf16.vlgmr.msra.gmra.mxu0 %vm420_vm1, %v635_v31  ;;  %v644_v35 = vpack.c.bf16 %v622_v32, %v621_v28  ;;  %v592_v45 = vadd.f32 %v5729_v12, %v556_v41  ;;  %v606_v47 = vmax.f32 %v574_v43, 0.0  ;;  %v540_v55 = vmul.f32 %v5720_v9, %v504_v52  ;;  %v505_v5 = vld [vmem:[#allocation2 + $0x30] sm:$0xff]  ;;  %432 = vst.msk [vmem:[#allocation2 + $0x58] sm:$0xff] %vm420_vm1, %v399_v16  ;;  %v401_v28 = vld [vmem:[%s5704_s24 + $0x68] sm:$0xff]  ;;  %v412_v40 = vld [vmem:[%s5704_s24 + $0xc0] sm:$0xff] }
  0x21   : > { %v623_v48 = vmax.f32 %v591_v44, 0.0  ;;  %v575_v60 = vadd.f32 %v5729_v12, %v539_v54  ;;  %v506_v6 = vld [vmem:[#allocation2 + $0x38] sm:$0xff]  ;;  %v541_v11 = vmul.f32 %v5720_v9, %v505_v5  ;;  %433 = vst.msk [vmem:[#allocation2 + $0x60] sm:$0xff] %vm420_vm1, %v400_v27  ;;  %v413_v41 = vld [vmem:[%s5704_s24 + $0xc8] sm:$0xff] }
  0x22   : > { %5427 = vmatmul.msk.bf16.vlgmr.msra.gmra.mxu3 %vm420_vm1, %v644_v35  ;;  %v624_v49 = vmax.f32 %v592_v45, 0.0  ;;  %v636_v50 = vpack.c.bf16 %v606_v47, %v605_v46  ;;  %v576_v61 = vadd.f32 %v5729_v12, %v540_v55  ;;  %v542_v13 = vmul.f32 %v5720_v9, %v506_v6  ;;  %v507_v23 = vld [vmem:[#allocation2 + $0x40] sm:$0xff]  ;;  %434 = vst.msk [vmem:[#allocation2 + $0x68] sm:$0xff] %vm420_vm1, %v401_v28  ;;  %v415_v5 = vld [vmem:[%s5704_s24 + $0xd8] sm:$0xff] }
  0x23   : > { %v607_v62 = vmax.f32 %v575_v60, 0.0  ;;  %v577_v18 = vadd.f32 %v5729_v12, %v541_v11  ;;  %v508_v24 = vld [vmem:[#allocation2 + $0x48] sm:$0xff]  ;;  %v543_v25 = vmul.f32 %v5720_v9, %v507_v23  ;;  %435 = vst.msk [vmem:[#allocation2 + $0x70] sm:$0xff] %vm420_vm1, %v402_v38  ;;  %v404_v60 = vld [vmem:[%s5704_s24 + $0x80] sm:$0xff] }
  0x24   : > { %v645_v53 = vpack.c.bf16 %v624_v49, %v623_v48  ;;  %v608_v63 = vmax.f32 %v576_v61, 0.0  ;;  %v521_v0 = vld [vmem:[#allocation2 + $0xb0] sm:$0xff]  ;;  %v578_v19 = vadd.f32 %v5729_v12, %v542_v13  ;;  %v544_v26 = vmul.f32 %v5720_v9, %v508_v24  ;;  %436 = vst.msk [vmem:[#allocation2 + $0x78] sm:$0xff] %vm420_vm1, %v403_v39  ;;  %v405_v61 = vld [vmem:[%s5704_s24 + $0x88] sm:$0xff]  ;;  %v5918_v38 = vld [vmem:[%s8189_s4] ss:$0 sm:$0xff] }
  0x25   : > { %v522_v1 = vld [vmem:[#allocation2 + $0xb8] sm:$0xff]  ;;  %v557_v2 = vmul.f32 %v5720_v9, %v521_v0  ;;  %v609_v20 = vmax.f32 %v577_v18, 0.0  ;;  %v579_v29 = vadd.f32 %v5729_v12, %v543_v25  ;;  %445 = vst.msk [vmem:[#allocation2 + $0xc0] sm:$0xff] %vm420_vm1, %v412_v40 }
  0x26   : > { %v637_v3 = vpack.c.bf16 %v608_v63, %v607_v62  ;;  %v558_v4 = vmul.f32 %v5720_v9, %v522_v1  ;;  %v610_v21 = vmax.f32 %v578_v19, 0.0  ;;  %v580_v30 = vadd.f32 %v5729_v12, %v544_v26  ;;  %v509_v34 = vld [vmem:[#allocation2 + $0x50] sm:$0xff]  ;;  %446 = vst.msk [vmem:[#allocation2 + $0xc8] sm:$0xff] %vm420_vm1, %v413_v41 }
  0x27   : > { %v593_v7 = vadd.f32 %v5729_v12, %v557_v2  ;;  %v611_v31 = vmax.f32 %v579_v29, 0.0  ;;  %v510_v35 = vld [vmem:[#allocation2 + $0x58] sm:$0xff]  ;;  %v545_v36 = vmul.f32 %v5720_v9, %v509_v34  ;;  %454 = vst.msk [vmem:[#allocation3] sm:$0xff] %vm453_vm2, %v5616_v51 }
  0x28   : > { %v594_v8 = vadd.f32 %v5729_v12, %v558_v4  ;;  %v638_v22 = vpack.c.bf16 %v610_v21, %v609_v20  ;;  %v612_v32 = vmax.f32 %v580_v30, 0.0  ;;  %v546_v37 = vmul.f32 %v5720_v9, %v510_v35  ;;  %v511_v52 = vld [vmem:[#allocation2 + $0x60] sm:$0xff]  ;;  %455 = vst.msk [vmem:[#allocation3 + $0x8] sm:$0xff] %vm453_vm2, %v5616_v51  ;;  %v414_v4 = vld [vmem:[%s5704_s24 + $0xd0] sm:$0xff] }
  0x29   : > { %v625_v10 = vmax.f32 %v593_v7, 0.0  ;;  %v581_v42 = vadd.f32 %v5729_v12, %v545_v36  ;;  %459 = vst.msk [vmem:[#allocation3 + $0x198] sm:$0xff] %vm453_vm2, %v5616_v51  ;;  %v547_v57 = vmul.f32 %v5720_v9, %v511_v52 }
  0x2a   : > { %v626_v14 = vmax.f32 %v594_v8, 0.0  ;;  %v639_v33 = vpack.c.bf16 %v612_v32, %v611_v31  ;;  %v582_v43 = vadd.f32 %v5729_v12, %v546_v37  ;;  %460 = vst.msk [vmem:[#allocation3 + $0x1a0] sm:$0xff] %vm453_vm2, %v5616_v51  ;;  %v513_v8 = vld [vmem:[#allocation2 + $0x70] sm:$0xff] }
  0x2b   : > { %v613_v44 = vmax.f32 %v581_v42, 0.0  ;;  %457 = vst.msk [vmem:[#allocation3 + $0x10] sm:$0x3] %vm456_vm3, %v5616_v51  ;;  %v583_v63 = vadd.f32 %v5729_v12, %v547_v57  ;;  %v549_v11 = vmul.f32 %v5720_v9, %v513_v8 }
  0x2c   : > { %v646_v17 = vpack.c.bf16 %v626_v14, %v625_v10  ;;  %v614_v45 = vmax.f32 %v582_v43, 0.0  ;;  %v523_v46 = vld [vmem:[#allocation2 + $0xc0] sm:$0xff]  ;;  %461 = vst.msk [vmem:[#allocation3 + $0x1a8] sm:$0x3] %vm456_vm3, %v5616_v51  ;;  %v514_v10 = vld [vmem:[#allocation2 + $0x78] sm:$0xff] }
  0x2d   : > { %v524_v47 = vld [vmem:[#allocation2 + $0xc8] sm:$0xff]  ;;  %v559_v48 = vmul.f32 %v5720_v9, %v523_v46  ;;  %437 = vst.msk [vmem:[#allocation2 + $0x80] sm:$0xff] %vm420_vm1, %v404_v60  ;;  %v615_v2 = vmax.f32 %v583_v63, 0.0  ;;  %v550_v13 = vmul.f32 %v5720_v9, %v514_v10  ;;  %v585_v19 = vadd.f32 %v5729_v12, %v549_v11  ;;  %v416_v43 = vld [vmem:[%s5704_s24 + $0xe0] sm:$0xff] }
  0x2e   : > { %v640_v49 = vpack.c.bf16 %v614_v45, %v613_v44  ;;  %438 = vst.msk [vmem:[#allocation2 + $0x88] sm:$0xff] %vm420_vm1, %v405_v61  ;;  %v417_v44 = vld [vmem:[%s5704_s24 + $0xe8] sm:$0xff] }
  0x2f   : > { %v595_v54 = vadd.f32 %v5729_v12, %v559_v48  ;;  %v926_v1 = vld [vmem:[#allocation3 + $0x1] sm:$0xff]  ;;  %447 = vst.msk [vmem:[#allocation2 + $0xd0] sm:$0xff] %vm420_vm1, %v414_v4  ;;  %v586_v20 = vadd.f32 %v5729_v12, %v550_v13  ;;  %v617_v25 = vmax.f32 %v585_v19, 0.0 }
  0x30   : > { %5419 = vmatmul.msk.bf16.gmra.mxu0 %vm420_vm1, %v636_v50  ;;  %v560_v50 = vmul.f32 %v5720_v9, %v524_v47  ;;  %990 = vrot.lane.b32.xlu0 %v926_v1, %s5617_s29  ;;  %448 = vst.msk [vmem:[#allocation2 + $0xd8] sm:$0xff] %vm420_vm1, %v415_v5  ;;  %v1119_v27 = vld [vmem:[#allocation3 + $0x2] sm:$0xff] }
  0x31   : > { %v627_v56 = vmax.f32 %v595_v54, 0.0  ;;  %481 = vst.msk [vmem:[#allocation3 + $0x11] sm:$0x1] %vm462_vm4, %v5616_v51  ;;  %v618_v26 = vmax.f32 %v586_v20, 0.0  ;;  %1183 = vrot.lane.b32.xlu2 %v1119_v27, %s5618_s30 }
  0x32   : > { %5428 = vmatmul.msk.bf16.gmra.mxu3 %vm420_vm1, %v645_v53  ;;  %v512_v53 = vld [vmem:[#allocation2 + $0x68] sm:$0xff]  ;;  %v596_v55 = vadd.f32 %v5729_v12, %v560_v50  ;;  %463 = vst.msk [vmem:[#allocation3] sm:$0x1] %vm462_vm4, %v5616_v51 }
  0x33   : > { %v548_v58 = vmul.f32 %v5720_v9, %v512_v53  ;;  %v927_v6 = vld [vmem:[#allocation3 + $0x9] sm:$0xff]  ;;  %464 = vst.msk [vmem:[#allocation3 + $0x18] sm:$0x1] %vm462_vm4, %v5616_v51  ;;  %v642_v29 = vpack.c.bf16 %v618_v26, %v617_v25 }
  0x34   : > { %v628_v59 = vmax.f32 %v596_v55, 0.0  ;;  %465 = vst.msk [vmem:[#allocation3 + $0x30] sm:$0x1] %vm462_vm4, %v5616_v51  ;;  %v515_v30 = vld [vmem:[#allocation2 + $0x80] sm:$0xff] }
  0x35   : > { %v584_v0 = vadd.f32 %v5729_v12, %v548_v58  ;;  %466 = vst.msk [vmem:[#allocation3 + $0x48] sm:$0x1] %vm462_vm4, %v5616_v51  ;;  %v516_v31 = vld [vmem:[#allocation2 + $0x88] sm:$0xff]  ;;  %v551_v32 = vmul.f32 %v5720_v9, %v515_v30 }
  0x36   : > { %v647_v62 = vpack.c.bf16 %v628_v59, %v627_v56  ;;  %467 = vst.msk [vmem:[#allocation3 + $0x60] sm:$0x1] %vm462_vm4, %v5616_v51  ;;  %v525_v14 = vld [vmem:[#allocation2 + $0xd0] sm:$0xff] }
  0x37   : > { %468 = vst.msk [vmem:[#allocation3 + $0x78] sm:$0x1] %vm462_vm4, %v5616_v51  ;;  %v526_v15 = vld [vmem:[#allocation2 + $0xd8] sm:$0xff]  ;;  %v561_v16 = vmul.f32 %v5720_v9, %v525_v14  ;;  %v587_v34 = vadd.f32 %v5729_v12, %v551_v32 }
  0x38   : > { %992 = vrot.lane.b32.xlu0 %v927_v6, %s5617_s29  ;;  %469 = vst.msk [vmem:[#allocation3 + $0x90] sm:$0x1] %vm462_vm4, %v5616_v51  ;;  %v562_v18 = vmul.f32 %v5720_v9, %v526_v15 }
  0x39   : > { %470 = vst.msk [vmem:[#allocation3 + $0xa8] sm:$0x1] %vm462_vm4, %v5616_v51  ;;  %v597_v21 = vadd.f32 %v5729_v12, %v561_v16  ;;  %v619_v36 = vmax.f32 %v587_v34, 0.0 }
  0x3a   : > { %471 = vst.msk [vmem:[#allocation3 + $0xc0] sm:$0x1] %vm462_vm4, %v5616_v51 }
  0x3b   : > { %472 = vst.msk [vmem:[#allocation3 + $0xd8] sm:$0x1] %vm462_vm4, %v5616_v51  ;;  %v629_v23 = vmax.f32 %v597_v21, 0.0 }
  0x3c   : > { %473 = vst.msk [vmem:[#allocation3 + $0xf0] sm:$0x1] %vm462_vm4, %v5616_v51 }
  0x3d   : > { %474 = vst.msk [vmem:[#allocation3 + $0x108] sm:$0x1] %vm462_vm4, %v5616_v51 }
  0x3e   : > { %475 = vst.msk [vmem:[#allocation3 + $0x120] sm:$0x1] %vm462_vm4, %v5616_v51 }
  0x3f   : > { %476 = vst.msk [vmem:[#allocation3 + $0x138] sm:$0x1] %vm462_vm4, %v5616_v51 }
  0x40   : > { %5420 = vmatmul.msk.bf16.gmra.mxu0 %vm420_vm1, %v637_v3  ;;  %v616_v3 = vmax.f32 %v584_v0, 0.0  ;;  %477 = vst.msk [vmem:[#allocation3 + $0x150] sm:$0x1] %vm462_vm4, %v5616_v51 }
  0x41   : > { %478 = vst.msk [vmem:[#allocation3 + $0x168] sm:$0x1] %vm462_vm4, %v5616_v51 }
  0x42   : > { %5429 = vmatmul.msk.bf16.gmra.mxu3 %vm420_vm1, %v646_v17  ;;  %v641_v7 = vpack.c.bf16 %v616_v3, %v615_v2  ;;  %v1120_v17 = vld [vmem:[#allocation3 + $0xa] sm:$0xff]  ;;  %479 = vst.msk [vmem:[#allocation3 + $0x180] sm:$0x1] %vm462_vm4, %v5616_v51 }
  0x43   : > { %1185 = vrot.lane.b32.xlu0 %v1120_v17, %s5618_s30  ;;  %480 = vst.msk [vmem:[#allocation3 + $0x198] sm:$0x1] %vm462_vm4, %v5616_v51 }
  0x44   : > { %482 = vst.msk [vmem:[#allocation3 + $0x29] sm:$0x1] %vm462_vm4, %v5616_v51 }
  0x45   : > { %483 = vst.msk [vmem:[#allocation3 + $0x41] sm:$0x1] %vm462_vm4, %v5616_v51 }
  0x46   : > { %484 = vst.msk [vmem:[#allocation3 + $0x59] sm:$0x1] %vm462_vm4, %v5616_v51 }
  0x47   : > { %485 = vst.msk [vmem:[#allocation3 + $0x71] sm:$0x1] %vm462_vm4, %v5616_v51 }
  0x48   : > { %486 = vst.msk [vmem:[#allocation3 + $0x89] sm:$0x1] %vm462_vm4, %v5616_v51 }
  0x49   : > { %487 = vst.msk [vmem:[#allocation3 + $0xa1] sm:$0x1] %vm462_vm4, %v5616_v51 }
  0x4a   : > { %488 = vst.msk [vmem:[#allocation3 + $0xb9] sm:$0x1] %vm462_vm4, %v5616_v51 }
  0x4b   : > { %489 = vst.msk [vmem:[#allocation3 + $0xd1] sm:$0x1] %vm462_vm4, %v5616_v51 }
  0x4c   : > { %490 = vst.msk [vmem:[#allocation3 + $0xe9] sm:$0x1] %vm462_vm4, %v5616_v51 }
  0x4d   : > { %491 = vst.msk [vmem:[#allocation3 + $0x101] sm:$0x1] %vm462_vm4, %v5616_v51 }
  0x4e   : > { %492 = vst.msk [vmem:[#allocation3 + $0x119] sm:$0x1] %vm462_vm4, %v5616_v51 }
  0x4f   : > { %493 = vst.msk [vmem:[#allocation3 + $0x131] sm:$0x1] %vm462_vm4, %v5616_v51 }
  0x50   : > { %5421 = vmatmul.msk.bf16.gmra.mxu0 %vm420_vm1, %v638_v22  ;;  %v598_v22 = vadd.f32 %v5729_v12, %v562_v18  ;;  %494 = vst.msk [vmem:[#allocation3 + $0x149] sm:$0x1] %vm462_vm4, %v5616_v51 }
  0x51   : > { %495 = vst.msk [vmem:[#allocation3 + $0x161] sm:$0x1] %vm462_vm4, %v5616_v51 }
  0x52   : > { %5430 = vmatmul.msk.bf16.gmra.mxu3 %vm420_vm1, %v647_v62  ;;  %v630_v24 = vmax.f32 %v598_v22, 0.0  ;;  %496 = vst.msk [vmem:[#allocation3 + $0x179] sm:$0x1] %vm462_vm4, %v5616_v51 }
  0x53   : > { %497 = vst.msk [vmem:[#allocation3 + $0x191] sm:$0x1] %vm462_vm4, %v5616_v51 }
  0x54   : > { %v648_v28 = vpack.c.bf16 %v630_v24, %v629_v23  ;;  %498 = vst.msk [vmem:[#allocation3 + $0x1a9] sm:$0x1] %vm462_vm4, %v5616_v51 }
  0x55   : > { %449 = vst.msk [vmem:[#allocation2 + $0xe0] sm:$0xff] %vm420_vm1, %v416_v43 }
  0x56   : > { %450 = vst.msk [vmem:[#allocation2 + $0xe8] sm:$0xff] %vm420_vm1, %v417_v44 }
  0x5c   : > { %v527_v53 = vld [vmem:[#allocation2 + $0xe0] sm:$0xff] }
  0x5d   : > { %v528_v54 = vld [vmem:[#allocation2 + $0xe8] sm:$0xff]  ;;  %v563_v55 = vmul.f32 %v5720_v9, %v527_v53 }
  0x5e   : > { %v564_v56 = vmul.f32 %v5720_v9, %v528_v54 }
  0x5f   : > { %v599_v59 = vadd.f32 %v5729_v12, %v563_v55 }
  0x60   : > { %5422 = vmatmul.msk.bf16.gmra.mxu0 %vm420_vm1, %v639_v33  ;;  %v552_v33 = vmul.f32 %v5720_v9, %v516_v31  ;;  %v600_v62 = vadd.f32 %v5729_v12, %v564_v56 }
  0x61   : > { %v631_v63 = vmax.f32 %v599_v59, 0.0 }
  0x62   : > { %5431 = vmatmul.msk.bf16.gmra.mxu3 %vm420_vm1, %v648_v28  ;;  %v588_v35 = vadd.f32 %v5729_v12, %v552_v33  ;;  %v632_v2 = vmax.f32 %v600_v62, 0.0 }
  0x64   : > { %v620_v37 = vmax.f32 %v588_v35, 0.0  ;;  %v649_v6 = vpack.c.bf16 %v632_v2, %v631_v63 }
  0x66   : > { %v643_v39 = vpack.c.bf16 %v620_v37, %v619_v36 }
  0x70   : > { %5423 = vmatmul.msk.bf16.gmra.mxu0 %vm420_vm1, %v640_v49 }
  0x72   : > { %5432 = vmatmul.msk.bf16.gmra.mxu3 %vm420_vm1, %v649_v6 }
  0x80   : > { %5424 = vmatmul.msk.bf16.gmra.mxu0 %vm420_vm1, %v641_v7 }
  0x90   : > { %5425 = vmatmul.msk.bf16.gmra.mxu0 %vm420_vm1, %v642_v29 }
  0x9d   : > { %v717_v40 = vpop.f32.mrf.mxu0 }
  0x9e   : > { %v718_v41 = vadd.f32 %v5918_v38, %v717_v40 }
  0xa0   : > { %v797_v42 = vmax.f32 %v718_v41, 0.0  ;;  %5426 = vmatmul.msk.bf16.gmra.mxu0 %vm420_vm1, %v643_v39 }
  0xa2   : > { %830 = vst.msk [vmem:[#allocation3 + $0x19] sm:$0xff] %vm453_vm2, %v797_v42 }
  0xa5   : > { %v762_v45 = vpop.f32.mrf.mxu3  ;;  %v719_v46 = vpop.f32.mrf.mxu0 }
  0xa6   : > { %v763_v47 = vadd.f32 %v5918_v38, %v762_v45  ;;  %v720_v48 = vadd.f32 %v5918_v38, %v719_v46 }
  0xa8   : > { %v815_v49 = vmax.f32 %v763_v47, 0.0  ;;  %v798_v50 = vmax.f32 %v720_v48, 0.0  ;;  %v418_v47 = vld [vmem:[%s5704_s24 + $0xf0] sm:$0xff]  ;;  %v419_v48 = vld [vmem:[%s5704_s24 + $0xf8] sm:$0xff]  ;;  %s5624_s24 = smov 8  }
  0xa9   : > { %v1505_v51 = vld [vmem:[#allocation3 + $0x19] sm:$0xff]  ;;  %451 = vst.msk [vmem:[#allocation2 + $0xf0] sm:$0xff] %vm420_vm1, %v418_v47 }
  0xaa   : > { %v1312_v52 = vld [vmem:[#allocation3 + $0x18] sm:$0xff]  ;;  %848 = vst.msk [vmem:[#allocation3 + $0xf1] sm:$0xff] %vm453_vm2, %v815_v49  ;;  %1569 = vrot.lane.b32.xlu0 %v1505_v51, %s5619_s14  ;;  %994 = vrot.lane.b32.xlu1 %v1505_v51, %s5617_s29 }
  0xab   : > { %831 = vst.msk [vmem:[#allocation3 + $0x21] sm:$0xff] %vm453_vm2, %v798_v50 }
  0xac   : > { %896 = vst.msk [vmem:[#allocation4 + $0x20] sm:$0xff] %vm453_vm2, %v1312_v52 }
  0xad   : > { %v764_v57 = vpop.f32.mrf.mxu3  ;;  %v722_v58 = vpop.f32.mrf.mxu0  ;;  %452 = vst.msk [vmem:[#allocation2 + $0xf8] sm:$0xff] %vm420_vm1, %v419_v48 }
  0xae   : > { %v765_v60 = vadd.f32 %v5918_v38, %v764_v57  ;;  %v723_v61 = vadd.f32 %v5918_v38, %v722_v58 }
  0xb0   : > { %v816_v0 = vmax.f32 %v765_v60, 0.0  ;;  %v799_v1 = vmax.f32 %v723_v61, 0.0  ;;  %v529_v59 = vld [vmem:[#allocation2 + $0xf0] sm:$0xff] }
  0xb1   : > { %v946_v3 = vld [vmem:[#allocation3 + $0xf1] sm:$0xff]  ;;  %v565_v61 = vmul.f32 %v5720_v9, %v529_v59 }
  0xb2   : > { %v1330_v4 = vld [vmem:[#allocation3 + $0xf0] sm:$0xff]  ;;  %849 = vst.msk [vmem:[#allocation3 + $0xf9] sm:$0xff] %vm453_vm2, %v816_v0  ;;  %1030 = vrot.lane.b32.xlu2 %v946_v3, %s5617_s29  ;;  %1376 = vrot.lane.b32.xlu1 %v1312_v52, %s5620_s15  ;;  %v1313_v5 = vld [vmem:[#allocation3 + $0x20] sm:$0xff] }
  0xb3   : > { %832 = vst.msk [vmem:[#allocation3 + $0x31] sm:$0xff] %vm453_vm2, %v799_v1  ;;  %v1122_v16 = vld [vmem:[#allocation3 + $0x22] sm:$0xff]  ;;  %v1121_v37 = vld [vmem:[#allocation3 + $0x1a] sm:$0xff]  ;;  %v601_v1 = vadd.f32 %v5729_v12, %v565_v61 }
  0xb4   : > { %914 = vst.msk [vmem:[#allocation4 + $0x140] sm:$0xff] %vm453_vm2, %v1330_v4  ;;  %v929_v28 = vld [vmem:[#allocation3 + $0x21] sm:$0xff]  ;;  %v530_v60 = vld [vmem:[#allocation2 + $0xf8] sm:$0xff] }
  0xb5   : > { %v724_v7 = vpop.f32.mrf.mxu0  ;;  %v767_v8 = vpop.f32.mrf.mxu3  ;;  %897 = vst.msk [vmem:[#allocation4 + $0x30] sm:$0xff] %vm453_vm2, %v1313_v5  ;;  %v566_v63 = vmul.f32 %v5720_v9, %v530_v60 }
  0xb6   : > { %v725_v10 = vadd.f32 %v5918_v38, %v724_v7  ;;  %v768_v11 = vadd.f32 %v5918_v38, %v767_v8 }
  0xb7   : > { %v602_v2 = vadd.f32 %v5729_v12, %v566_v63 }
  0xb8   : > { %v800_v13 = vmax.f32 %v725_v10, 0.0  ;;  %v817_v14 = vmax.f32 %v768_v11, 0.0  ;;  %v862_v10 = vld [vmem:[#allocation3] sm:$0xff] }
  0xb9   : > { %v5961_v15 = vld [vmem:[#allocation3 + $0xf2] sm:$0xff]  ;;  %v1140_v19 = vld [vmem:[#allocation3 + $0xfa] sm:$0xff]  ;;  %v634_v7 = vmax.f32 %v602_v2, 0.0  ;;  %894 = vst.msk [vmem:[#allocation4] sm:$0xff] %vm453_vm2, %v862_v10 }
  0xba   : > { %v947_v17 = vld [vmem:[#allocation3 + $0xf9] sm:$0xff]  ;;  %2326 = vst.msk [vmem:[#allocation4 + $0x108] sm:$0xff] %vm453_vm2, %v5961_v15  ;;  %1189 = vrot.lane.b32.xlu2 %v1122_v16, %s5618_s30  ;;  %1412 = vrot.lane.b32.xlu1 %v1330_v4, %s5620_s15  ;;  %v1314_v21 = vld [vmem:[#allocation3 + $0x30] sm:$0xff]  ;;  %v633_v4 = vmax.f32 %v601_v1, 0.0 }
  0xbb   : > { %1032 = vrot.lane.b32.xlu0 %v947_v17, %s5617_s29  ;;  %v1331_v18 = vld [vmem:[#allocation3 + $0xf8] sm:$0xff]  ;;  %833 = vst.msk [vmem:[#allocation3 + $0x39] sm:$0xff] %vm453_vm2, %v800_v13 }
  0xbc   : > { %850 = vst.msk [vmem:[#allocation3 + $0x109] sm:$0xff] %vm453_vm2, %v817_v14  ;;  %v930_v55 = vld [vmem:[#allocation3 + $0x31] sm:$0xff]  ;;  %v650_v8 = vpack.c.bf16 %v634_v7, %v633_v4 }
  0xbd   : > { %v727_v20 = vpop.f32.mrf.mxu0  ;;  %v769_v22 = vpop.f32.mrf.mxu3  ;;  %915 = vst.msk [vmem:[#allocation4 + $0x150] sm:$0xff] %vm453_vm2, %v1331_v18 }
  0xbe   : > { %v728_v23 = vadd.f32 %v5918_v38, %v727_v20  ;;  %v770_v24 = vadd.f32 %v5918_v38, %v769_v22  ;;  %898 = vst.msk [vmem:[#allocation4 + $0x40] sm:$0xff] %vm453_vm2, %v1314_v21  ;;  %5433 = vmatmul.msk.bf16.gmra.mxu3 %vm420_vm1, %v650_v8  ;;  %v5570_v8 = vld [vmem:[%s8190_s5 + $0x40] sm:$0xff] }
  0xbf   : > { %2327 = vst.msk [vmem:[#allocation4 + $0x118] sm:$0xff] %vm453_vm2, %v1140_v19  ;;  %5582 = vmatpush.bf16.msra.mxu2 %v5570_v8 }
  0xc0   : > { %v801_v25 = vmax.f32 %v728_v23, 0.0  ;;  %v818_v26 = vmax.f32 %v770_v24, 0.0 }
  0xc2   : > { %v2278_v27 = vld [vmem:[#allocation3 + $0x32] sm:$0xff]  ;;  %834 = vst.msk [vmem:[#allocation3 + $0x49] sm:$0xff] %vm453_vm2, %v801_v25  ;;  %1378 = vrot.lane.b32.xlu2 %v1313_v5, %s5620_s15  ;;  %996 = vrot.lane.b32.xlu1 %v929_v28, %s5617_s29  ;;  %v2279_v33 = vld [vmem:[#allocation3 + $0x3a] sm:$0xff] }
  0xc3   : > { %1380 = vrot.lane.b32.xlu0 %v1314_v21, %s5620_s15  ;;  %2310 = vst.msk [vmem:[#allocation4 + $0x8] sm:$0xff] %vm453_vm2, %v2278_v27  ;;  %v5980_v29 = vld [vmem:[#allocation3 + $0x38] sm:$0xff]  ;;  %v1332_v31 = vld [vmem:[#allocation3 + $0x108] sm:$0xff] }
  0xc4   : > { %851 = vst.msk [vmem:[#allocation3 + $0x111] sm:$0xff] %vm453_vm2, %v818_v26  ;;  %v1508_v54 = vld [vmem:[#allocation3 + $0x39] sm:$0xff]  ;;  %v948_v9 = vld [vmem:[#allocation3 + $0x109] sm:$0xff] }
  0xc5   : > { %v729_v30 = vpop.f32.mrf.mxu0  ;;  %899 = vst.msk [vmem:[#allocation4 + $0x50] sm:$0xff] %vm453_vm2, %v5980_v29  ;;  %v772_v34 = vpop.f32.mrf.mxu3  ;;  %v1124_v20 = vld [vmem:[#allocation3 + $0x3a] sm:$0xff] }
  0xc6   : > { %v730_v32 = vadd.f32 %v5918_v38, %v729_v30  ;;  %916 = vst.msk [vmem:[#allocation4 + $0x160] sm:$0xff] %vm453_vm2, %v1332_v31  ;;  %v773_v36 = vadd.f32 %v5918_v38, %v772_v34 }
  0xc7   : > { %2311 = vst.msk [vmem:[#allocation4 + $0x18] sm:$0xff] %vm453_vm2, %v2279_v33 }
  0xc8   : > { %v802_v35 = vmax.f32 %v730_v32, 0.0  ;;  %v819_v39 = vmax.f32 %v773_v36, 0.0 }
  0xc9   : > { %v6021_v57 = vld [vmem:[#allocation3 + $0x48] sm:$0xff] }
  0xca   : > { %835 = vst.msk [vmem:[#allocation3 + $0x51] sm:$0xff] %vm453_vm2, %v802_v35  ;;  %1225 = vrot.lane.b32.xlu2 %v1140_v19, %s5618_s30  ;;  %1187 = vrot.lane.b32.xlu1 %v1121_v37, %s5618_s30  ;;  %v6058_v17 = vld [vmem:[#allocation3 + $0x49] sm:$0xff] }
  0xcb   : > { %1416 = vrot.lane.b32.xlu0 %v1332_v31, %s5620_s15  ;;  %v2296_v40 = vld [vmem:[#allocation3 + $0x10a] sm:$0xff]  ;;  %v5994_v41 = vld [vmem:[#allocation3 + $0x112] sm:$0xff]  ;;  %852 = vst.msk [vmem:[#allocation3 + $0x121] sm:$0xff] %vm453_vm2, %v819_v39  ;;  %v1184_v31 = vpop.permute.xlu2 %1183 }
  0xcc   : > { %2328 = vst.msk [vmem:[#allocation4 + $0x128] sm:$0xff] %vm453_vm2, %v2296_v40  ;;  %v5996_v42 = vld [vmem:[#allocation3 + $0x110] sm:$0xff] }
  0xcd   : > { %v732_v43 = vpop.f32.mrf.mxu0  ;;  %917 = vst.msk [vmem:[#allocation4 + $0x170] sm:$0xff] %vm453_vm2, %v5996_v42  ;;  %v774_v51 = vpop.f32.mrf.mxu3 }
  0xce   : > { %v733_v44 = vadd.f32 %v5918_v38, %v732_v43  ;;  %2329 = vst.msk [vmem:[#allocation4 + $0x138] sm:$0xff] %vm453_vm2, %v5994_v41  ;;  %v775_v53 = vadd.f32 %v5918_v38, %v774_v51 }
  0xcf   : > { %900 = vst.msk [vmem:[#allocation4 + $0x60] sm:$0xff] %vm453_vm2, %v6021_v57 }
  0xd0   : > { %v803_v45 = vmax.f32 %v733_v44, 0.0  ;;  %v820_v56 = vmax.f32 %v775_v53, 0.0 }
  0xd1   : > { %v6004_v46 = vld [vmem:[#allocation3 + $0x4a] sm:$0xff]  ;;  %v2281_v5 = vld [vmem:[#allocation3 + $0x52] sm:$0xff] }
  0xd2   : > { %2312 = vst.msk [vmem:[#allocation4 + $0x28] sm:$0xff] %vm453_vm2, %v6004_v46  ;;  %1414 = vrot.lane.b32.xlu2 %v1331_v18, %s5620_s15  ;;  %1571 = vrot.lane.b32.xlu1 %v929_v28, %s5619_s14  ;;  %v6025_v58 = vld [vmem:[#allocation3 + $0x50] sm:$0xff]  ;;  %v1334_v14 = vld [vmem:[#allocation3 + $0x120] sm:$0xff]  ;;  %v991_v18 = vpop.permute.xlu0 %990  ;;  %v863_v28 = vld [vmem:[#allocation3 + $0x8] sm:$0xff] }
  0xd3   : > { %1191 = vrot.lane.b32.xlu0 %v2278_v27, %s5618_s30  ;;  %836 = vst.msk [vmem:[#allocation3 + $0x61] sm:$0xff] %vm453_vm2, %v803_v45  ;;  %v950_v23 = vld [vmem:[#allocation3 + $0x121] sm:$0xff]  ;;  %v6073_v27 = vld [vmem:[#allocation3 + $0x111] sm:$0xff] }
  0xd4   : > { %853 = vst.msk [vmem:[#allocation3 + $0x129] sm:$0xff] %vm453_vm2, %v820_v56  ;;  %v1126_v33 = vld [vmem:[#allocation3 + $0x52] sm:$0xff] }
  0xd5   : > { %v734_v49 = vpop.f32.mrf.mxu0  ;;  %901 = vst.msk [vmem:[#allocation4 + $0x70] sm:$0xff] %vm453_vm2, %v6025_v58  ;;  %v777_v34 = vpop.f32.mrf.mxu3  ;;  %v1510_v63 = vld [vmem:[#allocation3 + $0x51] sm:$0xff] }
  0xd6   : > { %v735_v50 = vadd.f32 %v5918_v38, %v734_v49  ;;  %2313 = vst.msk [vmem:[#allocation4 + $0x38] sm:$0xff] %vm453_vm2, %v2281_v5  ;;  %v778_v37 = vadd.f32 %v5918_v38, %v777_v34 }
  0xd7   : > { %918 = vst.msk [vmem:[#allocation4 + $0x180] sm:$0xff] %vm453_vm2, %v1334_v14 }
  0xd8   : > { %v804_v52 = vmax.f32 %v735_v50, 0.0  ;;  %1087 = vst.msk [vmem:[#allocation4] sm:$0xff] %vm1086_vm5, %v991_v18 }
  0xd9   : > { %895 = vst.msk [vmem:[#allocation4 + $0x10] sm:$0xff] %vm453_vm2, %v863_v28 }
  0xda   : > { %837 = vst.msk [vmem:[#allocation3 + $0x69] sm:$0xff] %vm453_vm2, %v804_v52  ;;  %998 = vrot.lane.b32.xlu2 %v930_v55, %s5617_s29  ;;  %1223 = vrot.lane.b32.xlu1 %v5961_v15, %s5618_s30  ;;  %v993_v24 = vpop.permute.xlu0 %992  ;;  %v6108_v48 = vld [vmem:[#allocation3 + $0x60] sm:$0xff] }
  0xdb   : > { %1575 = vrot.lane.b32.xlu0 %v1508_v54, %s5619_s14  ;;  %v6046_v12 = vld [vmem:[#allocation3 + $0x122] sm:$0xff]  ;;  %v6050_v11 = vld [vmem:[#allocation3 + $0x12a] sm:$0xff]  ;;  %1088 = vst.msk [vmem:[#allocation4 + $0x10] sm:$0xff] %vm1086_vm5, %v993_v24 }
  0xdc   : > { %2330 = vst.msk [vmem:[#allocation4 + $0x148] sm:$0xff] %vm453_vm2, %v6046_v12  ;;  %v6055_v16 = vld [vmem:[#allocation3 + $0x128] sm:$0xff] }
  0xdd   : > { %v737_v62 = vpop.f32.mrf.mxu0  ;;  %2331 = vst.msk [vmem:[#allocation4 + $0x158] sm:$0xff] %vm453_vm2, %v6050_v11  ;;  %v779_v43 = vpop.f32.mrf.mxu3  ;;  %v1511_v5 = vld [vmem:[#allocation3 + $0x61] sm:$0xff] }
  0xde   : > { %v738_v0 = vadd.f32 %v5918_v38, %v737_v62  ;;  %919 = vst.msk [vmem:[#allocation4 + $0x190] sm:$0xff] %vm453_vm2, %v6055_v16  ;;  %v780_v45 = vadd.f32 %v5918_v38, %v779_v43 }
  0xdf   : > { %1280 = vst.msk [vmem:[#allocation4] sm:$0xff] %vm1279_vm6, %v1184_v31 }
  0xe0   : > { %v805_v3 = vmax.f32 %v738_v0, 0.0  ;;  %902 = vst.msk [vmem:[#allocation4 + $0x80] sm:$0xff] %vm453_vm2, %v6108_v48 }
  0xe1   : > { %v6037_v6 = vld [vmem:[#allocation3 + $0x62] sm:$0xff]  ;;  %v2283_v52 = vld [vmem:[#allocation3 + $0x6a] sm:$0xff] }
  0xe2   : > { %2314 = vst.msk [vmem:[#allocation4 + $0x48] sm:$0xff] %vm453_vm2, %v6037_v6  ;;  %1573 = vrot.lane.b32.xlu2 %v930_v55, %s5619_s14  ;;  %1034 = vrot.lane.b32.xlu1 %v948_v9, %s5617_s29  ;;  %v1186_v35 = vpop.permute.xlu0 %1185  ;;  %v6111_v49 = vld [vmem:[#allocation3 + $0x68] sm:$0xff] }
  0xe3   : > { %1227 = vrot.lane.b32.xlu0 %v2296_v40, %s5618_s30  ;;  %838 = vst.msk [vmem:[#allocation3 + $0x79] sm:$0xff] %vm453_vm2, %v805_v3  ;;  %v6166_v9 = vld [vmem:[#allocation3 + $0x129] sm:$0xff] }
  0xe4   : > { %1281 = vst.msk [vmem:[#allocation4 + $0x10] sm:$0xff] %vm1279_vm6, %v1186_v35 }
  0xe5   : > { %v739_v13 = vpop.f32.mrf.mxu0  ;;  %903 = vst.msk [vmem:[#allocation4 + $0x90] sm:$0xff] %vm453_vm2, %v6111_v49  ;;  %v782_v59 = vpop.f32.mrf.mxu3 }
  0xe6   : > { %v740_v15 = vadd.f32 %v5918_v38, %v739_v13  ;;  %2315 = vst.msk [vmem:[#allocation4 + $0x58] sm:$0xff] %vm453_vm2, %v2283_v52  ;;  %v783_v60 = vadd.f32 %v5918_v38, %v782_v59 }
  0xe8   : > { %v806_v19 = vmax.f32 %v740_v15, 0.0  ;;  %v823_v0 = vmax.f32 %v783_v60, 0.0  ;;  %v935_v15 = vld [vmem:[#allocation3 + $0x69] sm:$0xff] }
  0xea   : > { %839 = vst.msk [vmem:[#allocation3 + $0x81] sm:$0xff] %vm453_vm2, %v806_v19  ;;  %1000 = vrot.lane.b32.xlu2 %v1508_v54, %s5617_s29  ;;  %1193 = vrot.lane.b32.xlu1 %v1124_v20, %s5618_s30  ;;  %v6157_v2 = vld [vmem:[#allocation3 + $0x78] sm:$0xff] }
  0xeb   : > { %1002 = vrot.lane.b32.xlu0 %v6058_v17, %s5617_s29  ;;  %856 = vst.msk [vmem:[#allocation3 + $0x151] sm:$0xff] %vm453_vm2, %v823_v0  ;;  %v2377_v0 = vld [vmem:[#allocation4 + $0x118] sm:$0xff] }
  0xec   : > { %904 = vst.msk [vmem:[#allocation4 + $0xa0] sm:$0xff] %vm453_vm2, %v6157_v2 }
  0xed   : > { %v742_v21 = vpop.f32.mrf.mxu0 }
  0xee   : > { %v743_v22 = vadd.f32 %v5918_v38, %v742_v21 }
  0xf0   : > { %v807_v25 = vmax.f32 %v743_v22, 0.0 }
  0xf1   : > { %v6071_v26 = vld [vmem:[#allocation3 + $0x7a] sm:$0xff] }
  0xf2   : > { %2316 = vst.msk [vmem:[#allocation4 + $0x68] sm:$0xff] %vm453_vm2, %v6071_v26  ;;  %1036 = vrot.lane.b32.xlu2 %v6073_v27, %s5617_s29  ;;  %1382 = vrot.lane.b32.xlu1 %v5980_v29, %s5620_s15  ;;  %v821_v29 = vmax.f32 %v778_v37, 0.0  ;;  %v6173_v10 = vld [vmem:[#allocation3 + $0x150] sm:$0xff]  ;;  %v6193_v28 = vld [vmem:[#allocation3 + $0x80] sm:$0xff] }
  0xf3   : > { %1038 = vrot.lane.b32.xlu0 %v950_v23, %s5617_s29  ;;  %840 = vst.msk [vmem:[#allocation3 + $0x91] sm:$0xff] %vm453_vm2, %v807_v25 }
  0xf4   : > { %854 = vst.msk [vmem:[#allocation3 + $0x139] sm:$0xff] %vm453_vm2, %v821_v29 }
  0xf5   : > { %v744_v30 = vpop.f32.mrf.mxu0  ;;  %922 = vst.msk [vmem:[#allocation4 + $0x1c0] sm:$0xff] %vm453_vm2, %v6173_v10 }
  0xf6   : > { %v745_v32 = vadd.f32 %v5918_v38, %v744_v30  ;;  %905 = vst.msk [vmem:[#allocation4 + $0xb0] sm:$0xff] %vm453_vm2, %v6193_v28 }
  0xf8   : > { %v808_v36 = vmax.f32 %v745_v32, 0.0  ;;  %v2285_v32 = vld [vmem:[#allocation3 + $0x82] sm:$0xff] }
  0xf9   : > { %2317 = vst.msk [vmem:[#allocation4 + $0x78] sm:$0xff] %vm453_vm2, %v2285_v32 }
  0xfa   : > { %841 = vst.msk [vmem:[#allocation3 + $0x99] sm:$0xff] %vm453_vm2, %v808_v36  ;;  %1384 = vrot.lane.b32.xlu2 %v6021_v57, %s5620_s15  ;;  %1229 = vrot.lane.b32.xlu1 %v5994_v41, %s5618_s30  ;;  %v822_v41 = vmax.f32 %v780_v45, 0.0 }
  0xfb   : > { %1197 = vrot.lane.b32.xlu0 %v1126_v33, %s5618_s30  ;;  %v6130_v55 = vld [vmem:[#allocation3 + $0x138] sm:$0xff] }
  0xfc   : > { %855 = vst.msk [vmem:[#allocation3 + $0x141] sm:$0xff] %vm453_vm2, %v822_v41  ;;  %v6197_v31 = vld [vmem:[#allocation3 + $0x139] sm:$0xff] }
  0xfd   : > { %v747_v39 = vpop.f32.mrf.mxu0  ;;  %920 = vst.msk [vmem:[#allocation4 + $0x1a0] sm:$0xff] %vm453_vm2, %v6130_v55 }
  0xfe   : > { %v748_v40 = vadd.f32 %v5918_v38, %v747_v39 }
 0x100   : > { %v809_v44 = vmax.f32 %v748_v40, 0.0 }
 0x101   : > { %v6098_v47 = vld [vmem:[#allocation3 + $0x92] sm:$0xff] }
 0x102   : > { %2318 = vst.msk [vmem:[#allocation4 + $0x88] sm:$0xff] %vm453_vm2, %v6098_v47  ;;  %1420 = vrot.lane.b32.xlu2 %v1334_v14, %s5620_s15  ;;  %1418 = vrot.lane.b32.xlu1 %v5996_v42, %s5620_s15 }
 0x103   : > { %1386 = vrot.lane.b32.xlu0 %v6025_v58, %s5620_s15  ;;  %842 = vst.msk [vmem:[#allocation3 + $0xa9] sm:$0xff] %vm453_vm2, %v809_v44  ;;  %v6126_v42 = vld [vmem:[#allocation3 + $0x13a] sm:$0xff]  ;;  %v6132_v56 = vld [vmem:[#allocation3 + $0x142] sm:$0xff]  ;;  %v6232_v44 = vld [vmem:[#allocation3 + $0x6a] sm:$0xff] }
 0x104   : > { %2332 = vst.msk [vmem:[#allocation4 + $0x168] sm:$0xff] %vm453_vm2, %v6126_v42  ;;  %v6135_v58 = vld [vmem:[#allocation3 + $0x140] sm:$0xff] }
 0x105   : > { %v749_v50 = vpop.f32.mrf.mxu0  ;;  %2333 = vst.msk [vmem:[#allocation4 + $0x178] sm:$0xff] %vm453_vm2, %v6132_v56  ;;  %v6195_v30 = vld [vmem:[#allocation3 + $0x141] sm:$0xff] }
 0x106   : > { %v750_v51 = vadd.f32 %v5918_v38, %v749_v50  ;;  %921 = vst.msk [vmem:[#allocation4 + $0x1b0] sm:$0xff] %vm453_vm2, %v6135_v58 }
 0x108   : > { %v810_v53 = vmax.f32 %v750_v51, 0.0 }
 0x10a   : > { %843 = vst.msk [vmem:[#allocation3 + $0xb1] sm:$0xff] %vm453_vm2, %v810_v53  ;;  %1195 = vrot.lane.b32.xlu2 %v6004_v46, %s5618_s30  ;;  %1577 = vrot.lane.b32.xlu1 %v6058_v17, %s5619_s14 }
 0x10b   : > { %1233 = vrot.lane.b32.xlu0 %v6050_v11, %s5618_s30 }
 0x10c   : > { %v1031_v54 = vpop.permute.xlu2 %1030 }
 0x10d   : > { %1107 = vst.msk [vmem:[#allocation4 + $0x140] sm:$0xff] %vm1086_vm5, %v1031_v54  ;;  %v752_v57 = vpop.f32.mrf.mxu0 }
 0x10e   : > { %v753_v46 = vadd.f32 %v5918_v38, %v752_v57 }
 0x110   : > { %v811_v61 = vmax.f32 %v753_v46, 0.0 }
 0x111   : > { %v6145_v62 = vld [vmem:[#allocation3 + $0xaa] sm:$0xff] }
 0x112   : > { %2320 = vst.msk [vmem:[#allocation4 + $0xa8] sm:$0xff] %vm453_vm2, %v6145_v62  ;;  %1579 = vrot.lane.b32.xlu2 %v1510_v63, %s5619_s14  ;;  %1004 = vrot.lane.b32.xlu1 %v1510_v63, %s5617_s29  ;;  %v2375_v63 = vld [vmem:[#allocation4 + $0x108] sm:$0xff] }
 0x113   : > { %1422 = vrot.lane.b32.xlu0 %v6055_v16, %s5620_s15  ;;  %844 = vst.msk [vmem:[#allocation3 + $0xc1] sm:$0xff] %vm453_vm2, %v811_v61  ;;  %v784_v16 = vpop.f32.mrf.mxu3 }
 0x114   : > { %v6154_v1 = vpop.permute.xlu2 %1189  ;;  %v785_v18 = vadd.f32 %v5918_v38, %v784_v16  ;;  %v6304_v16 = vld [vmem:[#allocation3 + $0x91] sm:$0xff] }
 0x115   : > { %v754_v3 = vpop.f32.mrf.mxu0 }
 0x116   : > { %v755_v4 = vadd.f32 %v5918_v38, %v754_v3  ;;  %v824_v20 = vmax.f32 %v785_v18, 0.0  ;;  %v2423_v3 = vpack.c.bf16 %v2377_v0, %v2375_v63 }
 0x118   : > { %v812_v7 = vmax.f32 %v755_v4, 0.0  ;;  %857 = vst.msk [vmem:[#allocation3 + $0x159] sm:$0xff] %vm453_vm2, %v824_v20 }
 0x11a   : > { %845 = vst.msk [vmem:[#allocation3 + $0xc9] sm:$0xff] %vm453_vm2, %v812_v7  ;;  %1231 = vrot.lane.b32.xlu2 %v6046_v12, %s5618_s30  ;;  %1040 = vrot.lane.b32.xlu1 %v6166_v9, %s5617_s29 }
 0x11b   : > { %1581 = vrot.lane.b32.xlu0 %v1511_v5, %s5619_s14  ;;  %v787_v50 = vpop.f32.mrf.mxu3 }
 0x11c   : > { %v1379_v11 = vpop.permute.xlu2 %1378  ;;  %v995_v12 = vpop.permute.xlu1 %994  ;;  %v788_v51 = vadd.f32 %v5918_v38, %v787_v50  ;;  %v6344_v50 = vld [vmem:[#allocation3 + $0x9a] sm:$0xff] }
 0x11d   : > { %1474 = vst.msk [vmem:[#allocation4 + $0x10] sm:$0xff] %vm1472_vm7, %v1379_v11  ;;  %v757_v13 = vpop.f32.mrf.mxu0  ;;  %v1570_v21 = vpop.permute.xlu0 %1569  ;;  %v6296_v11 = vld [vmem:[#allocation3 + $0x151] sm:$0xff] }
 0x11e   : > { %1089 = vst.msk [vmem:[#allocation4 + $0x20] sm:$0xff] %vm1086_vm5, %v995_v12  ;;  %v758_v14 = vadd.f32 %v5918_v38, %v757_v13  ;;  %v825_v53 = vmax.f32 %v788_v51, 0.0  ;;  %v2383_v51 = vld [vmem:[#allocation4 + $0x148] sm:$0xff] }
 0x11f   : > { %v6210_v34 = vld [vmem:[#allocation3 + $0x152] sm:$0xff]  ;;  %v6220_v29 = vld [vmem:[#allocation3 + $0x15a] sm:$0xff] }
 0x120   : > { %v813_v17 = vmax.f32 %v758_v14, 0.0  ;;  %2334 = vst.msk [vmem:[#allocation4 + $0x188] sm:$0xff] %vm453_vm2, %v6210_v34  ;;  %v6222_v39 = vld [vmem:[#allocation3 + $0x158] sm:$0xff] }
 0x121   : > { %v6181_v19 = vld [vmem:[#allocation3 + $0xc2] sm:$0xff]  ;;  %2335 = vst.msk [vmem:[#allocation4 + $0x198] sm:$0xff] %vm453_vm2, %v6220_v29 }
 0x122   : > { %2322 = vst.msk [vmem:[#allocation4 + $0xc8] sm:$0xff] %vm453_vm2, %v6181_v19  ;;  %1006 = vrot.lane.b32.xlu2 %v1511_v5, %s5617_s29  ;;  %1388 = vrot.lane.b32.xlu1 %v6108_v48, %s5620_s15 }
 0x123   : > { %1008 = vrot.lane.b32.xlu0 %v935_v15, %s5617_s29  ;;  %846 = vst.msk [vmem:[#allocation3 + $0xd9] sm:$0xff] %vm453_vm2, %v813_v17 }
 0x124   : > { %v1226_v22 = vpop.permute.xlu2 %1225  ;;  %v1377_v23 = vpop.permute.xlu1 %1376  ;;  %923 = vst.msk [vmem:[#allocation4 + $0x1d0] sm:$0xff] %vm453_vm2, %v6222_v39 }
 0x125   : > { %v759_v24 = vpop.f32.mrf.mxu0  ;;  %1473 = vst.msk [vmem:[#allocation4] sm:$0xff] %vm1472_vm7, %v1377_v23  ;;  %v6321_v23 = vld [vmem:[#allocation3 + $0x82] sm:$0xff] }
 0x126   : > { %v760_v25 = vadd.f32 %v5918_v38, %v759_v24  ;;  %1666 = vst.msk [vmem:[#allocation4] sm:$0xff] %vm1665_vm8, %v1570_v21  ;;  %v2379_v21 = vld [vmem:[#allocation4 + $0x128] sm:$0xff] }
 0x127   : > { %858 = vst.msk [vmem:[#allocation3 + $0x169] sm:$0xff] %vm453_vm2, %v825_v53 }
 0x128   : > { %v814_v33 = vmax.f32 %v760_v25, 0.0 }
 0x12a   : > { %847 = vst.msk [vmem:[#allocation3 + $0xe1] sm:$0xff] %vm453_vm2, %v814_v33  ;;  %1042 = vrot.lane.b32.xlu2 %v6197_v31, %s5617_s29  ;;  %1424 = vrot.lane.b32.xlu1 %v6130_v55, %s5620_s15 }
 0x12b   : > { %1044 = vrot.lane.b32.xlu0 %v6195_v30, %s5617_s29 }
 0x12c   : > { %v6212_v36 = vpop.permute.xlu2 %1414  ;;  %v6217_v37 = vpop.permute.xlu1 %1412 }
 0x12d   : > { %v1033_v35 = vpop.permute.xlu0 %1032 }
 0x12e   : > { %1108 = vst.msk [vmem:[#allocation4 + $0x150] sm:$0xff] %vm1086_vm5, %v1033_v35  ;;  %v1340_v12 = vld [vmem:[#allocation3 + $0x168] sm:$0xff]  ;;  %v6333_v35 = vld [vmem:[#allocation3 + $0x159] sm:$0xff] }
 0x12f   : > { %1301 = vst.msk [vmem:[#allocation4 + $0x150] sm:$0xff] %vm1279_vm6, %v1226_v22  ;;  %v2381_v22 = vld [vmem:[#allocation4 + $0x138] sm:$0xff] }
 0x130   : > { %924 = vst.msk [vmem:[#allocation4 + $0x1e0] sm:$0xff] %vm453_vm2, %v1340_v12  ;;  %v2425_v24 = vpack.c.bf16 %v2381_v22, %v2379_v21  ;;  %v6403_v22 = vld [vmem:[#allocation3 + $0xa9] sm:$0xff] }
 0x131   : > { %v6228_v40 = vld [vmem:[#allocation3 + $0xda] sm:$0xff]  ;;  %v6230_v43 = vld [vmem:[#allocation3 + $0xe2] sm:$0xff] }
 0x132   : > { %2324 = vst.msk [vmem:[#allocation4 + $0xe8] sm:$0xff] %vm453_vm2, %v6228_v40  ;;  %1201 = vrot.lane.b32.xlu2 %v6232_v44, %s5618_s30  ;;  %1199 = vrot.lane.b32.xlu1 %v6037_v6, %s5618_s30 }
 0x133   : > { %1392 = vrot.lane.b32.xlu0 %v6157_v2, %s5620_s15  ;;  %2325 = vst.msk [vmem:[#allocation4 + $0xf8] sm:$0xff] %vm453_vm2, %v6230_v43  ;;  %v6268_v2 = vld [vmem:[#allocation3 + $0x81] sm:$0xff] }
 0x134   : > { %v999_v41 = vpop.permute.xlu2 %998  ;;  %v997_v48 = vpop.permute.xlu1 %996 }
 0x135   : > { %v1381_v45 = vpop.permute.xlu0 %1380  ;;  %1091 = vst.msk [vmem:[#allocation4 + $0x40] sm:$0xff] %vm1086_vm5, %v999_v41 }
 0x136   : > { %1090 = vst.msk [vmem:[#allocation4 + $0x30] sm:$0xff] %vm1086_vm5, %v997_v48 }
 0x137   : > { %1283 = vst.msk [vmem:[#allocation4 + $0x30] sm:$0xff] %vm1279_vm6, %v6154_v1  ;;  %v789_v1 = vpop.f32.mrf.mxu3 }
 0x139   : > { %v2371_v52 = vld [vmem:[#allocation4 + $0xe8] sm:$0xff] }
 0x13a   : > { %1390 = vrot.lane.b32.xlu2 %v6111_v49, %s5620_s15  ;;  %v2373_v6 = vld [vmem:[#allocation4 + $0xf8] sm:$0xff]  ;;  %1583 = vrot.lane.b32.xlu1 %v935_v15, %s5619_s14 }
 0x13b   : > { %1428 = vrot.lane.b32.xlu0 %v6173_v10, %s5620_s15  ;;  %v2421_v54 = vpack.c.bf16 %v2373_v6, %v2371_v52  ;;  %v2287_v10 = vld [vmem:[#allocation3 + $0x9a] sm:$0xff]  ;;  %v2385_v52 = vld [vmem:[#allocation4 + $0x158] sm:$0xff] }
 0x13c   : > { %v1574_v57 = vpop.permute.xlu2 %1573  ;;  %v1188_v46 = vpop.permute.xlu1 %1187  ;;  %2319 = vst.msk [vmem:[#allocation4 + $0x98] sm:$0xff] %vm453_vm2, %v2287_v10  ;;  %v2289_v10 = vld [vmem:[#allocation3 + $0xb2] sm:$0xff] }
 0x13d   : > { %v1417_v55 = vpop.permute.xlu0 %1416  ;;  %5477 = vmatmul.msk.bf16.vlgmr.msra.gmra.mxu2 %vm453_vm2, %v2421_v54  ;;  %1282 = vst.msk [vmem:[#allocation4 + $0x20] sm:$0xff] %vm1279_vm6, %v1188_v46  ;;  %v2427_v54 = vpack.c.bf16 %v2385_v52, %v2383_v51  ;;  %v6419_v51 = vld [vmem:[#allocation3 + $0xc8] sm:$0xff] }
 0x13e   : > { %1475 = vst.msk [vmem:[#allocation4 + $0x20] sm:$0xff] %vm1472_vm7, %v1381_v45 }
 0x13f   : > { %1668 = vst.msk [vmem:[#allocation4 + $0x20] sm:$0xff] %vm1665_vm8, %v1574_v57 }
 0x140   : > { %2321 = vst.msk [vmem:[#allocation4 + $0xb8] sm:$0xff] %vm453_vm2, %v2289_v10 }
 0x141   : > { %v792_v6 = vpop.f32.mrf.mxu3  ;;  %911 = vst.msk [vmem:[#allocation4 + $0x110] sm:$0xff] %vm453_vm2, %v6419_v51 }
 0x142   : > { %1237 = vrot.lane.b32.xlu2 %v6132_v56, %s5618_s30  ;;  %1235 = vrot.lane.b32.xlu1 %v6126_v42, %s5618_s30  ;;  %v6275_v42 = vld [vmem:[#allocation3 + $0x79] sm:$0xff]  ;;  %v6277_v56 = vld [vmem:[#allocation3 + $0x90] sm:$0xff]  ;;  %v793_v53 = vadd.f32 %v5918_v38, %v792_v6 }
 0x143   : > { %1203 = vrot.lane.b32.xlu0 %v6071_v26, %s5618_s30  ;;  %v790_v26 = vadd.f32 %v5918_v38, %v789_v1  ;;  %906 = vst.msk [vmem:[#allocation4 + $0xc0] sm:$0xff] %vm453_vm2, %v6277_v56 }
 0x144   : > { %v1001_v60 = vpop.permute.xlu2 %1000  ;;  %v1572_v61 = vpop.permute.xlu1 %1571 }
 0x145   : > { %v1192_v59 = vpop.permute.xlu0 %1191  ;;  %1092 = vst.msk [vmem:[#allocation4 + $0x50] sm:$0xff] %vm1086_vm5, %v1001_v60  ;;  %v826_v7 = vmax.f32 %v790_v26, 0.0  ;;  %v6366_v26 = vld [vmem:[#allocation3 + $0xa8] sm:$0xff] }
 0x146   : > { %1284 = vst.msk [vmem:[#allocation4 + $0x40] sm:$0xff] %vm1279_vm6, %v1192_v59 }
 0x147   : > { %1667 = vst.msk [vmem:[#allocation4 + $0x10] sm:$0xff] %vm1665_vm8, %v1572_v61 }
 0x148   : > { %859 = vst.msk [vmem:[#allocation3 + $0x171] sm:$0xff] %vm453_vm2, %v826_v7 }
 0x149   : > { %v794_v60 = vpop.f32.mrf.mxu3  ;;  %908 = vst.msk [vmem:[#allocation4 + $0xe0] sm:$0xff] %vm453_vm2, %v6366_v26 }
 0x14a   : > { %1426 = vrot.lane.b32.xlu2 %v6135_v58, %s5620_s15  ;;  %1010 = vrot.lane.b32.xlu1 %v6275_v42, %s5617_s29  ;;  %v6286_v58 = vld [vmem:[#allocation3 + $0x98] sm:$0xff]  ;;  %v795_v61 = vadd.f32 %v5918_v38, %v794_v60 }
 0x14b   : > { %1587 = vrot.lane.b32.xlu0 %v6268_v2, %s5619_s14  ;;  %907 = vst.msk [vmem:[#allocation4 + $0xd0] sm:$0xff] %vm453_vm2, %v6286_v58  ;;  %v2387_v38 = vld [vmem:[#allocation4 + $0x168] sm:$0xff] }
 0x14c   : > { %v1037_v5 = vpop.permute.xlu2 %1036  ;;  %v1224_v8 = vpop.permute.xlu1 %1223  ;;  %v828_v1 = vmax.f32 %v795_v61, 0.0 }
 0x14d   : > { %v1576_v4 = vpop.permute.xlu0 %1575  ;;  %1110 = vst.msk [vmem:[#allocation4 + $0x170] sm:$0xff] %vm1086_vm5, %v1037_v5  ;;  %5478 = vmatmul.msk.bf16.gmra.mxu2 %vm453_vm2, %v2423_v3  ;;  %v2389_v3 = vld [vmem:[#allocation4 + $0x178] sm:$0xff]  ;;  %v6380_v5 = vld [vmem:[#allocation3 + $0xc0] sm:$0xff] }
 0x14e   : > { %1300 = vst.msk [vmem:[#allocation4 + $0x140] sm:$0xff] %vm1279_vm6, %v1224_v8 }
 0x14f   : > { %1493 = vst.msk [vmem:[#allocation4 + $0x140] sm:$0xff] %vm1472_vm7, %v1417_v55  ;;  %v6307_v17 = vld [vmem:[#allocation3 + $0x16a] sm:$0xff]  ;;  %v6309_v18 = vld [vmem:[#allocation3 + $0x172] sm:$0xff]  ;;  %v827_v55 = vmax.f32 %v793_v53, 0.0 }
 0x150   : > { %v6311_v20 = vld [vmem:[#allocation3 + $0x170] sm:$0xff]  ;;  %2336 = vst.msk [vmem:[#allocation4 + $0x1a8] sm:$0xff] %vm453_vm2, %v6307_v17 }
 0x151   : > { %2337 = vst.msk [vmem:[#allocation4 + $0x1b8] sm:$0xff] %vm453_vm2, %v6309_v18 }
 0x152   : > { %1585 = vrot.lane.b32.xlu2 %v6275_v42, %s5619_s14  ;;  %1046 = vrot.lane.b32.xlu1 %v6296_v11, %s5617_s29  ;;  %925 = vst.msk [vmem:[#allocation4 + $0x1f0] sm:$0xff] %vm453_vm2, %v6311_v20 }
 0x153   : > { %1239 = vrot.lane.b32.xlu0 %v6210_v34, %s5618_s30  ;;  %v6331_v34 = vld [vmem:[#allocation3 + $0x169] sm:$0xff]  ;;  %860 = vst.msk [vmem:[#allocation3 + $0x181] sm:$0xff] %vm453_vm2, %v827_v55 }
 0x154   : > { %v1385_v14 = vpop.permute.xlu2 %1384  ;;  %v1035_v15 = vpop.permute.xlu1 %1034  ;;  %861 = vst.msk [vmem:[#allocation3 + $0x189] sm:$0xff] %vm453_vm2, %v828_v1 }
 0x155   : > { %v1228_v13 = vpop.permute.xlu0 %1227  ;;  %1477 = vst.msk [vmem:[#allocation4 + $0x40] sm:$0xff] %vm1472_vm7, %v1385_v14  ;;  %v6390_v14 = vld [vmem:[#allocation3 + $0x99] sm:$0xff] }
 0x156   : > { %1109 = vst.msk [vmem:[#allocation4 + $0x160] sm:$0xff] %vm1086_vm5, %v1035_v15 }
 0x157   : > { %1302 = vst.msk [vmem:[#allocation4 + $0x160] sm:$0xff] %vm1279_vm6, %v1228_v13  ;;  %v2395_v55 = vld [vmem:[#allocation4 + $0x1a8] sm:$0xff] }
 0x158   : > { %910 = vst.msk [vmem:[#allocation4 + $0x100] sm:$0xff] %vm453_vm2, %v6380_v5 }
 0x15a   : > { %1012 = vrot.lane.b32.xlu2 %v6268_v2, %s5617_s29  ;;  %1205 = vrot.lane.b32.xlu1 %v6321_v23, %s5618_s30 }
 0x15b   : > { %1014 = vrot.lane.b32.xlu0 %v6304_v16, %s5617_s29  ;;  %v2307_v13 = vld [vmem:[#allocation3 + $0x18a] sm:$0xff] }
 0x15c   : > { %v1421_v32 = vpop.permute.xlu2 %1420  ;;  %v1194_v33 = vpop.permute.xlu1 %1193  ;;  %2339 = vst.msk [vmem:[#allocation4 + $0x1d8] sm:$0xff] %vm453_vm2, %v2307_v13  ;;  %v6473_v13 = vld [vmem:[#allocation3 + $0xd9] sm:$0xff] }
 0x15d   : > { %v1003_v25 = vpop.permute.xlu0 %1002  ;;  %5479 = vmatmul.msk.bf16.gmra.mxu2 %vm453_vm2, %v2425_v24  ;;  %1495 = vst.msk [vmem:[#allocation4 + $0x160] sm:$0xff] %vm1472_vm7, %v1421_v32  ;;  %v2393_v24 = vld [vmem:[#allocation4 + $0x198] sm:$0xff] }
 0x15e   : > { %1093 = vst.msk [vmem:[#allocation4 + $0x60] sm:$0xff] %vm1086_vm5, %v1003_v25  ;;  %v6410_v25 = vld [vmem:[#allocation3 + $0x171] sm:$0xff] }
 0x15f   : > { %1285 = vst.msk [vmem:[#allocation4 + $0x50] sm:$0xff] %vm1279_vm6, %v1194_v33 }
 0x162   : > { %1048 = vrot.lane.b32.xlu2 %v6333_v35, %s5617_s29  ;;  %1394 = vrot.lane.b32.xlu1 %v6193_v28, %s5620_s15 }
 0x163   : > { %1050 = vrot.lane.b32.xlu0 %v6331_v34, %s5617_s29 }
 0x164   : > { %v1196_v41 = vpop.permute.xlu2 %1195  ;;  %v1383_v48 = vpop.permute.xlu1 %1382 }
 0x165   : > { %v1039_v45 = vpop.permute.xlu0 %1038  ;;  %1286 = vst.msk [vmem:[#allocation4 + $0x60] sm:$0xff] %vm1279_vm6, %v1196_v41 }
 0x166   : > { %1111 = vst.msk [vmem:[#allocation4 + $0x180] sm:$0xff] %vm1086_vm5, %v1039_v45 }
 0x167   : > { %1476 = vst.msk [vmem:[#allocation4 + $0x30] sm:$0xff] %vm1472_vm7, %v1383_v48  ;;  %v6417_v48 = vld [vmem:[#allocation3 + $0xb1] sm:$0xff] }
 0x168   : > { %1669 = vst.msk [vmem:[#allocation4 + $0x30] sm:$0xff] %vm1665_vm8, %v1576_v4  ;;  %v6369_v4 = vld [vmem:[#allocation3 + $0xb0] sm:$0xff] }
 0x169   : > { %909 = vst.msk [vmem:[#allocation4 + $0xf0] sm:$0xff] %vm453_vm2, %v6369_v4 }
 0x16a   : > { %1396 = vrot.lane.b32.xlu2 %v6277_v56, %s5620_s15  ;;  %1241 = vrot.lane.b32.xlu1 %v6220_v29, %s5618_s30 }
 0x16b   : > { %1209 = vrot.lane.b32.xlu0 %v6344_v50, %s5618_s30 }
 0x16c   : > { %v1580_v46 = vpop.permute.xlu2 %1579  ;;  %v1230_v59 = vpop.permute.xlu1 %1229 }
 0x16d   : > { %v1198_v57 = vpop.permute.xlu0 %1197  ;;  %5480 = vmatmul.msk.bf16.gmra.mxu2 %vm453_vm2, %v2427_v54  ;;  %1303 = vst.msk [vmem:[#allocation4 + $0x170] sm:$0xff] %vm1279_vm6, %v1230_v59  ;;  %v1342_v54 = vld [vmem:[#allocation3 + $0x180] sm:$0xff] }
 0x172   : > { %1432 = vrot.lane.b32.xlu2 %v1340_v12, %s5620_s15  ;;  %1430 = vrot.lane.b32.xlu1 %v6222_v39, %s5620_s15  ;;  %v2429_v39 = vpack.c.bf16 %v2389_v3, %v2387_v38  ;;  %v2306_v12 = vld [vmem:[#allocation3 + $0x182] sm:$0xff] }
 0x173   : > { %1398 = vrot.lane.b32.xlu0 %v6286_v58, %s5620_s15  ;;  %2338 = vst.msk [vmem:[#allocation4 + $0x1c8] sm:$0xff] %vm453_vm2, %v2306_v12 }
 0x174   : > { %v1232_v63 = vpop.permute.xlu2 %1231  ;;  %v1419_v0 = vpop.permute.xlu1 %1418 }
 0x175   : > { %v1387_v29 = vpop.permute.xlu0 %1386  ;;  %1304 = vst.msk [vmem:[#allocation4 + $0x180] sm:$0xff] %vm1279_vm6, %v1232_v63  ;;  %v6446_v63 = vld [vmem:[#allocation3 + $0xe0] sm:$0xff] }
 0x176   : > { %1478 = vst.msk [vmem:[#allocation4 + $0x50] sm:$0xff] %vm1472_vm7, %v1387_v29 }
 0x177   : > { %1671 = vst.msk [vmem:[#allocation4 + $0x50] sm:$0xff] %vm1665_vm8, %v1580_v46  ;;  %v6435_v46 = vld [vmem:[#allocation3 + $0xb2] sm:$0xff] }
 0x178   : > { %1494 = vst.msk [vmem:[#allocation4 + $0x150] sm:$0xff] %vm1472_vm7, %v1419_v0  ;;  %v6454_v0 = vld [vmem:[#allocation3 + $0xd8] sm:$0xff] }
 0x179   : > { %913 = vst.msk [vmem:[#allocation4 + $0x130] sm:$0xff] %vm453_vm2, %v6446_v63 }
 0x17a   : > { %1207 = vrot.lane.b32.xlu2 %v6098_v47, %s5618_s30  ;;  %1589 = vrot.lane.b32.xlu1 %v6304_v16, %s5619_s14  ;;  %912 = vst.msk [vmem:[#allocation4 + $0x120] sm:$0xff] %vm453_vm2, %v6454_v0 }
 0x17b   : > { %1245 = vrot.lane.b32.xlu0 %v6309_v18, %s5618_s30 }
 0x17c   : > { %v1007_v8 = vpop.permute.xlu2 %1006  ;;  %v1578_v47 = vpop.permute.xlu1 %1577 }
 0x17d   : > { %v1234_v7 = vpop.permute.xlu0 %1233  ;;  %1095 = vst.msk [vmem:[#allocation4 + $0x80] sm:$0xff] %vm1086_vm5, %v1007_v8  ;;  %5481 = vmatmul.msk.bf16.gmra.mxu2 %vm453_vm2, %v2429_v39  ;;  %v2399_v39 = vld [vmem:[#allocation4 + $0x1c8] sm:$0xff]  ;;  %v1343_v8 = vld [vmem:[#allocation3 + $0x188] sm:$0xff] }
 0x17e   : > { %1670 = vst.msk [vmem:[#allocation4 + $0x40] sm:$0xff] %vm1665_vm8, %v1578_v47 }
 0x182   : > { %1591 = vrot.lane.b32.xlu2 %v6390_v14, %s5619_s14  ;;  %1016 = vrot.lane.b32.xlu1 %v6390_v14, %s5617_s29 }
 0x183   : > { %1434 = vrot.lane.b32.xlu0 %v6311_v20, %s5620_s15  ;;  %v2391_v20 = vld [vmem:[#allocation4 + $0x188] sm:$0xff] }
 0x184   : > { %v1043_v18 = vpop.permute.xlu2 %1042  ;;  %v1005_v21 = vpop.permute.xlu1 %1004  ;;  %v2431_v32 = vpack.c.bf16 %v2393_v24, %v2391_v20  ;;  %v6490_v24 = vld [vmem:[#allocation3 + $0xca] sm:$0xff] }
 0x185   : > { %v1423_v15 = vpop.permute.xlu0 %1422  ;;  %1113 = vst.msk [vmem:[#allocation4 + $0x1a0] sm:$0xff] %vm1086_vm5, %v1043_v18 }
 0x186   : > { %1496 = vst.msk [vmem:[#allocation4 + $0x170] sm:$0xff] %vm1472_vm7, %v1423_v15  ;;  %v6475_v15 = vld [vmem:[#allocation3 + $0xc1] sm:$0xff] }
 0x187   : > { %1094 = vst.msk [vmem:[#allocation4 + $0x70] sm:$0xff] %vm1086_vm5, %v1005_v21 }
 0x188   : > { %1287 = vst.msk [vmem:[#allocation4 + $0x70] sm:$0xff] %vm1279_vm6, %v1198_v57  ;;  %v2397_v57 = vld [vmem:[#allocation4 + $0x1b8] sm:$0xff] }
 0x189   : > { %v2433_v59 = vpack.c.bf16 %v2397_v57, %v2395_v55  ;;  %v6517_v55 = vld [vmem:[#allocation3 + $0xe1] sm:$0xff] }
 0x18a   : > { %1243 = vrot.lane.b32.xlu2 %v6307_v17, %s5618_s30  ;;  %1052 = vrot.lane.b32.xlu1 %v6410_v25, %s5617_s29  ;;  %v2291_v17 = vld [vmem:[#allocation3 + $0xca] sm:$0xff] }
 0x18b   : > { %1593 = vrot.lane.b32.xlu0 %v6403_v22, %s5619_s14  ;;  %2323 = vst.msk [vmem:[#allocation4 + $0xd8] sm:$0xff] %vm453_vm2, %v2291_v17 }
 0x18c   : > { %v1202_v45 = vpop.permute.xlu2 %1201  ;;  %v1041_v41 = vpop.permute.xlu1 %1040 }
 0x18d   : > { %v1582_v33 = vpop.permute.xlu0 %1581  ;;  %5482 = vmatmul.msk.bf16.gmra.mxu2 %vm453_vm2, %v2431_v32  ;;  %1112 = vst.msk [vmem:[#allocation4 + $0x190] sm:$0xff] %vm1086_vm5, %v1041_v41 }
 0x18e   : > { %1305 = vst.msk [vmem:[#allocation4 + $0x190] sm:$0xff] %vm1279_vm6, %v1234_v7  ;;  %v2401_v7 = vld [vmem:[#allocation4 + $0x1d8] sm:$0xff] }
 0x192   : > { %1018 = vrot.lane.b32.xlu2 %v6403_v22, %s5617_s29  ;;  %1400 = vrot.lane.b32.xlu1 %v6366_v26, %s5620_s15 }
 0x193   : > { %1020 = vrot.lane.b32.xlu0 %v6417_v48, %s5617_s29 }
 0x194   : > { %v1391_v6 = vpop.permute.xlu2 %1390  ;;  %v1389_v53 = vpop.permute.xlu1 %1388 }
 0x195   : > { %v1009_v52 = vpop.permute.xlu0 %1008  ;;  %1480 = vst.msk [vmem:[#allocation4 + $0x70] sm:$0xff] %vm1472_vm7, %v1391_v6 }
 0x196   : > { %1096 = vst.msk [vmem:[#allocation4 + $0x90] sm:$0xff] %vm1086_vm5, %v1009_v52  ;;  %v6506_v52 = vld [vmem:[#allocation3 + $0xf1] sm:$0xff] }
 0x197   : > { %1289 = vst.msk [vmem:[#allocation4 + $0x90] sm:$0xff] %vm1279_vm6, %v1202_v45 }
 0x198   : > { %1479 = vst.msk [vmem:[#allocation4 + $0x60] sm:$0xff] %vm1472_vm7, %v1389_v53 }
 0x199   : > { %1672 = vst.msk [vmem:[#allocation4 + $0x60] sm:$0xff] %vm1665_vm8, %v1582_v33 }
 0x19a   : > { %1213 = vrot.lane.b32.xlu2 %v6435_v46, %s5618_s30  ;;  %1436 = vrot.lane.b32.xlu1 %v1342_v54, %s5620_s15 }
 0x19b   : > { %1404 = vrot.lane.b32.xlu0 %v6380_v5, %s5620_s15 }
 0x19c   : > { %v1238_v61 = vpop.permute.xlu2 %1237  ;;  %v1425_v29 = vpop.permute.xlu1 %1424 }
 0x19d   : > { %v1045_v60 = vpop.permute.xlu0 %1044  ;;  %5483 = vmatmul.msk.bf16.gmra.mxu2 %vm453_vm2, %v2433_v59  ;;  %1497 = vst.msk [vmem:[#allocation4 + $0x180] sm:$0xff] %vm1472_vm7, %v1425_v29 }
 0x19e   : > { %1114 = vst.msk [vmem:[#allocation4 + $0x1b0] sm:$0xff] %vm1086_vm5, %v1045_v60  ;;  %v6529_v60 = vld [vmem:[#allocation3 + $0x109] sm:$0xff] }
 0x19f   : > { %1307 = vst.msk [vmem:[#allocation4 + $0x1b0] sm:$0xff] %vm1279_vm6, %v1238_v61 }
 0x1a2   : > { %1402 = vrot.lane.b32.xlu2 %v6369_v4, %s5620_s15  ;;  %1211 = vrot.lane.b32.xlu1 %v6145_v62, %s5618_s30  ;;  %v2435_v62 = vpack.c.bf16 %v2401_v7, %v2399_v39 }
 0x1a3   : > { %1215 = vrot.lane.b32.xlu0 %v6181_v19, %s5618_s30  ;;  %v6463_v19 = vld [vmem:[#allocation3 + $0xc9] sm:$0xff] }
 0x1a4   : > { %v1427_v38 = vpop.permute.xlu2 %1426  ;;  %v1200_v3 = vpop.permute.xlu1 %1199 }
 0x1a5   : > { %v1393_v1 = vpop.permute.xlu0 %1392  ;;  %1498 = vst.msk [vmem:[#allocation4 + $0x190] sm:$0xff] %vm1472_vm7, %v1427_v38 }
 0x1a6   : > { %1288 = vst.msk [vmem:[#allocation4 + $0x80] sm:$0xff] %vm1279_vm6, %v1200_v3 }
 0x1a7   : > { %1481 = vst.msk [vmem:[#allocation4 + $0x80] sm:$0xff] %vm1472_vm7, %v1393_v1 }
 0x1aa   : > { %1438 = vrot.lane.b32.xlu2 %v1343_v8, %s5620_s15  ;;  %1595 = vrot.lane.b32.xlu1 %v6417_v48, %s5619_s14 }
 0x1ab   : > { %1599 = vrot.lane.b32.xlu0 %v6463_v19, %s5619_s14 }
 0x1ac   : > { %v1586_v47 = vpop.permute.xlu2 %1585  ;;  %v1584_v12 = vpop.permute.xlu1 %1583 }
 0x1ad   : > { %v1429_v10 = vpop.permute.xlu0 %1428  ;;  %1674 = vst.msk [vmem:[#allocation4 + $0x80] sm:$0xff] %vm1665_vm8, %v1586_v47  ;;  %5484 = vmatmul.msk.bf16.gmra.mxu2 %vm453_vm2, %v2435_v62  ;;  %v1699_v62 = vld [vmem:[#allocation3 + $0x22] sm:$0xff]  ;;  %v1702_v47 = vld [vmem:[#allocation3 + $0x4a] sm:$0xff] }
 0x1ae   : > { %1673 = vst.msk [vmem:[#allocation4 + $0x70] sm:$0xff] %vm1665_vm8, %v1584_v12  ;;  %v1698_v12 = vld [vmem:[#allocation3 + $0x1a] sm:$0xff] }
 0x1b2   : > { %1597 = vrot.lane.b32.xlu2 %v6475_v15, %s5619_s14  ;;  %1022 = vrot.lane.b32.xlu1 %v6475_v15, %s5617_s29 }
 0x1b3   : > { %1026 = vrot.lane.b32.xlu0 %v6473_v13, %s5617_s29 }
 0x1b4   : > { %v1013_v21 = vpop.permute.xlu2 %1012  ;;  %v1236_v20 = vpop.permute.xlu1 %1235 }
 0x1b5   : > { %v1204_v18 = vpop.permute.xlu0 %1203  ;;  %1098 = vst.msk [vmem:[#allocation4 + $0xb0] sm:$0xff] %vm1086_vm5, %v1013_v21 }
 0x1b6   : > { %1306 = vst.msk [vmem:[#allocation4 + $0x1a0] sm:$0xff] %vm1279_vm6, %v1236_v20  ;;  %v2085_v20 = vld [vmem:[#allocation3 + $0x31] sm:$0xff] }
 0x1b7   : > { %1499 = vst.msk [vmem:[#allocation4 + $0x1a0] sm:$0xff] %vm1472_vm7, %v1429_v10 }
 0x1ba   : > { %1024 = vrot.lane.b32.xlu2 %v6463_v19, %s5617_s29  ;;  %1217 = vrot.lane.b32.xlu1 %v6490_v24, %s5618_s30 }
 0x1bb   : > { %1221 = vrot.lane.b32.xlu0 %v6230_v43, %s5618_s30 }
 0x1bc   : > { %v1049_v33 = vpop.permute.xlu2 %1048  ;;  %v1011_v45 = vpop.permute.xlu1 %1010 }
 0x1bd   : > { %v1588_v32 = vpop.permute.xlu0 %1587  ;;  %1116 = vst.msk [vmem:[#allocation4 + $0x1d0] sm:$0xff] %vm1086_vm5, %v1049_v33  ;;  %v1700_v33 = vld [vmem:[#allocation3 + $0x32] sm:$0xff] }
 0x1be   : > { %1097 = vst.msk [vmem:[#allocation4 + $0xa0] sm:$0xff] %vm1086_vm5, %v1011_v45 }
 0x1bf   : > { %1290 = vst.msk [vmem:[#allocation4 + $0xa0] sm:$0xff] %vm1279_vm6, %v1204_v18  ;;  %v6572_v18 = vld [vmem:[#allocation3 + $0x189] sm:$0xff] }
 0x1c2   : > { %1408 = vrot.lane.b32.xlu2 %v6454_v0, %s5620_s15  ;;  %1406 = vrot.lane.b32.xlu1 %v6419_v51, %s5620_s15 }
 0x1c3   : > { %1410 = vrot.lane.b32.xlu0 %v6446_v63, %s5620_s15 }
 0x1c4   : > { %v1397_v41 = vpop.permute.xlu2 %1396  ;;  %v1047_v17 = vpop.permute.xlu1 %1046 }
 0x1c5   : > { %v1240_v43 = vpop.permute.xlu0 %1239  ;;  %1483 = vst.msk [vmem:[#allocation4 + $0xa0] sm:$0xff] %vm1472_vm7, %v1397_v41 }
 0x1c6   : > { %1115 = vst.msk [vmem:[#allocation4 + $0x1c0] sm:$0xff] %vm1086_vm5, %v1047_v17  ;;  %v1894_v17 = vld [vmem:[#allocation3 + $0x48] sm:$0xff] }
 0x1c7   : > { %1308 = vst.msk [vmem:[#allocation4 + $0x1c0] sm:$0xff] %vm1279_vm6, %v1240_v43 }
 0x1ca   : > { %1219 = vrot.lane.b32.xlu2 %v6228_v40, %s5618_s30  ;;  %1601 = vrot.lane.b32.xlu1 %v6473_v13, %s5619_s14 }
 0x1cb   : > { %1605 = vrot.lane.b32.xlu0 %v6506_v52, %s5619_s14 }
 0x1cc   : > { %v1433_v53 = vpop.permute.xlu2 %1432  ;;  %v1206_v54 = vpop.permute.xlu1 %1205 }
 0x1cd   : > { %v1015_v6 = vpop.permute.xlu0 %1014  ;;  %1501 = vst.msk [vmem:[#allocation4 + $0x1c0] sm:$0xff] %vm1472_vm7, %v1433_v53  ;;  %v1892_v53 = vld [vmem:[#allocation3 + $0x30] sm:$0xff] }
 0x1ce   : > { %1099 = vst.msk [vmem:[#allocation4 + $0xc0] sm:$0xff] %vm1086_vm5, %v1015_v6  ;;  %v1893_v6 = vld [vmem:[#allocation3 + $0x38] sm:$0xff] }
 0x1cf   : > { %1291 = vst.msk [vmem:[#allocation4 + $0xb0] sm:$0xff] %vm1279_vm6, %v1206_v54 }
 0x1d2   : > { %1603 = vrot.lane.b32.xlu2 %v6517_v55, %s5619_s14  ;;  %1028 = vrot.lane.b32.xlu1 %v6517_v55, %s5617_s29 }
 0x1d3   : > { %1611 = vrot.lane.b32.xlu0 %v6073_v27, %s5619_s14  ;;  %v6535_v27 = vld [vmem:[#allocation3 + $0xf9] sm:$0xff] }
 0x1d4   : > { %v1208_v57 = vpop.permute.xlu2 %1207  ;;  %v1395_v59 = vpop.permute.xlu1 %1394 }
 0x1d5   : > { %v1051_v40 = vpop.permute.xlu0 %1050  ;;  %1292 = vst.msk [vmem:[#allocation4 + $0xc0] sm:$0xff] %vm1279_vm6, %v1208_v57 }
 0x1d6   : > { %1117 = vst.msk [vmem:[#allocation4 + $0x1e0] sm:$0xff] %vm1086_vm5, %v1051_v40 }
 0x1d7   : > { %1482 = vst.msk [vmem:[#allocation4 + $0x90] sm:$0xff] %vm1472_vm7, %v1395_v59  ;;  %v2088_v59 = vld [vmem:[#allocation3 + $0x51] sm:$0xff] }
 0x1d8   : > { %1675 = vst.msk [vmem:[#allocation4 + $0x90] sm:$0xff] %vm1665_vm8, %v1588_v32  ;;  %v1701_v32 = vld [vmem:[#allocation3 + $0x3a] sm:$0xff] }
 0x1da   : > { %1609 = vrot.lane.b32.xlu2 %v6529_v60, %s5619_s14  ;;  %1607 = vrot.lane.b32.xlu1 %v6535_v27, %s5619_s14 }
 0x1db   : > { %1617 = vrot.lane.b32.xlu0 %v6197_v31, %s5619_s14  ;;  %v6544_v31 = vld [vmem:[#allocation3 + $0x121] sm:$0xff] }
 0x1dc   : > { %v1592_v29 = vpop.permute.xlu2 %1591  ;;  %v1242_v1 = vpop.permute.xlu1 %1241 }
 0x1dd   : > { %v1210_v61 = vpop.permute.xlu0 %1209  ;;  %1309 = vst.msk [vmem:[#allocation4 + $0x1d0] sm:$0xff] %vm1279_vm6, %v1242_v1 }
 0x1e2   : > { %1615 = vrot.lane.b32.xlu2 %v6166_v9, %s5619_s14  ;;  %1613 = vrot.lane.b32.xlu1 %v6544_v31, %s5619_s14 }
 0x1e3   : > { %1623 = vrot.lane.b32.xlu0 %v6333_v35, %s5619_s14  ;;  %v6552_v35 = vld [vmem:[#allocation3 + $0x181] sm:$0xff] }
 0x1e4   : > { %v1244_v3 = vpop.permute.xlu2 %1243  ;;  %v1431_v39 = vpop.permute.xlu1 %1430 }
 0x1e5   : > { %v1399_v38 = vpop.permute.xlu0 %1398  ;;  %1310 = vst.msk [vmem:[#allocation4 + $0x1e0] sm:$0xff] %vm1279_vm6, %v1244_v3 }
 0x1e6   : > { %1484 = vst.msk [vmem:[#allocation4 + $0xb0] sm:$0xff] %vm1472_vm7, %v1399_v38 }
 0x1e7   : > { %1677 = vst.msk [vmem:[#allocation4 + $0xb0] sm:$0xff] %vm1665_vm8, %v1592_v29  ;;  %v2086_v29 = vld [vmem:[#allocation3 + $0x39] sm:$0xff] }
 0x1e8   : > { %1500 = vst.msk [vmem:[#allocation4 + $0x1b0] sm:$0xff] %vm1472_vm7, %v1431_v39  ;;  %v1896_v39 = vld [vmem:[#allocation3 + $0x60] sm:$0xff] }
 0x1ea   : > { %1621 = vrot.lane.b32.xlu2 %v6296_v11, %s5619_s14  ;;  %1619 = vrot.lane.b32.xlu1 %v6195_v30, %s5619_s14 }
 0x1eb   : > { %1629 = vrot.lane.b32.xlu0 %v6552_v35, %s5619_s14 }
 0x1ec   : > { %v1019_v7 = vpop.permute.xlu2 %1018  ;;  %v1590_v8 = vpop.permute.xlu1 %1589 }
 0x1ed   : > { %v1246_v9 = vpop.permute.xlu0 %1245  ;;  %1101 = vst.msk [vmem:[#allocation4 + $0xe0] sm:$0xff] %vm1086_vm5, %v1019_v7  ;;  %v1895_v7 = vld [vmem:[#allocation3 + $0x50] sm:$0xff] }
 0x1ee   : > { %1676 = vst.msk [vmem:[#allocation4 + $0xa0] sm:$0xff] %vm1665_vm8, %v1590_v8 }
 0x1f2   : > { %1627 = vrot.lane.b32.xlu2 %v6410_v25, %s5619_s14  ;;  %1625 = vrot.lane.b32.xlu1 %v6331_v34, %s5619_s14 }
 0x1f3   : > { %1764 = vrot.lane.b32.xlu0 %v1699_v62, %s5621_s20 }
 0x1f4   : > { %v1214_v10 = vpop.permute.xlu2 %1213  ;;  %v1017_v30 = vpop.permute.xlu1 %1016 }
 0x1f5   : > { %v1435_v11 = vpop.permute.xlu0 %1434  ;;  %1100 = vst.msk [vmem:[#allocation4 + $0xd0] sm:$0xff] %vm1086_vm5, %v1017_v30  ;;  %v1704_v30 = vld [vmem:[#allocation3 + $0x62] sm:$0xff] }
 0x1f6   : > { %1502 = vst.msk [vmem:[#allocation4 + $0x1d0] sm:$0xff] %vm1472_vm7, %v1435_v11 }
 0x1f7   : > { %1293 = vst.msk [vmem:[#allocation4 + $0xd0] sm:$0xff] %vm1279_vm6, %v1210_v61  ;;  %v1703_v61 = vld [vmem:[#allocation3 + $0x52] sm:$0xff] }
 0x1fa   : > { %1762 = vrot.lane.b32.xlu2 %v1698_v12, %s5621_s20  ;;  %1631 = vrot.lane.b32.xlu1 %v6572_v18, %s5619_s14 }
 0x1fb   : > { %1770 = vrot.lane.b32.xlu0 %v1702_v47, %s5621_s20 }
 0x1fc   : > { %v1403_v25 = vpop.permute.xlu2 %1402  ;;  %v1053_v21 = vpop.permute.xlu1 %1052 }
 0x1fd   : > { %v1594_v34 = vpop.permute.xlu0 %1593  ;;  %1486 = vst.msk [vmem:[#allocation4 + $0xd0] sm:$0xff] %vm1472_vm7, %v1403_v25  ;;  %v2089_v25 = vld [vmem:[#allocation3 + $0x61] sm:$0xff] }
 0x1fe   : > { %1118 = vst.msk [vmem:[#allocation4 + $0x1f0] sm:$0xff] %vm1086_vm5, %v1053_v21 }
 0x1ff   : > { %1311 = vst.msk [vmem:[#allocation4 + $0x1f0] sm:$0xff] %vm1279_vm6, %v1246_v9  ;;  %v2087_v9 = vld [vmem:[#allocation3 + $0x49] sm:$0xff] }
 0x202   : > { %1768 = vrot.lane.b32.xlu2 %v1701_v32, %s5621_s20  ;;  %1766 = vrot.lane.b32.xlu1 %v1700_v33, %s5621_s20  ;;  %v1706_v32 = vld [vmem:[#allocation3 + $0x7a] sm:$0xff] }
 0x203   : > { %2149 = vrot.lane.b32.xlu0 %v2085_v20, %s5622_s22 }
 0x204   : > { %v1439_v43 = vpop.permute.xlu2 %1438  ;;  %v1401_v41 = vpop.permute.xlu1 %1400 }
 0x205   : > { %v1021_v45 = vpop.permute.xlu0 %1020  ;;  %1504 = vst.msk [vmem:[#allocation4 + $0x1f0] sm:$0xff] %vm1472_vm7, %v1439_v43 }
 0x206   : > { %1102 = vst.msk [vmem:[#allocation4 + $0xf0] sm:$0xff] %vm1086_vm5, %v1021_v45 }
 0x207   : > { %1295 = vst.msk [vmem:[#allocation4 + $0xf0] sm:$0xff] %vm1279_vm6, %v1214_v10  ;;  %v2090_v10 = vld [vmem:[#allocation3 + $0x69] sm:$0xff] }
 0x208   : > { %1485 = vst.msk [vmem:[#allocation4 + $0xc0] sm:$0xff] %vm1472_vm7, %v1401_v41 }
 0x209   : > { %1678 = vst.msk [vmem:[#allocation4 + $0xc0] sm:$0xff] %vm1665_vm8, %v1594_v34 }
 0x20a   : > { %1958 = vrot.lane.b32.xlu2 %v1893_v6, %s5623_s23  ;;  %1956 = vrot.lane.b32.xlu1 %v1892_v53, %s5623_s23 }
 0x20b   : > { %1960 = vrot.lane.b32.xlu0 %v1894_v17, %s5623_s23  ;;  %v5568_v17 = vld [vmem:[%s8190_s5 + $0x30] sm:$0xff] }
 0x20c   : > { %v1598_v40 = vpop.permute.xlu2 %1597  ;;  %v1437_v57 = vpop.permute.xlu1 %1436 }
 0x20d   : > { %v1405_v54 = vpop.permute.xlu0 %1404  ;;  %1503 = vst.msk [vmem:[#allocation4 + $0x1e0] sm:$0xff] %vm1472_vm7, %v1437_v57 }
 0x212   : > { %1772 = vrot.lane.b32.xlu2 %v1703_v61, %s5621_s20  ;;  %2151 = vrot.lane.b32.xlu1 %v2086_v29, %s5622_s22  ;;  %v5564_v61 = vld [vmem:[%s8190_s5 + $0x10] sm:$0xff] }
 0x213   : > { %2155 = vrot.lane.b32.xlu0 %v2088_v59, %s5622_s22 }
 0x214   : > { %v1025_v38 = vpop.permute.xlu2 %1024  ;;  %v1212_v3 = vpop.permute.xlu1 %1211 }
 0x215   : > { %v1216_v1 = vpop.permute.xlu0 %1215  ;;  %1104 = vst.msk [vmem:[#allocation4 + $0x110] sm:$0xff] %vm1086_vm5, %v1025_v38  ;;  %v5562_v38 = vld [vmem:[%s8190_s5] sm:$0xff] }
 0x216   : > { %1294 = vst.msk [vmem:[#allocation4 + $0xe0] sm:$0xff] %vm1279_vm6, %v1212_v3 }
 0x217   : > { %1487 = vst.msk [vmem:[#allocation4 + $0xe0] sm:$0xff] %vm1472_vm7, %v1405_v54 }
 0x218   : > { %1680 = vst.msk [vmem:[#allocation4 + $0xe0] sm:$0xff] %vm1665_vm8, %v1598_v40  ;;  %v5566_v40 = vld [vmem:[%s8190_s5 + $0x20] sm:$0xff] }
 0x21a   : > { %2153 = vrot.lane.b32.xlu2 %v2087_v9, %s5622_s22  ;;  %1962 = vrot.lane.b32.xlu1 %v1895_v7, %s5623_s23  ;;  %v1714_v7 = vld [vmem:[#allocation3 + $0xda] sm:$0xff] }
 0x21b   : > { %1964 = vrot.lane.b32.xlu0 %v1896_v39, %s5623_s23 }
 0x21c   : > { %v1409_v62 = vpop.permute.xlu2 %1408  ;;  %v1596_v11 = vpop.permute.xlu1 %1595 }
 0x21d   : > { %v1600_v8 = vpop.permute.xlu0 %1599  ;;  %1679 = vst.msk [vmem:[#allocation4 + $0xd0] sm:$0xff] %vm1665_vm8, %v1596_v11 }
 0x222   : > { %1776 = vrot.lane.b32.xlu2 %v6232_v44, %s5621_s20  ;;  %1774 = vrot.lane.b32.xlu1 %v1704_v30, %s5621_s20 }
 0x223   : > { %2159 = vrot.lane.b32.xlu0 %v2090_v10, %s5622_s22 }
 0x224   : > { %v1220_v12 = vpop.permute.xlu2 %1219  ;;  %v1023_v34 = vpop.permute.xlu1 %1022 }
 0x225   : > { %v1027_v47 = vpop.permute.xlu0 %1026  ;;  %1103 = vst.msk [vmem:[#allocation4 + $0x100] sm:$0xff] %vm1086_vm5, %v1023_v34 }
 0x226   : > { %1105 = vst.msk [vmem:[#allocation4 + $0x120] sm:$0xff] %vm1086_vm5, %v1027_v47  ;;  %v1716_v47 = vld [vmem:[#allocation3 + $0xf2] sm:$0xff] }
 0x227   : > { %1298 = vst.msk [vmem:[#allocation4 + $0x120] sm:$0xff] %vm1279_vm6, %v1220_v12 }
 0x228   : > { %1491 = vst.msk [vmem:[#allocation4 + $0x120] sm:$0xff] %vm1472_vm7, %v6217_v37  ;;  %v1898_v37 = vld [vmem:[#allocation3 + $0x78] sm:$0xff] }
 0x229   : > { %1296 = vst.msk [vmem:[#allocation4 + $0x100] sm:$0xff] %vm1279_vm6, %v1216_v1 }
 0x22a   : > { %1489 = vst.msk [vmem:[#allocation4 + $0x100] sm:$0xff] %vm1472_vm7, %v1409_v62  ;;  %2157 = vrot.lane.b32.xlu2 %v2089_v25, %s5622_s22  ;;  %1966 = vrot.lane.b32.xlu1 %v6111_v49, %s5623_s23  ;;  %v1909_v62 = vld [vmem:[#allocation3 + $0xf8] sm:$0xff] }
 0x22b   : > { %1970 = vrot.lane.b32.xlu0 %v6193_v28, %s5623_s23 }
 0x22c   : > { %v1604_v21 = vpop.permute.xlu2 %1603  ;;  %v1218_v20 = vpop.permute.xlu1 %1217 }
 0x22d   : > { %v1222_v44 = vpop.permute.xlu0 %1221  ;;  %1297 = vst.msk [vmem:[#allocation4 + $0x110] sm:$0xff] %vm1279_vm6, %v1218_v20 }
 0x232   : > { %1968 = vrot.lane.b32.xlu2 %v1898_v37, %s5623_s23  ;;  %1778 = vrot.lane.b32.xlu1 %v1706_v32, %s5621_s20  ;;  %v1911_v37 = vld [vmem:[#allocation3 + $0x110] sm:$0xff] }
 0x233   : > { %1780 = vrot.lane.b32.xlu0 %v6321_v23, %s5621_s20 }
 0x234   : > { %v1610_v33 = vpop.permute.xlu2 %1609  ;;  %v1407_v45 = vpop.permute.xlu1 %1406 }
 0x235   : > { %v1411_v28 = vpop.permute.xlu0 %1410  ;;  %1686 = vst.msk [vmem:[#allocation4 + $0x140] sm:$0xff] %vm1665_vm8, %v1610_v33 }
 0x236   : > { %1490 = vst.msk [vmem:[#allocation4 + $0x110] sm:$0xff] %vm1472_vm7, %v1411_v28 }
 0x237   : > { %1683 = vst.msk [vmem:[#allocation4 + $0x110] sm:$0xff] %vm1665_vm8, %v1604_v21 }
 0x238   : > { %1488 = vst.msk [vmem:[#allocation4 + $0xf0] sm:$0xff] %vm1472_vm7, %v1407_v45  ;;  %v1718_v45 = vld [vmem:[#allocation3 + $0x10a] sm:$0xff] }
 0x239   : > { %1681 = vst.msk [vmem:[#allocation4 + $0xf0] sm:$0xff] %vm1665_vm8, %v1600_v8 }
 0x23a   : > { %2163 = vrot.lane.b32.xlu2 %v6268_v2, %s5622_s22  ;;  %2161 = vrot.lane.b32.xlu1 %v6275_v42, %s5622_s22 }
 0x23b   : > { %2165 = vrot.lane.b32.xlu0 %v6304_v16, %s5622_s22 }
 0x23c   : > { %v1616_v23 = vpop.permute.xlu2 %1615  ;;  %v1602_v43 = vpop.permute.xlu1 %1601 }
 0x23d   : > { %v1606_v49 = vpop.permute.xlu0 %1605  ;;  %1689 = vst.msk [vmem:[#allocation4 + $0x170] sm:$0xff] %vm1665_vm8, %v1616_v23 }
 0x23e   : > { %1684 = vst.msk [vmem:[#allocation4 + $0x120] sm:$0xff] %vm1665_vm8, %v1606_v49  ;;  %v2104_v49 = vld [vmem:[#allocation3 + $0x111] sm:$0xff] }
 0x23f   : > { %1682 = vst.msk [vmem:[#allocation4 + $0x100] sm:$0xff] %vm1665_vm8, %v1602_v43 }
 0x242   : > { %1974 = vrot.lane.b32.xlu2 %v6286_v58, %s5623_s23  ;;  %1972 = vrot.lane.b32.xlu1 %v6277_v56, %s5623_s23 }
 0x243   : > { %1784 = vrot.lane.b32.xlu0 %v6344_v50, %s5621_s20  ;;  %v1708_v50 = vld [vmem:[#allocation3 + $0x92] sm:$0xff] }
 0x244   : > { %v1622_v42 = vpop.permute.xlu2 %1621  ;;  %v1029_v16 = vpop.permute.xlu1 %1028 }
 0x245   : > { %v1612_v2 = vpop.permute.xlu0 %1611  ;;  %1692 = vst.msk [vmem:[#allocation4 + $0x1a0] sm:$0xff] %vm1665_vm8, %v1622_v42 }
 0x246   : > { %1687 = vst.msk [vmem:[#allocation4 + $0x150] sm:$0xff] %vm1665_vm8, %v1612_v2 }
 0x247   : > { %1106 = vst.msk [vmem:[#allocation4 + $0x130] sm:$0xff] %vm1086_vm5, %v1029_v16 }
 0x248   : > { %1299 = vst.msk [vmem:[#allocation4 + $0x130] sm:$0xff] %vm1279_vm6, %v1222_v44 }
 0x249   : > { %1492 = vst.msk [vmem:[#allocation4 + $0x130] sm:$0xff] %vm1472_vm7, %v6212_v36  ;;  %v5569_v36 = vld [vmem:[%s8190_s5 + $0x38] sm:$0xff] }
 0x24a   : > { %1782 = vrot.lane.b32.xlu2 %v1708_v50, %s5621_s20  ;;  %2167 = vrot.lane.b32.xlu1 %v6390_v14, %s5622_s22 }
 0x24b   : > { %2169 = vrot.lane.b32.xlu0 %v6403_v22, %s5622_s22  ;;  %2558 = vmatpush.bf16.msra.mxu1 %v5569_v36 }
 0x24c   : > { %v1628_v58 = vpop.permute.xlu2 %1627  ;;  %v1608_v41 = vpop.permute.xlu1 %1607 }
 0x24d   : > { %v1618_v56 = vpop.permute.xlu0 %1617  ;;  %1695 = vst.msk [vmem:[#allocation4 + $0x1d0] sm:$0xff] %vm1665_vm8, %v1628_v58  ;;  %v1912_v58 = vld [vmem:[#allocation3 + $0x120] sm:$0xff] }
 0x24e   : > { %1690 = vst.msk [vmem:[#allocation4 + $0x180] sm:$0xff] %vm1665_vm8, %v1618_v56  ;;  %v1913_v56 = vld [vmem:[#allocation3 + $0x128] sm:$0xff] }
 0x24f   : > { %1685 = vst.msk [vmem:[#allocation4 + $0x130] sm:$0xff] %vm1665_vm8, %v1608_v41  ;;  %2559 = vmatpush.bf16.msra.mxu1 %v5568_v17  ;;  %v1720_v17 = vld [vmem:[#allocation3 + $0x122] sm:$0xff] }
 0x252   : > { %1978 = vrot.lane.b32.xlu2 %v6369_v4, %s5623_s23  ;;  %1976 = vrot.lane.b32.xlu1 %v6366_v26, %s5623_s23  ;;  %v5567_v4 = vld [vmem:[%s8190_s5 + $0x28] sm:$0xff] }
 0x253   : > { %1788 = vrot.lane.b32.xlu0 %v6435_v46, %s5621_s20  ;;  %v1710_v46 = vld [vmem:[#allocation3 + $0xaa] sm:$0xff]  ;;  %2560 = vmatpush.bf16.msra.mxu1 %v5567_v4 }
 0x254   : > { %v1763_v22 = vpop.permute.xlu2 %1762  ;;  %v1614_v6 = vpop.permute.xlu1 %1613 }
 0x255   : > { %v1624_v14 = vpop.permute.xlu0 %1623  ;;  %1859 = vst.msk [vmem:[#allocation4] sm:$0xff] %vm1858_vm9, %v1763_v22  ;;  %v2107_v22 = vld [vmem:[#allocation3 + $0x139] sm:$0xff] }
 0x256   : > { %1693 = vst.msk [vmem:[#allocation4 + $0x1b0] sm:$0xff] %vm1665_vm8, %v1624_v14 }
 0x257   : > { %1688 = vst.msk [vmem:[#allocation4 + $0x160] sm:$0xff] %vm1665_vm8, %v1614_v6  ;;  %2561 = vmatpush.bf16.msra.mxu1 %v5566_v40  ;;  %v2106_v6 = vld [vmem:[#allocation3 + $0x129] sm:$0xff] }
 0x25a   : > { %1786 = vrot.lane.b32.xlu2 %v1710_v46, %s5621_s20  ;;  %2171 = vrot.lane.b32.xlu1 %v6417_v48, %s5622_s22 }
 0x25b   : > { %2173 = vrot.lane.b32.xlu0 %v6475_v15, %s5622_s22  ;;  %v5565_v15 = vld [vmem:[%s8190_s5 + $0x18] sm:$0xff] }
 0x25c   : > { %v1769_v53 = vpop.permute.xlu2 %1768  ;;  %v1620_v54 = vpop.permute.xlu1 %1619  ;;  %2562 = vmatpush.bf16.msra.mxu1 %v5565_v15  ;;  %v1723_v15 = vld [vmem:[#allocation3 + $0x142] sm:$0xff] }
 0x25d   : > { %v1630_v26 = vpop.permute.xlu0 %1629  ;;  %1862 = vst.msk [vmem:[#allocation4 + $0x30] sm:$0xff] %vm1858_vm9, %v1769_v53 }
 0x25e   : > { %1696 = vst.msk [vmem:[#allocation4 + $0x1e0] sm:$0xff] %vm1665_vm8, %v1630_v26 }
 0x25f   : > { %1691 = vst.msk [vmem:[#allocation4 + $0x190] sm:$0xff] %vm1665_vm8, %v1620_v54 }
 0x260   : > { %2563 = vmatpush.bf16.msra.mxu1 %v5564_v61 }
 0x262   : > { %1982 = vrot.lane.b32.xlu2 %v6419_v51, %s5623_s23  ;;  %1980 = vrot.lane.b32.xlu1 %v6380_v5, %s5623_s23  ;;  %v5563_v5 = vld [vmem:[%s8190_s5 + $0x8] sm:$0xff] }
 0x263   : > { %1792 = vrot.lane.b32.xlu0 %v6490_v24, %s5621_s20  ;;  %v1712_v24 = vld [vmem:[#allocation3 + $0xc2] sm:$0xff] }
 0x264   : > { %v1959_v57 = vpop.permute.xlu2 %1958  ;;  %v1626_v59 = vpop.permute.xlu1 %1625  ;;  %2564 = vmatpush.bf16.msra.mxu1 %v5563_v5  ;;  %v2109_v5 = vld [vmem:[#allocation3 + $0x151] sm:$0xff] }
 0x265   : > { %v1765_v48 = vpop.permute.xlu0 %1764  ;;  %1694 = vst.msk [vmem:[#allocation4 + $0x1c0] sm:$0xff] %vm1665_vm8, %v1626_v59 }
 0x266   : > { %1860 = vst.msk [vmem:[#allocation4 + $0x10] sm:$0xff] %vm1858_vm9, %v1765_v48  ;;  %v1915_v48 = vld [vmem:[#allocation3 + $0x140] sm:$0xff] }
 0x267   : > { %2054 = vst.msk [vmem:[#allocation4 + $0x10] sm:$0xff] %vm2052_vm10, %v1959_v57  ;;  %v1914_v57 = vld [vmem:[#allocation3 + $0x138] sm:$0xff] }
 0x268   : > { %2565 = vmatpush.bf16.msra.mxu1 %v5562_v38 }
 0x26a   : > { %1790 = vrot.lane.b32.xlu2 %v1712_v24, %s5621_s20  ;;  %2175 = vrot.lane.b32.xlu1 %v6463_v19, %s5622_s22  ;;  %v5606_v19 = vld [vmem:[%s8190_s5 + $0x40] sm:$0xff] }
 0x26b   : > { %2177 = vrot.lane.b32.xlu0 %v6473_v13, %s5622_s22  ;;  %v1715_v13 = vld [vmem:[#allocation3 + $0xe2] sm:$0xff] }
 0x26c   : > { %v1773_v29 = vpop.permute.xlu2 %1772  ;;  %v1632_v1 = vpop.permute.xlu1 %1631  ;;  %2654 = vmatpush.bf16.msrb.mxu1 %v5606_v19 }
 0x26d   : > { %v1771_v51 = vpop.permute.xlu0 %1770  ;;  %1864 = vst.msk [vmem:[#allocation4 + $0x50] sm:$0xff] %vm1858_vm9, %v1773_v29  ;;  %v2108_v29 = vld [vmem:[#allocation3 + $0x141] sm:$0xff] }
 0x26e   : > { %1863 = vst.msk [vmem:[#allocation4 + $0x40] sm:$0xff] %vm1858_vm9, %v1771_v51  ;;  %v1722_v51 = vld [vmem:[#allocation3 + $0x13a] sm:$0xff] }
 0x26f   : > { %1697 = vst.msk [vmem:[#allocation4 + $0x1f0] sm:$0xff] %vm1665_vm8, %v1632_v1 }
 0x272   : > { %1986 = vrot.lane.b32.xlu2 %v6446_v63, %s5623_s23  ;;  %1984 = vrot.lane.b32.xlu1 %v6454_v0, %s5623_s23 }
 0x273   : > { %1796 = vrot.lane.b32.xlu0 %v1715_v13, %s5621_s20 }
 0x274   : > { %v2154_v39 = vpop.permute.xlu2 %2153  ;;  %v1767_v9 = vpop.permute.xlu1 %1766 }
 0x275   : > { %v2150_v3 = vpop.permute.xlu0 %2149  ;;  %1861 = vst.msk [vmem:[#allocation4 + $0x20] sm:$0xff] %vm1858_vm9, %v1767_v9  ;;  %v1725_v9 = vld [vmem:[#allocation3 + $0x15a] sm:$0xff] }
 0x27a   : > { %1794 = vrot.lane.b32.xlu2 %v1714_v7, %s5621_s20  ;;  %2179 = vrot.lane.b32.xlu1 %v6517_v55, %s5622_s22  ;;  %v1908_v55 = vld [vmem:[#allocation3 + $0xf0] sm:$0xff]  ;;  %v1917_v7 = vld [vmem:[#allocation3 + $0x158] sm:$0xff] }
 0x27b   : > { %2181 = vrot.lane.b32.xlu0 %v6506_v52, %s5622_s22  ;;  %v1717_v52 = vld [vmem:[#allocation3 + $0xfa] sm:$0xff] }
 0x27c   : > { %v1777_v0 = vpop.permute.xlu2 %1776  ;;  %v1957_v8 = vpop.permute.xlu1 %1956 }
 0x27d   : > { %v1961_v63 = vpop.permute.xlu0 %1960  ;;  %1866 = vst.msk [vmem:[#allocation4 + $0x70] sm:$0xff] %vm1858_vm9, %v1777_v0 }
 0x27e   : > { %2055 = vst.msk [vmem:[#allocation4 + $0x20] sm:$0xff] %vm2052_vm10, %v1961_v63  ;;  %v1916_v63 = vld [vmem:[#allocation3 + $0x150] sm:$0xff] }
 0x27f   : > { %2248 = vst.msk [vmem:[#allocation4 + $0x20] sm:$0xff] %vm2245_vm11, %v2154_v39 }
 0x280   : > { %2053 = vst.msk [vmem:[#allocation4] sm:$0xff] %vm2052_vm10, %v1957_v8 }
 0x281   : > { %2246 = vst.msk [vmem:[#allocation4] sm:$0xff] %vm2245_vm11, %v2150_v3 }
 0x282   : > { %1990 = vrot.lane.b32.xlu2 %v1909_v62, %s5623_s23  ;;  %1988 = vrot.lane.b32.xlu1 %v1908_v55, %s5623_s23  ;;  %v2111_v62 = vld [vmem:[#allocation3 + $0x169] sm:$0xff]  ;;  %v1724_v55 = vld [vmem:[#allocation3 + $0x152] sm:$0xff] }
 0x283   : > { %1800 = vrot.lane.b32.xlu0 %v1717_v52, %s5621_s20 }
 0x284   : > { %v2158_v10 = vpop.permute.xlu2 %2157  ;;  %v2152_v30 = vpop.permute.xlu1 %2151 }
 0x285   : > { %v2156_v11 = vpop.permute.xlu0 %2155  ;;  %2247 = vst.msk [vmem:[#allocation4 + $0x10] sm:$0xff] %vm2245_vm11, %v2152_v30 }
 0x286   : > { %v2346_v16 = vld [vmem:[#allocation4 + $0x20] sm:$0xff] }
 0x288   : > { %v2342_v44 = vld [vmem:[#allocation4] sm:$0xff] }
 0x28a   : > { %1798 = vrot.lane.b32.xlu2 %v1716_v47, %s5621_s20  ;;  %2183 = vrot.lane.b32.xlu1 %v6535_v27, %s5622_s22  ;;  %v1910_v27 = vld [vmem:[#allocation3 + $0x108] sm:$0xff] }
 0x28b   : > { %2185 = vrot.lane.b32.xlu0 %v6529_v60, %s5622_s22  ;;  %v1719_v60 = vld [vmem:[#allocation3 + $0x112] sm:$0xff] }
 0x28c   : > { %v1969_v34 = vpop.permute.xlu2 %1968  ;;  %v1963_v25 = vpop.permute.xlu1 %1962  ;;  %v2344_v21 = vld [vmem:[#allocation4 + $0x10] sm:$0xff] }
 0x28d   : > { %v1965_v12 = vpop.permute.xlu0 %1964  ;;  %v2406_v20 = vpack.c.bf16 %v2344_v21, %v2342_v44  ;;  %2056 = vst.msk [vmem:[#allocation4 + $0x30] sm:$0xff] %vm2052_vm10, %v1963_v25  ;;  %v1727_v44 = vld [vmem:[#allocation3 + $0x172] sm:$0xff] }
 0x28e   : > { %2057 = vst.msk [vmem:[#allocation4 + $0x40] sm:$0xff] %vm2052_vm10, %v1965_v12  ;;  %v1919_v21 = vld [vmem:[#allocation3 + $0x170] sm:$0xff] }
 0x28f   : > { %2250 = vst.msk [vmem:[#allocation4 + $0x40] sm:$0xff] %vm2245_vm11, %v2158_v10  ;;  %2566 = vmatmul.bf16.vlgmr.msra.gmra.mxu1 %v2406_v20  ;;  %v1918_v20 = vld [vmem:[#allocation3 + $0x168] sm:$0xff] }
 0x290   : > { %2249 = vst.msk [vmem:[#allocation4 + $0x30] sm:$0xff] %vm2245_vm11, %v2156_v11  ;;  %v2110_v11 = vld [vmem:[#allocation3 + $0x159] sm:$0xff] }
 0x292   : > { %1994 = vrot.lane.b32.xlu2 %v1911_v37, %s5623_s23  ;;  %1992 = vrot.lane.b32.xlu1 %v1910_v27, %s5623_s23 }
 0x293   : > { %1804 = vrot.lane.b32.xlu0 %v1719_v60, %s5621_s20 }
 0x294   : > { %v2164_v28 = vpop.permute.xlu2 %2163  ;;  %v1775_v33 = vpop.permute.xlu1 %1774 }
 0x295   : > { %v2160_v32 = vpop.permute.xlu0 %2159  ;;  %1865 = vst.msk [vmem:[#allocation4 + $0x60] sm:$0xff] %vm1858_vm9, %v1775_v33 }
 0x296   : > { %2059 = vst.msk [vmem:[#allocation4 + $0x60] sm:$0xff] %vm2052_vm10, %v1969_v34  ;;  %v2350_v54 = vld [vmem:[#allocation4 + $0x40] sm:$0xff] }
 0x297   : > { %v2348_v23 = vld [vmem:[#allocation4 + $0x30] sm:$0xff] }
 0x298   : > { %v2408_v50 = vpack.c.bf16 %v2348_v23, %v2346_v16  ;;  %v1921_v16 = vld [vmem:[#allocation3 + $0x188] sm:$0xff] }
 0x29a   : > { %1802 = vrot.lane.b32.xlu2 %v1718_v45, %s5621_s20  ;;  %2187 = vrot.lane.b32.xlu1 %v2104_v49, %s5622_s22 }
 0x29b   : > { %2189 = vrot.lane.b32.xlu0 %v6544_v31, %s5622_s22  ;;  %v1721_v31 = vld [vmem:[#allocation3 + $0x12a] sm:$0xff] }
 0x29c   : > { %v1975_v2 = vpop.permute.xlu2 %1974  ;;  %v1967_v42 = vpop.permute.xlu1 %1966 }
 0x29d   : > { %v1971_v43 = vpop.permute.xlu0 %1970  ;;  %2058 = vst.msk [vmem:[#allocation4 + $0x50] sm:$0xff] %vm2052_vm10, %v1967_v42  ;;  %v1729_v42 = vld [vmem:[#allocation3 + $0x18a] sm:$0xff] }
 0x29e   : > { %2060 = vst.msk [vmem:[#allocation4 + $0x70] sm:$0xff] %vm2052_vm10, %v1971_v43 }
 0x29f   : > { %2253 = vst.msk [vmem:[#allocation4 + $0x70] sm:$0xff] %vm2245_vm11, %v2164_v28  ;;  %2571 = vmatmul.bf16.gmra.mxu1 %v2408_v50  ;;  %v2112_v28 = vld [vmem:[#allocation3 + $0x171] sm:$0xff] }
 0x2a0   : > { %2251 = vst.msk [vmem:[#allocation4 + $0x50] sm:$0xff] %vm2245_vm11, %v2160_v32  ;;  %v1726_v32 = vld [vmem:[#allocation3 + $0x16a] sm:$0xff] }
 0x2a2   : > { %1998 = vrot.lane.b32.xlu2 %v1913_v56, %s5623_s23  ;;  %1996 = vrot.lane.b32.xlu1 %v1912_v58, %s5623_s23  ;;  %v2115_v58 = vld [vmem:[#allocation3 + $0x199] sm:$0xff] }
 0x2a3   : > { %1808 = vrot.lane.b32.xlu0 %v1721_v31, %s5621_s20 }
 0x2a4   : > { %v1783_v36 = vpop.permute.xlu2 %1782  ;;  %v1779_v14 = vpop.permute.xlu1 %1778 }
 0x2a5   : > { %v1781_v41 = vpop.permute.xlu0 %1780  ;;  %1869 = vst.msk [vmem:[#allocation4 + $0xa0] sm:$0xff] %vm1858_vm9, %v1783_v36 }
 0x2a6   : > { %1868 = vst.msk [vmem:[#allocation4 + $0x90] sm:$0xff] %vm1858_vm9, %v1781_v41  ;;  %v2356_v3 = vld [vmem:[#allocation4 + $0x70] sm:$0xff] }
 0x2a7   : > { %2062 = vst.msk [vmem:[#allocation4 + $0x90] sm:$0xff] %vm2052_vm10, %v1975_v2  ;;  %v2352_v4 = vld [vmem:[#allocation4 + $0x50] sm:$0xff] }
 0x2a8   : > { %1867 = vst.msk [vmem:[#allocation4 + $0x80] sm:$0xff] %vm1858_vm9, %v1779_v14  ;;  %v2410_v40 = vpack.c.bf16 %v2352_v4, %v2350_v54  ;;  %v1728_v41 = vld [vmem:[#allocation3 + $0x182] sm:$0xff] }
 0x2aa   : > { %1806 = vrot.lane.b32.xlu2 %v1720_v17, %s5621_s20  ;;  %2191 = vrot.lane.b32.xlu1 %v2106_v6, %s5622_s22 }
 0x2ab   : > { %2193 = vrot.lane.b32.xlu0 %v2107_v22, %s5622_s22 }
 0x2ac   : > { %v1979_v26 = vpop.permute.xlu2 %1978  ;;  %v2162_v53 = vpop.permute.xlu1 %2161 }
 0x2ad   : > { %v2166_v46 = vpop.permute.xlu0 %2165  ;;  %2252 = vst.msk [vmem:[#allocation4 + $0x60] sm:$0xff] %vm2245_vm11, %v2162_v53 }
 0x2af   : > { %2576 = vmatmul.bf16.gmra.mxu1 %v2410_v40  ;;  %v1923_v40 = vld [vmem:[#allocation3 + $0x1a0] sm:$0xff] }
 0x2b2   : > { %2002 = vrot.lane.b32.xlu2 %v1915_v48, %s5623_s23  ;;  %2000 = vrot.lane.b32.xlu1 %v1914_v57, %s5623_s23 }
 0x2b3   : > { %1812 = vrot.lane.b32.xlu0 %v1723_v15, %s5621_s20 }
 0x2b4   : > { %v1787_v61 = vpop.permute.xlu2 %1786  ;;  %v1973_v24 = vpop.permute.xlu1 %1972  ;;  %v2354_v1 = vld [vmem:[#allocation4 + $0x60] sm:$0xff] }
 0x2b5   : > { %v1785_v59 = vpop.permute.xlu0 %1784  ;;  %1871 = vst.msk [vmem:[#allocation4 + $0xc0] sm:$0xff] %vm1858_vm9, %v1787_v61  ;;  %v2412_v39 = vpack.c.bf16 %v2356_v3, %v2354_v1 }
 0x2b6   : > { %1870 = vst.msk [vmem:[#allocation4 + $0xb0] sm:$0xff] %vm1858_vm9, %v1785_v59 }
 0x2b7   : > { %2064 = vst.msk [vmem:[#allocation4 + $0xb0] sm:$0xff] %vm2052_vm10, %v1979_v26 }
 0x2b8   : > { %2061 = vst.msk [vmem:[#allocation4 + $0x80] sm:$0xff] %vm2052_vm10, %v1973_v24 }
 0x2b9   : > { %2254 = vst.msk [vmem:[#allocation4 + $0x80] sm:$0xff] %vm2245_vm11, %v2166_v46  ;;  %v1922_v46 = vld [vmem:[#allocation3 + $0x198] sm:$0xff] }
 0x2ba   : > { %1810 = vrot.lane.b32.xlu2 %v1722_v51, %s5621_s20  ;;  %2195 = vrot.lane.b32.xlu1 %v2108_v29, %s5622_s22 }
 0x2bb   : > { %2197 = vrot.lane.b32.xlu0 %v2109_v5, %s5622_s22 }
 0x2bc   : > { %v1983_v13 = vpop.permute.xlu2 %1982  ;;  %v2168_v19 = vpop.permute.xlu1 %2167 }
 0x2bd   : > { %v2170_v38 = vpop.permute.xlu0 %2169  ;;  %2255 = vst.msk [vmem:[#allocation4 + $0x90] sm:$0xff] %vm2245_vm11, %v2168_v19 }
 0x2bf   : > { %2581 = vmatmul.bf16.gmra.mxu1 %v2412_v39 }
 0x2c0   : > { %v2358_v34 = vld [vmem:[#allocation4 + $0x80] sm:$0xff] }
 0x2c2   : > { %2006 = vrot.lane.b32.xlu2 %v1917_v7, %s5623_s23  ;;  %2004 = vrot.lane.b32.xlu1 %v1916_v63, %s5623_s23 }
 0x2c3   : > { %1816 = vrot.lane.b32.xlu0 %v1725_v9, %s5621_s20 }
 0x2c4   : > { %v1791_v8 = vpop.permute.xlu2 %1790  ;;  %v1977_v52 = vpop.permute.xlu1 %1976  ;;  %v2360_v10 = vld [vmem:[#allocation4 + $0x90] sm:$0xff] }
 0x2c5   : > { %v1789_v0 = vpop.permute.xlu0 %1788  ;;  %1873 = vst.msk [vmem:[#allocation4 + $0xe0] sm:$0xff] %vm1858_vm9, %v1791_v8  ;;  %v2414_v25 = vpack.c.bf16 %v2360_v10, %v2358_v34 }
 0x2c6   : > { %1872 = vst.msk [vmem:[#allocation4 + $0xd0] sm:$0xff] %vm1858_vm9, %v1789_v0 }
 0x2c7   : > { %2066 = vst.msk [vmem:[#allocation4 + $0xd0] sm:$0xff] %vm2052_vm10, %v1983_v13 }
 0x2c8   : > { %2063 = vst.msk [vmem:[#allocation4 + $0xa0] sm:$0xff] %vm2052_vm10, %v1977_v52 }
 0x2c9   : > { %2256 = vst.msk [vmem:[#allocation4 + $0xa0] sm:$0xff] %vm2245_vm11, %v2170_v38 }
 0x2ca   : > { %1814 = vrot.lane.b32.xlu2 %v1724_v55, %s5621_s20  ;;  %2199 = vrot.lane.b32.xlu1 %v2110_v11, %s5622_s22 }
 0x2cb   : > { %2201 = vrot.lane.b32.xlu0 %v2111_v62, %s5622_s22 }
 0x2cc   : > { %v1987_v47 = vpop.permute.xlu2 %1986  ;;  %v2172_v12 = vpop.permute.xlu1 %2171 }
 0x2cd   : > { %v2174_v30 = vpop.permute.xlu0 %2173  ;;  %2257 = vst.msk [vmem:[#allocation4 + $0xb0] sm:$0xff] %vm2245_vm11, %v2172_v12 }
 0x2cf   : > { %2586 = vmatmul.bf16.gmra.mxu1 %v2414_v25 }
 0x2d0   : > { %v2362_v43 = vld [vmem:[#allocation4 + $0xa0] sm:$0xff] }
 0x2d2   : > { %2010 = vrot.lane.b32.xlu2 %v1919_v21, %s5623_s23  ;;  %2008 = vrot.lane.b32.xlu1 %v1918_v20, %s5623_s23 }
 0x2d3   : > { %1820 = vrot.lane.b32.xlu0 %v1727_v44, %s5621_s20 }
 0x2d4   : > { %v1795_v37 = vpop.permute.xlu2 %1794  ;;  %v1981_v27 = vpop.permute.xlu1 %1980  ;;  %v2364_v33 = vld [vmem:[#allocation4 + $0xb0] sm:$0xff] }
 0x2d5   : > { %v1793_v60 = vpop.permute.xlu0 %1792  ;;  %1875 = vst.msk [vmem:[#allocation4 + $0x100] sm:$0xff] %vm1858_vm9, %v1795_v37  ;;  %v2416_v2 = vpack.c.bf16 %v2364_v33, %v2362_v43 }
 0x2d6   : > { %1874 = vst.msk [vmem:[#allocation4 + $0xf0] sm:$0xff] %vm1858_vm9, %v1793_v60 }
 0x2d7   : > { %2068 = vst.msk [vmem:[#allocation4 + $0xf0] sm:$0xff] %vm2052_vm10, %v1987_v47 }
 0x2d8   : > { %2065 = vst.msk [vmem:[#allocation4 + $0xc0] sm:$0xff] %vm2052_vm10, %v1981_v27 }
 0x2d9   : > { %2258 = vst.msk [vmem:[#allocation4 + $0xc0] sm:$0xff] %vm2245_vm11, %v2174_v30 }
 0x2da   : > { %1818 = vrot.lane.b32.xlu2 %v1726_v32, %s5621_s20  ;;  %2203 = vrot.lane.b32.xlu1 %v2112_v28, %s5622_s22 }
 0x2db   : > { %2205 = vrot.lane.b32.xlu0 %v6552_v35, %s5622_s22  ;;  %v1920_v35 = vld [vmem:[#allocation3 + $0x180] sm:$0xff] }
 0x2dc   : > { %v1991_v49 = vpop.permute.xlu2 %1990  ;;  %v2176_v23 = vpop.permute.xlu1 %2175 }
 0x2dd   : > { %v2178_v45 = vpop.permute.xlu0 %2177  ;;  %2259 = vst.msk [vmem:[#allocation4 + $0xd0] sm:$0xff] %vm2245_vm11, %v2176_v23 }
 0x2df   : > { %2591 = vmatmul.bf16.gmra.mxu1 %v2416_v2 }
 0x2e0   : > { %v2366_v6 = vld [vmem:[#allocation4 + $0xc0] sm:$0xff] }
 0x2e2   : > { %2014 = vrot.lane.b32.xlu2 %v1921_v16, %s5623_s23  ;;  %2012 = vrot.lane.b32.xlu1 %v1920_v35, %s5623_s23 }
 0x2e3   : > { %1824 = vrot.lane.b32.xlu0 %v1729_v42, %s5621_s20 }
 0x2e4   : > { %v1799_v31 = vpop.permute.xlu2 %1798  ;;  %v1985_v56 = vpop.permute.xlu1 %1984  ;;  %v2368_v36 = vld [vmem:[#allocation4 + $0xd0] sm:$0xff] }
 0x2e5   : > { %v1797_v50 = vpop.permute.xlu0 %1796  ;;  %1877 = vst.msk [vmem:[#allocation4 + $0x120] sm:$0xff] %vm1858_vm9, %v1799_v31  ;;  %v2418_v4 = vpack.c.bf16 %v2368_v36, %v2366_v6 }
 0x2e6   : > { %1876 = vst.msk [vmem:[#allocation4 + $0x110] sm:$0xff] %vm1858_vm9, %v1797_v50 }
 0x2e7   : > { %2070 = vst.msk [vmem:[#allocation4 + $0x110] sm:$0xff] %vm2052_vm10, %v1991_v49 }
 0x2e8   : > { %2067 = vst.msk [vmem:[#allocation4 + $0xe0] sm:$0xff] %vm2052_vm10, %v1985_v56 }
 0x2e9   : > { %2260 = vst.msk [vmem:[#allocation4 + $0xe0] sm:$0xff] %vm2245_vm11, %v2178_v45 }
 0x2ea   : > { %1822 = vrot.lane.b32.xlu2 %v1728_v41, %s5621_s20  ;;  %2207 = vrot.lane.b32.xlu1 %v6572_v18, %s5622_s22  ;;  %v2116_v18 = vld [vmem:[#allocation3 + $0x1a1] sm:$0xff] }
 0x2eb   : > { %2209 = vrot.lane.b32.xlu0 %v2115_v58, %s5622_s22 }
 0x2ec   : > { %v1995_v22 = vpop.permute.xlu2 %1994  ;;  %v2180_v17 = vpop.permute.xlu1 %2179 }
 0x2ed   : > { %v2182_v14 = vpop.permute.xlu0 %2181  ;;  %2261 = vst.msk [vmem:[#allocation4 + $0xf0] sm:$0xff] %vm2245_vm11, %v2180_v17 }
 0x2ef   : > { %2596 = vmatmul.bf16.gmra.mxu1 %v2418_v4 }
 0x2f0   : > { %v2370_v61 = vld [vmem:[#allocation4 + $0xe0] sm:$0xff] }
 0x2f2   : > { %2016 = vrot.lane.b32.xlu1 %v1922_v46, %s5623_s23  ;;  %2018 = vrot.lane.b32.xlu2 %v1923_v40, %s5623_s23 }
 0x2f4   : > { %v1803_v53 = vpop.permute.xlu2 %1802  ;;  %v1989_v54 = vpop.permute.xlu1 %1988  ;;  %v2372_v15 = vld [vmem:[#allocation4 + $0xf0] sm:$0xff] }
 0x2f5   : > { %v1801_v26 = vpop.permute.xlu0 %1800  ;;  %1879 = vst.msk [vmem:[#allocation4 + $0x140] sm:$0xff] %vm1858_vm9, %v1803_v53  ;;  %v2420_v24 = vpack.c.bf16 %v2372_v15, %v2370_v61  ;;  %v2309_v15 = vld [vmem:[#allocation3 + $0x1a2] sm:$0xff] }
 0x2f6   : > { %1878 = vst.msk [vmem:[#allocation4 + $0x130] sm:$0xff] %vm1858_vm9, %v1801_v26  ;;  %v2308_v26 = vld [vmem:[#allocation3 + $0x19a] sm:$0xff] }
 0x2f7   : > { %2072 = vst.msk [vmem:[#allocation4 + $0x130] sm:$0xff] %vm2052_vm10, %v1995_v22 }
 0x2f8   : > { %2069 = vst.msk [vmem:[#allocation4 + $0x100] sm:$0xff] %vm2052_vm10, %v1989_v54 }
 0x2f9   : > { %2262 = vst.msk [vmem:[#allocation4 + $0x100] sm:$0xff] %vm2245_vm11, %v2182_v14 }
 0x2fa   : > { %2211 = vrot.lane.b32.xlu1 %v2116_v18, %s5622_s22  ;;  %2340 = vst.msk [vmem:[#allocation4 + $0x1e8] sm:$0xff] %vm453_vm2, %v2308_v26 }
 0x2fb   : > { %2341 = vst.msk [vmem:[#allocation4 + $0x1f8] sm:$0xff] %vm453_vm2, %v2309_v15 }
 0x2fc   : > { %v1999_v57 = vpop.permute.xlu2 %1998  ;;  %v2184_v59 = vpop.permute.xlu1 %2183 }
 0x2fd   : > { %v2186_v48 = vpop.permute.xlu0 %2185  ;;  %2263 = vst.msk [vmem:[#allocation4 + $0x110] sm:$0xff] %vm2245_vm11, %v2184_v59 }
 0x2ff   : > { %2601 = vmatmul.bf16.gmra.mxu1 %v2420_v24 }
 0x300   : > { %v2374_v39 = vld [vmem:[#allocation4 + $0x100] sm:$0xff] }
 0x301   : > { %v2403_v59 = vld [vmem:[#allocation4 + $0x1e8] sm:$0xff] }
 0x302   : > { %4732 = vst.msk [vmem:[#allocation4 + $0x1e8] sm:$0xff] %vm453_vm2, %v2308_v26 }
 0x304   : > { %v1807_v51 = vpop.permute.xlu2 %1806  ;;  %v1993_v29 = vpop.permute.xlu1 %1992  ;;  %v2376_v1 = vld [vmem:[#allocation4 + $0x110] sm:$0xff] }
 0x305   : > { %v1805_v5 = vpop.permute.xlu0 %1804  ;;  %1881 = vst.msk [vmem:[#allocation4 + $0x160] sm:$0xff] %vm1858_vm9, %v1807_v51  ;;  %v2422_v9 = vpack.c.bf16 %v2376_v1, %v2374_v39 }
 0x306   : > { %1880 = vst.msk [vmem:[#allocation4 + $0x150] sm:$0xff] %vm1858_vm9, %v1805_v5 }
 0x307   : > { %2074 = vst.msk [vmem:[#allocation4 + $0x150] sm:$0xff] %vm2052_vm10, %v1999_v57 }
 0x308   : > { %2071 = vst.msk [vmem:[#allocation4 + $0x120] sm:$0xff] %vm2052_vm10, %v1993_v29  ;;  %v2405_v29 = vld [vmem:[#allocation4 + $0x1f8] sm:$0xff] }
 0x309   : > { %2264 = vst.msk [vmem:[#allocation4 + $0x120] sm:$0xff] %vm2245_vm11, %v2186_v48  ;;  %v2691_v48 = vpop.f32.mrf.mxu2  ;;  %v2437_v1 = vpack.c.bf16 %v2405_v29, %v2403_v59  ;;  %v2357_v59 = vld [vmem:[#allocation4 + $0x78] sm:$0xff] }
 0x30a   : > { %4733 = vst.msk [vmem:[#allocation4 + $0x1f8] sm:$0xff] %vm453_vm2, %v2309_v15  ;;  %v3327_v29 = vld [vmem:[#allocation3 + $0x9] sm:$0xff] }
 0x30b   : > { %5485 = vmatmul.msk.bf16.gmra.mxu2 %vm453_vm2, %v2437_v1 }
 0x30c   : > { %v2003_v13 = vpop.permute.xlu2 %2002  ;;  %v6835_v19 = vpop.f32.mrf.mxu1 }
 0x30d   : > { %v2190_v38 = vpop.permute.xlu0 %2189  ;;  %v2188_v3 = vpop.permute.xlu1 %2187 }
 0x30e   : > { %2265 = vst.msk [vmem:[#allocation4 + $0x130] sm:$0xff] %vm2245_vm11, %v2188_v3 }
 0x30f   : > { %2606 = vmatmul.bf16.gmra.mxu1 %v2422_v9 }
 0x310   : > { %v2378_v30 = vld [vmem:[#allocation4 + $0x120] sm:$0xff] }
 0x314   : > { %v1811_v63 = vpop.permute.xlu2 %1810  ;;  %v6839_v0 = vpop.f32.mrf.mxu1 }
 0x315   : > { %v1809_v7 = vpop.permute.xlu0 %1808  ;;  %v1997_v8 = vpop.permute.xlu1 %1996  ;;  %1883 = vst.msk [vmem:[#allocation4 + $0x180] sm:$0xff] %vm1858_vm9, %v1811_v63  ;;  %v2380_v52 = vld [vmem:[#allocation4 + $0x130] sm:$0xff] }
 0x316   : > { %1882 = vst.msk [vmem:[#allocation4 + $0x170] sm:$0xff] %vm1858_vm9, %v1809_v7  ;;  %v2424_v47 = vpack.c.bf16 %v2380_v52, %v2378_v30 }
 0x317   : > { %2076 = vst.msk [vmem:[#allocation4 + $0x170] sm:$0xff] %vm2052_vm10, %v2003_v13 }
 0x318   : > { %2073 = vst.msk [vmem:[#allocation4 + $0x140] sm:$0xff] %vm2052_vm10, %v1997_v8 }
 0x319   : > { %2266 = vst.msk [vmem:[#allocation4 + $0x140] sm:$0xff] %vm2245_vm11, %v2190_v38  ;;  %v2693_v38 = vpop.f32.mrf.mxu2 }
 0x31c   : > { %v2007_v55 = vpop.permute.xlu2 %2006  ;;  %v6845_v10 = vpop.f32.mrf.mxu1 }
 0x31d   : > { %v2194_v62 = vpop.permute.xlu0 %2193  ;;  %v2192_v11 = vpop.permute.xlu1 %2191 }
 0x31e   : > { %2267 = vst.msk [vmem:[#allocation4 + $0x150] sm:$0xff] %vm2245_vm11, %v2192_v11 }
 0x31f   : > { %2611 = vmatmul.bf16.gmra.mxu1 %v2424_v47 }
 0x320   : > { %v2382_v32 = vld [vmem:[#allocation4 + $0x140] sm:$0xff] }
 0x324   : > { %v1815_v34 = vpop.permute.xlu2 %1814  ;;  %v6849_v44 = vpop.f32.mrf.mxu1 }
 0x325   : > { %v1813_v12 = vpop.permute.xlu0 %1812  ;;  %v2001_v25 = vpop.permute.xlu1 %2000  ;;  %1885 = vst.msk [vmem:[#allocation4 + $0x1a0] sm:$0xff] %vm1858_vm9, %v1815_v34  ;;  %v2384_v21 = vld [vmem:[#allocation4 + $0x150] sm:$0xff] }
 0x326   : > { %1884 = vst.msk [vmem:[#allocation4 + $0x190] sm:$0xff] %vm1858_vm9, %v1813_v12  ;;  %v2426_v28 = vpack.c.bf16 %v2384_v21, %v2382_v32  ;;  %v2345_v32 = vld [vmem:[#allocation4 + $0x18] sm:$0xff] }
 0x327   : > { %2078 = vst.msk [vmem:[#allocation4 + $0x190] sm:$0xff] %vm2052_vm10, %v2007_v55 }
 0x328   : > { %2075 = vst.msk [vmem:[#allocation4 + $0x160] sm:$0xff] %vm2052_vm10, %v2001_v25 }
 0x329   : > { %2268 = vst.msk [vmem:[#allocation4 + $0x160] sm:$0xff] %vm2245_vm11, %v2194_v62  ;;  %v2696_v62 = vpop.f32.mrf.mxu2 }
 0x32c   : > { %v2011_v60 = vpop.permute.xlu2 %2010  ;;  %v6855_v27 = vpop.f32.mrf.mxu1 }
 0x32d   : > { %v2198_v20 = vpop.permute.xlu0 %2197  ;;  %v2196_v37 = vpop.permute.xlu1 %2195 }
 0x32e   : > { %2269 = vst.msk [vmem:[#allocation4 + $0x170] sm:$0xff] %vm2245_vm11, %v2196_v37  ;;  %v2343_v37 = vld [vmem:[#allocation4 + $0x8] sm:$0xff] }
 0x32f   : > { %2616 = vmatmul.bf16.gmra.mxu1 %v2426_v28 }
 0x330   : > { %v2386_v50 = vld [vmem:[#allocation4 + $0x160] sm:$0xff] }
 0x331   : > { %v2698_v11 = vpop.f32.mrf.mxu2 }
 0x334   : > { %v1819_v45 = vpop.permute.xlu2 %1818  ;;  %v6859_v23 = vpop.f32.mrf.mxu1 }
 0x335   : > { %v1817_v33 = vpop.permute.xlu0 %1816  ;;  %v2005_v49 = vpop.permute.xlu1 %2004  ;;  %1887 = vst.msk [vmem:[#allocation4 + $0x1c0] sm:$0xff] %vm1858_vm9, %v1819_v45  ;;  %v2388_v43 = vld [vmem:[#allocation4 + $0x170] sm:$0xff] }
 0x336   : > { %1886 = vst.msk [vmem:[#allocation4 + $0x1b0] sm:$0xff] %vm1858_vm9, %v1817_v33  ;;  %v2428_v31 = vpack.c.bf16 %v2388_v43, %v2386_v50  ;;  %v2349_v50 = vld [vmem:[#allocation4 + $0x38] sm:$0xff] }
 0x337   : > { %2080 = vst.msk [vmem:[#allocation4 + $0x1b0] sm:$0xff] %vm2052_vm10, %v2011_v60 }
 0x338   : > { %2077 = vst.msk [vmem:[#allocation4 + $0x180] sm:$0xff] %vm2052_vm10, %v2005_v49  ;;  %v2407_v49 = vpack.c.bf16 %v2345_v32, %v2343_v37 }
 0x339   : > { %2270 = vst.msk [vmem:[#allocation4 + $0x180] sm:$0xff] %vm2245_vm11, %v2198_v20  ;;  %v2701_v21 = vpop.f32.mrf.mxu2 }
 0x33c   : > { %v2015_v42 = vpop.permute.xlu2 %2014  ;;  %v6865_v35 = vpop.f32.mrf.mxu1 }
 0x33d   : > { %v2202_v2 = vpop.permute.xlu0 %2201  ;;  %v2200_v16 = vpop.permute.xlu1 %2199 }
 0x33e   : > { %2271 = vst.msk [vmem:[#allocation4 + $0x190] sm:$0xff] %vm2245_vm11, %v2200_v16  ;;  %v2347_v16 = vld [vmem:[#allocation4 + $0x28] sm:$0xff] }
 0x33f   : > { %2621 = vmatmul.bf16.gmra.mxu1 %v2428_v31 }
 0x340   : > { %v2390_v4 = vld [vmem:[#allocation4 + $0x180] sm:$0xff] }
 0x341   : > { %v2703_v28 = vpop.f32.mrf.mxu2 }
 0x344   : > { %v1823_v58 = vpop.permute.xlu2 %1822  ;;  %v6869_v36 = vpop.f32.mrf.mxu1 }
 0x345   : > { %v1821_v56 = vpop.permute.xlu0 %1820  ;;  %v2009_v41 = vpop.permute.xlu1 %2008  ;;  %1889 = vst.msk [vmem:[#allocation4 + $0x1e0] sm:$0xff] %vm1858_vm9, %v1823_v58  ;;  %v2392_v14 = vld [vmem:[#allocation4 + $0x190] sm:$0xff]  ;;  %v2409_v58 = vpack.c.bf16 %v2349_v50, %v2347_v16 }
 0x346   : > { %1888 = vst.msk [vmem:[#allocation4 + $0x1d0] sm:$0xff] %vm1858_vm9, %v1821_v56  ;;  %v2430_v46 = vpack.c.bf16 %v2392_v14, %v2390_v4  ;;  %v2351_v4 = vld [vmem:[#allocation4 + $0x48] sm:$0xff] }
 0x347   : > { %2082 = vst.msk [vmem:[#allocation4 + $0x1d0] sm:$0xff] %vm2052_vm10, %v2015_v42 }
 0x348   : > { %2079 = vst.msk [vmem:[#allocation4 + $0x1a0] sm:$0xff] %vm2052_vm10, %v2009_v41 }
 0x349   : > { %2272 = vst.msk [vmem:[#allocation4 + $0x1a0] sm:$0xff] %vm2245_vm11, %v2202_v2  ;;  %v2706_v42 = vpop.f32.mrf.mxu2 }
 0x34c   : > { %v6875_v6 = vpop.f32.mrf.mxu1  ;;  %v2019_v54 = vpop.permute.xlu2 %2018 }
 0x34d   : > { %v2206_v22 = vpop.permute.xlu0 %2205  ;;  %v2204_v17 = vpop.permute.xlu1 %2203 }
 0x34e   : > { %2273 = vst.msk [vmem:[#allocation4 + $0x1b0] sm:$0xff] %vm2245_vm11, %v2204_v17 }
 0x34f   : > { %2626 = vmatmul.bf16.gmra.mxu1 %v2430_v46  ;;  %v2353_v46 = vld [vmem:[#allocation4 + $0x58] sm:$0xff] }
 0x350   : > { %v2394_v5 = vld [vmem:[#allocation4 + $0x1a0] sm:$0xff] }
 0x351   : > { %v2708_v41 = vpop.f32.mrf.mxu2 }
 0x354   : > { %v6880_v40 = vpop.f32.mrf.mxu1 }
 0x355   : > { %v1825_v53 = vpop.permute.xlu0 %1824  ;;  %v2013_v18 = vpop.permute.xlu1 %2012  ;;  %v2396_v57 = vld [vmem:[#allocation4 + $0x1b0] sm:$0xff] }
 0x356   : > { %1890 = vst.msk [vmem:[#allocation4 + $0x1f0] sm:$0xff] %vm1858_vm9, %v1825_v53  ;;  %v2432_v51 = vpack.c.bf16 %v2396_v57, %v2394_v5  ;;  %v2355_v57 = vld [vmem:[#allocation4 + $0x68] sm:$0xff] }
 0x357   : > { %2081 = vst.msk [vmem:[#allocation4 + $0x1c0] sm:$0xff] %vm2052_vm10, %v2013_v18 }
 0x358   : > { %2274 = vst.msk [vmem:[#allocation4 + $0x1c0] sm:$0xff] %vm2245_vm11, %v2206_v22 }
 0x359   : > { %2084 = vst.msk [vmem:[#allocation4 + $0x1f0] sm:$0xff] %vm2052_vm10, %v2019_v54  ;;  %v2711_v17 = vpop.f32.mrf.mxu2  ;;  %v2411_v54 = vpack.c.bf16 %v2353_v46, %v2351_v4 }
 0x35c   : > { %v6887_v24 = vpop.f32.mrf.mxu1 }
 0x35d   : > { %v2208_v61 = vpop.permute.xlu1 %2207  ;;  %v2210_v13 = vpop.permute.xlu0 %2209 }
 0x35e   : > { %2275 = vst.msk [vmem:[#allocation4 + $0x1d0] sm:$0xff] %vm2245_vm11, %v2208_v61 }
 0x35f   : > { %2631 = vmatmul.bf16.gmra.mxu1 %v2432_v51  ;;  %v2398_v63 = vld [vmem:[#allocation4 + $0x1c0] sm:$0xff]  ;;  %v2413_v51 = vpack.c.bf16 %v2357_v59, %v2355_v57  ;;  %v5571_v57 = vld [vmem:[%s8193_s8] sm:$0xff] }
 0x360   : > { %3116 = vmatpush.bf16.msrb.mxu3 %v5571_v57 }
 0x361   : > { %v2713_v18 = vpop.f32.mrf.mxu2 }
 0x364   : > { %v6892_v3 = vpop.f32.mrf.mxu1 }
 0x365   : > { %v2017_v39 = vpop.permute.xlu1 %2016  ;;  %v2400_v9 = vld [vmem:[#allocation4 + $0x1d0] sm:$0xff] }
 0x366   : > { %2083 = vst.msk [vmem:[#allocation4 + $0x1e0] sm:$0xff] %vm2052_vm10, %v2017_v39  ;;  %v2434_v52 = vpack.c.bf16 %v2400_v9, %v2398_v63  ;;  %v2359_v63 = vld [vmem:[#allocation4 + $0x88] sm:$0xff] }
 0x367   : > { %2276 = vst.msk [vmem:[#allocation4 + $0x1e0] sm:$0xff] %vm2245_vm11, %v2210_v13  ;;  %v3518_v13 = vld [vmem:[#allocation3 + $0x2] sm:$0xff] }
 0x369   : > { %v2716_v1 = vpop.f32.mrf.mxu2 }
 0x36c   : > { %v6896_v7 = vpop.f32.mrf.mxu1 }
 0x36d   : > { %v2212_v8 = vpop.permute.xlu1 %2211 }
 0x36e   : > { %2277 = vst.msk [vmem:[#allocation4 + $0x1f0] sm:$0xff] %vm2245_vm11, %v2212_v8  ;;  %v2402_v30 = vld [vmem:[#allocation4 + $0x1e0] sm:$0xff]  ;;  %v2361_v8 = vld [vmem:[#allocation4 + $0x98] sm:$0xff] }
 0x36f   : > { %2636 = vmatmul.bf16.gmra.mxu1 %v2434_v52 }
 0x371   : > { %v2718_v9 = vpop.f32.mrf.mxu2 }
 0x374   : > { %v6899_v55 = vpop.f32.mrf.mxu1 }
 0x375   : > { %v2404_v47 = vld [vmem:[#allocation4 + $0x1f0] sm:$0xff] }
 0x376   : > { %v2436_v12 = vpack.c.bf16 %v2404_v47, %v2402_v30  ;;  %v3326_v30 = vld [vmem:[#allocation3 + $0x1] sm:$0xff] }
 0x379   : > { %v2721_v47 = vpop.f32.mrf.mxu2 }
 0x37c   : > { %v2602_v34 = vpop.f32.mrf.mxu1 }
 0x37d   : > { %v2692_v25 = vadd.f32 %v2691_v48, %v2602_v34 }
 0x37f   : > { %2641 = vmatmul.bf16.gmra.mxu1 %v2436_v12  ;;  %2796 = vrot.lane.b32.xlu1 %v2692_v25, %s5624_s24  ;;  %v2363_v25 = vld [vmem:[#allocation4 + $0xa8] sm:$0xff] }
 0x384   : > { %v2604_v20 = vpop.f32.mrf.mxu1 }
 0x385   : > { %v2694_v60 = vadd.f32 %v2693_v38, %v2604_v20  ;;  %v2723_v20 = vpop.f32.mrf.mxu2 }
 0x387   : > { %2798 = vrot.lane.b32.xlu2 %v2694_v60, %s5624_s24 }
 0x38c   : > { %v2607_v33 = vpop.f32.mrf.mxu1 }
 0x38d   : > { %v2697_v45 = vadd.f32 %v2696_v62, %v2607_v33 }
 0x38f   : > { %5470 = vmatmul.msk.bf16.vlgmr.msrb.gmra.mxu1 %vm453_vm2, %v2407_v49  ;;  %2800 = vrot.lane.b32.xlu0 %v2697_v45, %s5624_s24  ;;  %v3519_v45 = vld [vmem:[#allocation3 + $0xa] sm:$0xff] }
 0x394   : > { %v2609_v43 = vpop.f32.mrf.mxu1 }
 0x395   : > { %v2699_v2 = vadd.f32 %v2698_v11, %v2609_v43  ;;  %v2415_v11 = vpack.c.bf16 %v2361_v8, %v2359_v63  ;;  %v2726_v43 = vpop.f32.mrf.mxu2 }
 0x397   : > { %2802 = vrot.lane.b32.xlu1 %v2699_v2, %s5624_s24  ;;  %v2367_v2 = vld [vmem:[#allocation4 + $0xc8] sm:$0xff] }
 0x39c   : > { %v2612_v31 = vpop.f32.mrf.mxu1 }
 0x39d   : > { %v2702_v56 = vadd.f32 %v2701_v21, %v2612_v31  ;;  %v2365_v21 = vld [vmem:[#allocation4 + $0xb8] sm:$0xff] }
 0x39e   : > { %v2417_v32 = vpack.c.bf16 %v2365_v21, %v2363_v25 }
 0x39f   : > { %5471 = vmatmul.msk.bf16.gmra.mxu1 %vm453_vm2, %v2409_v58  ;;  %2804 = vrot.lane.b32.xlu2 %v2702_v56, %s5624_s24  ;;  %v2728_v56 = vpop.f32.mrf.mxu2 }
 0x3a4   : > { %v2614_v14 = vpop.f32.mrf.mxu1 }
 0x3a5   : > { %v2704_v22 = vadd.f32 %v2703_v28, %v2614_v14 }
 0x3a7   : > { %2806 = vrot.lane.b32.xlu0 %v2704_v22, %s5624_s24  ;;  %v2731_v22 = vpop.f32.mrf.mxu2 }
 0x3ac   : > { %v2617_v26 = vpop.f32.mrf.mxu1 }
 0x3ad   : > { %v2707_v53 = vadd.f32 %v2706_v42, %v2617_v26  ;;  %v2369_v42 = vld [vmem:[#allocation4 + $0xd8] sm:$0xff] }
 0x3ae   : > { %v2419_v31 = vpack.c.bf16 %v2369_v42, %v2367_v2 }
 0x3af   : > { %5472 = vmatmul.msk.bf16.gmra.mxu1 %vm453_vm2, %v2411_v54  ;;  %2808 = vrot.lane.b32.xlu1 %v2707_v53, %s5624_s24  ;;  %v2733_v53 = vpop.f32.mrf.mxu2  ;;  %v3263_v54 = vld [vmem:[#allocation3 + $0x8] sm:$0xff] }
 0x3b0   : > { %3295 = vst.msk [vmem:[#allocation4 + $0x10] sm:$0xff] %vm453_vm2, %v3263_v54 }
 0x3b4   : > { %v2619_v15 = vpop.f32.mrf.mxu1 }
 0x3b5   : > { %v2709_v48 = vadd.f32 %v2708_v41, %v2619_v15 }
 0x3b7   : > { %2810 = vrot.lane.b32.xlu2 %v2709_v48, %s5624_s24 }
 0x3bc   : > { %v2622_v61 = vpop.f32.mrf.mxu1 }
 0x3bd   : > { %v2712_v5 = vadd.f32 %v2711_v17, %v2622_v61 }
 0x3bf   : > { %5473 = vmatmul.msk.bf16.gmra.mxu1 %vm453_vm2, %v2413_v51  ;;  %2812 = vrot.lane.b32.xlu0 %v2712_v5, %s5624_s24 }
 0x3c0   : > { %3392 = vrot.lane.b32.xlu2 %v3327_v29, %s5617_s29 }
 0x3c4   : > { %v2624_v38 = vpop.f32.mrf.mxu1 }
 0x3c5   : > { %v2714_v39 = vadd.f32 %v2713_v18, %v2624_v38 }
 0x3c7   : > { %2814 = vrot.lane.b32.xlu1 %v2714_v39, %s5624_s24  ;;  %3582 = vrot.lane.b32.xlu0 %v3518_v13, %s5618_s30 }
 0x3cc   : > { %v2627_v52 = vpop.f32.mrf.mxu1 }
 0x3cd   : > { %v2717_v62 = vadd.f32 %v2716_v1, %v2627_v52 }
 0x3cf   : > { %5474 = vmatmul.msk.bf16.gmra.mxu1 %vm453_vm2, %v2415_v11  ;;  %2816 = vrot.lane.b32.xlu2 %v2717_v62, %s5624_s24 }
 0x3d0   : > { %3390 = vrot.lane.b32.xlu1 %v3326_v30, %s5617_s29 }
 0x3d4   : > { %v2629_v12 = vpop.f32.mrf.mxu1 }
 0x3d5   : > { %v2719_v34 = vadd.f32 %v2718_v9, %v2629_v12 }
 0x3d7   : > { %2818 = vrot.lane.b32.xlu0 %v2719_v34, %s5624_s24 }
 0x3dc   : > { %v2632_v60 = vpop.f32.mrf.mxu1 }
 0x3dd   : > { %v2722_v37 = vadd.f32 %v2721_v47, %v2632_v60 }
 0x3df   : > { %5475 = vmatmul.msk.bf16.gmra.mxu1 %vm453_vm2, %v2417_v32  ;;  %2820 = vrot.lane.b32.xlu1 %v2722_v37, %s5624_s24 }
 0x3e1   : > { %v2799_v28 = vpop.permute.xlu2 %2798 }
 0x3e2   : > { %2880 = vst.msk [vmem:[#allocation2 + $0x78] sm:$0xff] %vm2864_vm12, %v2799_v28 }
 0x3e4   : > { %v2634_v33 = vpop.f32.mrf.mxu1 }
 0x3e5   : > { %v2724_v49 = vadd.f32 %v2723_v20, %v2634_v33 }
 0x3e7   : > { %2822 = vrot.lane.b32.xlu2 %v2724_v49, %s5624_s24  ;;  %3584 = vrot.lane.b32.xlu1 %v3519_v45, %s5618_s30 }
 0x3ec   : > { %v2637_v16 = vpop.f32.mrf.mxu1 }
 0x3ed   : > { %v2727_v50 = vadd.f32 %v2726_v43, %v2637_v16 }
 0x3ef   : > { %5476 = vmatmul.msk.bf16.gmra.mxu1 %vm453_vm2, %v2419_v31  ;;  %2824 = vrot.lane.b32.xlu0 %v2727_v50, %s5624_s24 }
 0x3f1   : > { %v2797_v58 = vpop.permute.xlu1 %2796 }
 0x3f2   : > { %2879 = vst.msk [vmem:[#allocation2 + $0x70] sm:$0xff] %vm2864_vm12, %v2797_v58 }
 0x3f4   : > { %v2639_v41 = vpop.f32.mrf.mxu1 }
 0x3f5   : > { %v2729_v14 = vadd.f32 %v2728_v56, %v2639_v41 }
 0x3f7   : > { %2826 = vrot.lane.b32.xlu1 %v2729_v14, %s5624_s24 }
 0x3f9   : > { %v2805_v17 = vpop.permute.xlu2 %2804 }
 0x3fa   : > { %2883 = vst.msk [vmem:[#allocation2 + $0x90] sm:$0xff] %vm2864_vm12, %v2805_v17 }
 0x3fc   : > { %v2642_v4 = vpop.f32.mrf.mxu1 }
 0x3fd   : > { %v2732_v46 = vadd.f32 %v2731_v22, %v2642_v4 }
 0x3ff   : > { %2828 = vrot.lane.b32.xlu2 %v2732_v46, %s5624_s24 }
 0x401   : > { %v2801_v26 = vpop.permute.xlu0 %2800 }
 0x402   : > { %2881 = vst.msk [vmem:[#allocation2 + $0x80] sm:$0xff] %vm2864_vm12, %v2801_v26 }
 0x404   : > { %v2644_v18 = vpop.f32.mrf.mxu1 }
 0x405   : > { %v2734_v15 = vadd.f32 %v2733_v53, %v2644_v18 }
 0x407   : > { %2830 = vrot.lane.b32.xlu0 %v2734_v15, %s5624_s24 }
 0x409   : > { %v2803_v48 = vpop.permute.xlu1 %2802 }
 0x40a   : > { %2882 = vst.msk [vmem:[#allocation2 + $0x88] sm:$0xff] %vm2864_vm12, %v2803_v48 }
 0x40c   : > { %v2656_v59 = vpop.f32.mrf.mxu1 }
 0x40d   : > { %v2657_v61 = vadd.f32 %v2656_v59, %v6835_v19 }
 0x40f   : > { %2768 = vrot.lane.b32.xlu2 %v2657_v61, %s5624_s24 }
 0x411   : > { %v2811_v5 = vpop.permute.xlu2 %2810 }
 0x412   : > { %2886 = vst.msk [vmem:[#allocation2 + $0xa8] sm:$0xff] %vm2864_vm12, %v2811_v5 }
 0x414   : > { %v2658_v51 = vpop.f32.mrf.mxu1 }
 0x415   : > { %v2659_v29 = vadd.f32 %v2658_v51, %v6839_v0  ;;  %v3262_v0 = vld [vmem:[#allocation3] sm:$0xff] }
 0x416   : > { %3294 = vst.msk [vmem:[#allocation4] sm:$0xff] %vm453_vm2, %v3262_v0 }
 0x417   : > { %2770 = vrot.lane.b32.xlu0 %v2659_v29, %s5624_s24 }
 0x419   : > { %v2807_v1 = vpop.permute.xlu0 %2806 }
 0x41a   : > { %2884 = vst.msk [vmem:[#allocation2 + $0x98] sm:$0xff] %vm2864_vm12, %v2807_v1  ;;  %v3393_v38 = vpop.permute.xlu2 %3392 }
 0x41b   : > { %3487 = vst.msk [vmem:[#allocation4 + $0x10] sm:$0xff] %vm1086_vm5, %v3393_v38 }
 0x41c   : > { %v2661_v13 = vpop.f32.mrf.mxu1 }
 0x41d   : > { %v2662_v39 = vadd.f32 %v2661_v13, %v6845_v10 }
 0x41f   : > { %2772 = vrot.lane.b32.xlu1 %v2662_v39, %s5624_s24 }
 0x421   : > { %v2809_v19 = vpop.permute.xlu1 %2808 }
 0x422   : > { %2885 = vst.msk [vmem:[#allocation2 + $0xa0] sm:$0xff] %vm2864_vm12, %v2809_v19 }
 0x424   : > { %v2663_v9 = vpop.f32.mrf.mxu1 }
 0x425   : > { %v2664_v63 = vadd.f32 %v2663_v9, %v6849_v44 }
 0x427   : > { %2774 = vrot.lane.b32.xlu2 %v2664_v63, %s5624_s24 }
 0x429   : > { %v2817_v8 = vpop.permute.xlu2 %2816 }
 0x42a   : > { %2889 = vst.msk [vmem:[#allocation2 + $0xc0] sm:$0xff] %vm2864_vm12, %v2817_v8 }
 0x42c   : > { %v2666_v52 = vpop.f32.mrf.mxu1 }
 0x42d   : > { %v2667_v62 = vadd.f32 %v2666_v52, %v6855_v27 }
 0x42f   : > { %2776 = vrot.lane.b32.xlu0 %v2667_v62, %s5624_s24 }
 0x431   : > { %v2813_v10 = vpop.permute.xlu0 %2812 }
 0x432   : > { %2887 = vst.msk [vmem:[#allocation2 + $0xb0] sm:$0xff] %vm2864_vm12, %v2813_v10 }
 0x434   : > { %v2668_v11 = vpop.f32.mrf.mxu1 }
 0x435   : > { %v2669_v30 = vadd.f32 %v2668_v11, %v6859_v23 }
 0x437   : > { %2778 = vrot.lane.b32.xlu1 %v2669_v30, %s5624_s24 }
 0x439   : > { %v2815_v44 = vpop.permute.xlu1 %2814  ;;  %v3583_v34 = vpop.permute.xlu0 %3582 }
 0x43a   : > { %2888 = vst.msk [vmem:[#allocation2 + $0xb8] sm:$0xff] %vm2864_vm12, %v2815_v44 }
 0x43c   : > { %v2671_v47 = vpop.f32.mrf.mxu1 }
 0x43d   : > { %v2672_v12 = vadd.f32 %v2671_v47, %v6865_v35 }
 0x43f   : > { %2780 = vrot.lane.b32.xlu2 %v2672_v12, %s5624_s24 }
 0x441   : > { %v2823_v27 = vpop.permute.xlu2 %2822 }
 0x442   : > { %2892 = vst.msk [vmem:[#allocation2 + $0xd8] sm:$0xff] %vm2864_vm12, %v2823_v27  ;;  %v3391_v25 = vpop.permute.xlu1 %3390 }
 0x443   : > { %3486 = vst.msk [vmem:[#allocation4] sm:$0xff] %vm1086_vm5, %v3391_v25 }
 0x444   : > { %v2673_v21 = vpop.f32.mrf.mxu1  ;;  %3678 = vst.msk [vmem:[#allocation4] sm:$0xff] %vm1279_vm6, %v3583_v34 }
 0x445   : > { %v2674_v23 = vadd.f32 %v2673_v21, %v6869_v36 }
 0x447   : > { %2782 = vrot.lane.b32.xlu0 %v2674_v23, %s5624_s24 }
 0x449   : > { %v2819_v20 = vpop.permute.xlu0 %2818 }
 0x44a   : > { %2890 = vst.msk [vmem:[#allocation2 + $0xc8] sm:$0xff] %vm2864_vm12, %v2819_v20 }
 0x44c   : > { %v2676_v35 = vpop.f32.mrf.mxu1 }
 0x44d   : > { %v2677_v60 = vadd.f32 %v2676_v35, %v6875_v6 }
 0x44f   : > { %2784 = vrot.lane.b32.xlu1 %v2677_v60, %s5624_s24 }
 0x451   : > { %v2821_v37 = vpop.permute.xlu1 %2820 }
 0x452   : > { %2891 = vst.msk [vmem:[#allocation2 + $0xd0] sm:$0xff] %vm2864_vm12, %v2821_v37 }
 0x454   : > { %v2678_v32 = vpop.f32.mrf.mxu1 }
 0x455   : > { %v2679_v28 = vadd.f32 %v2678_v32, %v6880_v40 }
 0x457   : > { %2786 = vrot.lane.b32.xlu2 %v2679_v28, %s5624_s24 }
 0x459   : > { %v2829_v33 = vpop.permute.xlu2 %2828  ;;  %v3585_v36 = vpop.permute.xlu1 %3584 }
 0x45a   : > { %2895 = vst.msk [vmem:[#allocation2 + $0xf0] sm:$0xff] %vm2864_vm12, %v2829_v33 }
 0x45b   : > { %3679 = vst.msk [vmem:[#allocation4 + $0x10] sm:$0xff] %vm1279_vm6, %v3585_v36 }
 0x45c   : > { %v2681_v45 = vpop.f32.mrf.mxu1 }
 0x45d   : > { %v2682_v49 = vadd.f32 %v2681_v45, %v6887_v24 }
 0x45f   : > { %2788 = vrot.lane.b32.xlu0 %v2682_v49, %s5624_s24 }
 0x461   : > { %v2825_v6 = vpop.permute.xlu0 %2824 }
 0x462   : > { %2893 = vst.msk [vmem:[#allocation2 + $0xe0] sm:$0xff] %vm2864_vm12, %v2825_v6 }
 0x464   : > { %v2683_v43 = vpop.f32.mrf.mxu1 }
 0x465   : > { %v2684_v2 = vadd.f32 %v2683_v43, %v6892_v3 }
 0x467   : > { %2790 = vrot.lane.b32.xlu1 %v2684_v2, %s5624_s24 }
 0x469   : > { %v2827_v40 = vpop.permute.xlu1 %2826  ;;  %v2769_v42 = vpop.permute.xlu2 %2768 }
 0x46a   : > { %2894 = vst.msk [vmem:[#allocation2 + $0xe8] sm:$0xff] %vm2864_vm12, %v2827_v40 }
 0x46b   : > { %2865 = vst.msk [vmem:[#allocation2] sm:$0xff] %vm2864_vm12, %v2769_v42 }
 0x46c   : > { %v2686_v16 = vpop.f32.mrf.mxu1 }
 0x46d   : > { %v2687_v50 = vadd.f32 %v2686_v16, %v6896_v7  ;;  %v6991_v7 = vld [vmem:[%s8191_s6] ss:$0 sm:$0xff] }
 0x46f   : > { %2792 = vrot.lane.b32.xlu2 %v2687_v50, %s5624_s24 }
 0x472   : > { %v2897_v41 = vld [vmem:[#allocation2] sm:$0xff] }
 0x473   : > { %v2933_v14 = vmul.f32 %v6991_v7, %v2897_v41 }
 0x474   : > { %v2688_v24 = vpop.f32.mrf.mxu1 }
 0x475   : > { %v2689_v31 = vadd.f32 %v2688_v24, %v6899_v55  ;;  %v6997_v55 = vld [vmem:[%s8192_s7] ss:$0 sm:$0xff] }
 0x476   : > { %v2969_v46 = vadd.f32 %v6997_v55, %v2933_v14 }
 0x477   : > { %2794 = vrot.lane.b32.xlu0 %v2689_v31, %s5624_s24 }
 0x478   : > { %v3001_v53 = vmax.f32 %v2969_v46, 0.0 }
 0x479   : > { %v2831_v56 = vpop.permute.xlu0 %2830 }
 0x47a   : > { %2896 = vst.msk [vmem:[#allocation2 + $0xf8] sm:$0xff] %vm2864_vm12, %v2831_v56 }
 0x481   : > { %v2775_v3 = vpop.permute.xlu2 %2774 }
 0x482   : > { %2868 = vst.msk [vmem:[#allocation2 + $0x18] sm:$0xff] %vm2864_vm12, %v2775_v3 }
 0x489   : > { %v2771_v58 = vpop.permute.xlu0 %2770  ;;  %v2900_v57 = vld [vmem:[#allocation2 + $0x18] sm:$0xff] }
 0x48a   : > { %2866 = vst.msk [vmem:[#allocation2 + $0x8] sm:$0xff] %vm2864_vm12, %v2771_v58  ;;  %v2936_v61 = vmul.f32 %v6991_v7, %v2900_v57  ;;  %v2911_v57 = vld [vmem:[#allocation2 + $0x70] sm:$0xff] }
 0x48c   : > { %v2972_v29 = vadd.f32 %v6997_v55, %v2936_v61  ;;  %v2947_v61 = vmul.f32 %v6991_v7, %v2911_v57 }
 0x48e   : > { %v3004_v38 = vmax.f32 %v2972_v29, 0.0 }
 0x491   : > { %v2773_v22 = vpop.permute.xlu1 %2772  ;;  %v2898_v17 = vld [vmem:[#allocation2 + $0x8] sm:$0xff] }
 0x492   : > { %2867 = vst.msk [vmem:[#allocation2 + $0x10] sm:$0xff] %vm2864_vm12, %v2773_v22  ;;  %v2934_v4 = vmul.f32 %v6991_v7, %v2898_v17 }
 0x494   : > { %v2970_v26 = vadd.f32 %v6997_v55, %v2934_v4 }
 0x496   : > { %v3002_v54 = vmax.f32 %v2970_v26, 0.0 }
 0x498   : > { %v3033_v18 = vpack.c.bf16 %v3002_v54, %v3001_v53 }
 0x499   : > { %v2781_v15 = vpop.permute.xlu2 %2780  ;;  %v2899_v48 = vld [vmem:[#allocation2 + $0x10] sm:$0xff] }
 0x49a   : > { %2871 = vst.msk [vmem:[#allocation2 + $0x30] sm:$0xff] %vm2864_vm12, %v2781_v15  ;;  %5490 = vmatmul.msk.bf16.vlgmr.msrb.gmra.mxu3 %vm453_vm2, %v3033_v18  ;;  %v2935_v59 = vmul.f32 %v6991_v7, %v2899_v48 }
 0x49c   : > { %v2971_v5 = vadd.f32 %v6997_v55, %v2935_v59  ;;  %v2912_v59 = vld [vmem:[#allocation2 + $0x78] sm:$0xff] }
 0x49e   : > { %v3003_v1 = vmax.f32 %v2971_v5, 0.0  ;;  %v2948_v5 = vmul.f32 %v6991_v7, %v2912_v59 }
 0x4a0   : > { %v3034_v13 = vpack.c.bf16 %v3004_v38, %v3003_v1  ;;  %v2984_v29 = vadd.f32 %v6997_v55, %v2948_v5 }
 0x4a1   : > { %v2777_v51 = vpop.permute.xlu0 %2776  ;;  %v2903_v47 = vld [vmem:[#allocation2 + $0x30] sm:$0xff] }
 0x4a2   : > { %2869 = vst.msk [vmem:[#allocation2 + $0x20] sm:$0xff] %vm2864_vm12, %v2777_v51  ;;  %v2939_v12 = vmul.f32 %v6991_v7, %v2903_v47  ;;  %v2983_v51 = vadd.f32 %v6997_v55, %v2947_v61  ;;  %v3016_v38 = vmax.f32 %v2984_v29, 0.0 }
 0x4a4   : > { %v2975_v21 = vadd.f32 %v6997_v55, %v2939_v12  ;;  %v3015_v1 = vmax.f32 %v2983_v51, 0.0 }
 0x4a6   : > { %v3007_v20 = vmax.f32 %v2975_v21, 0.0 }
 0x4a9   : > { %v2779_v39 = vpop.permute.xlu1 %2778  ;;  %v2901_v19 = vld [vmem:[#allocation2 + $0x20] sm:$0xff] }
 0x4aa   : > { %2870 = vst.msk [vmem:[#allocation2 + $0x28] sm:$0xff] %vm2864_vm12, %v2779_v39  ;;  %5491 = vmatmul.msk.bf16.gmra.mxu3 %vm453_vm2, %v3034_v13  ;;  %v2937_v9 = vmul.f32 %v6991_v7, %v2901_v19  ;;  %v3040_v13 = vpack.c.bf16 %v3016_v38, %v3015_v1  ;;  %v2914_v39 = vld [vmem:[#allocation2 + $0x88] sm:$0xff]  ;;  %v2913_v19 = vld [vmem:[#allocation2 + $0x80] sm:$0xff] }
 0x4ac   : > { %v2973_v52 = vadd.f32 %v6997_v55, %v2937_v9  ;;  %v2950_v9 = vmul.f32 %v6991_v7, %v2914_v39 }
 0x4ae   : > { %v3005_v10 = vmax.f32 %v2973_v52, 0.0 }
 0x4b1   : > { %v2787_v63 = vpop.permute.xlu2 %2786  ;;  %v2902_v0 = vld [vmem:[#allocation2 + $0x28] sm:$0xff] }
 0x4b2   : > { %2874 = vst.msk [vmem:[#allocation2 + $0x48] sm:$0xff] %vm2864_vm12, %v2787_v63  ;;  %v2938_v8 = vmul.f32 %v6991_v7, %v2902_v0  ;;  %v2949_v63 = vmul.f32 %v6991_v7, %v2913_v19  ;;  %v2986_v0 = vadd.f32 %v6997_v55, %v2950_v9 }
 0x4b4   : > { %v2974_v62 = vadd.f32 %v6997_v55, %v2938_v8  ;;  %v2985_v8 = vadd.f32 %v6997_v55, %v2949_v63  ;;  %v3018_v52 = vmax.f32 %v2986_v0, 0.0 }
 0x4b6   : > { %v3006_v11 = vmax.f32 %v2974_v62, 0.0  ;;  %v3017_v62 = vmax.f32 %v2985_v8, 0.0 }
 0x4b8   : > { %v3035_v30 = vpack.c.bf16 %v3006_v11, %v3005_v10  ;;  %v3041_v10 = vpack.c.bf16 %v3018_v52, %v3017_v62  ;;  %v7057_v11 = vld [vmem:[%s8194_s9] ss:$0 sm:$0xff]  ;;  %v2922_v62 = vld [vmem:[#allocation2 + $0xc8] sm:$0xff] }
 0x4b9   : > { %v2783_v44 = vpop.permute.xlu0 %2782  ;;  %v2906_v28 = vld [vmem:[#allocation2 + $0x48] sm:$0xff] }
 0x4ba   : > { %2872 = vst.msk [vmem:[#allocation2 + $0x38] sm:$0xff] %vm2864_vm12, %v2783_v44  ;;  %5492 = vmatmul.msk.bf16.gmra.mxu3 %vm453_vm2, %v3035_v30  ;;  %v2942_v36 = vmul.f32 %v6991_v7, %v2906_v28  ;;  %v2916_v30 = vld [vmem:[#allocation2 + $0x98] sm:$0xff]  ;;  %v2915_v44 = vld [vmem:[#allocation2 + $0x90] sm:$0xff] }
 0x4bb   : > { %v2952_v12 = vmul.f32 %v6991_v7, %v2916_v30 }
 0x4bc   : > { %v2978_v6 = vadd.f32 %v6997_v55, %v2942_v36 }
 0x4bd   : > { %v2988_v21 = vadd.f32 %v6997_v55, %v2952_v12  ;;  %v2958_v12 = vmul.f32 %v6991_v7, %v2922_v62 }
 0x4be   : > { %v3010_v2 = vmax.f32 %v2978_v6, 0.0  ;;  %v2918_v6 = vld [vmem:[#allocation2 + $0xa8] sm:$0xff] }
 0x4c1   : > { %v2785_v34 = vpop.permute.xlu1 %2784  ;;  %v2904_v27 = vld [vmem:[#allocation2 + $0x38] sm:$0xff] }
 0x4c2   : > { %2873 = vst.msk [vmem:[#allocation2 + $0x40] sm:$0xff] %vm2864_vm12, %v2785_v34  ;;  %v2940_v25 = vmul.f32 %v6991_v7, %v2904_v27  ;;  %v2951_v27 = vmul.f32 %v6991_v7, %v2915_v44  ;;  %v2921_v44 = vld [vmem:[#allocation2 + $0xc0] sm:$0xff] }
 0x4c4   : > { %v2976_v23 = vadd.f32 %v6997_v55, %v2940_v25 }
 0x4c6   : > { %v3008_v35 = vmax.f32 %v2976_v23, 0.0  ;;  %v2987_v23 = vadd.f32 %v6997_v55, %v2951_v27  ;;  %v2957_v27 = vmul.f32 %v6991_v7, %v2921_v44 }
 0x4c8   : > { %v3036_v60 = vpack.c.bf16 %v3008_v35, %v3007_v20  ;;  %v3020_v35 = vmax.f32 %v2988_v21, 0.0  ;;  %v2994_v21 = vadd.f32 %v6997_v55, %v2958_v12 }
 0x4c9   : > { %v2793_v37 = vpop.permute.xlu2 %2792  ;;  %v2905_v32 = vld [vmem:[#allocation2 + $0x40] sm:$0xff] }
 0x4ca   : > { %2877 = vst.msk [vmem:[#allocation2 + $0x60] sm:$0xff] %vm2864_vm12, %v2793_v37  ;;  %5493 = vmatmul.msk.bf16.gmra.mxu3 %vm453_vm2, %v3036_v60  ;;  %v2941_v33 = vmul.f32 %v6991_v7, %v2905_v32  ;;  %v3019_v37 = vmax.f32 %v2987_v23, 0.0 }
 0x4cc   : > { %v2977_v45 = vadd.f32 %v6997_v55, %v2941_v33  ;;  %v3042_v36 = vpack.c.bf16 %v3020_v35, %v3019_v37  ;;  %v2993_v37 = vadd.f32 %v6997_v55, %v2957_v27 }
 0x4ce   : > { %v3009_v43 = vmax.f32 %v2977_v45, 0.0  ;;  %v2917_v45 = vld [vmem:[#allocation2 + $0xa0] sm:$0xff] }
 0x4d0   : > { %v3037_v40 = vpack.c.bf16 %v3010_v2, %v3009_v43  ;;  %v2953_v2 = vmul.f32 %v6991_v7, %v2917_v45 }
 0x4d1   : > { %v2789_v49 = vpop.permute.xlu0 %2788  ;;  %v2909_v17 = vld [vmem:[#allocation2 + $0x60] sm:$0xff] }
 0x4d2   : > { %2875 = vst.msk [vmem:[#allocation2 + $0x50] sm:$0xff] %vm2864_vm12, %v2789_v49  ;;  %v2945_v4 = vmul.f32 %v6991_v7, %v2909_v17  ;;  %v5580_v49 = vld [vmem:[%s8195_s10 + $0x40] sm:$0xff] }
 0x4d3   : > { %5046 = vmatpush.bf16.msrb.mxu2 %v5580_v49 }
 0x4d4   : > { %v2981_v53 = vadd.f32 %v6997_v55, %v2945_v4 }
 0x4d6   : > { %v3013_v18 = vmax.f32 %v2981_v53, 0.0  ;;  %v2920_v53 = vld [vmem:[#allocation2 + $0xb8] sm:$0xff] }
 0x4d9   : > { %v2791_v42 = vpop.permute.xlu1 %2790  ;;  %v2907_v16 = vld [vmem:[#allocation2 + $0x50] sm:$0xff] }
 0x4da   : > { %2876 = vst.msk [vmem:[#allocation2 + $0x58] sm:$0xff] %vm2864_vm12, %v2791_v42  ;;  %5494 = vmatmul.msk.bf16.gmra.mxu3 %vm453_vm2, %v3037_v40  ;;  %v2943_v50 = vmul.f32 %v6991_v7, %v2907_v16  ;;  %v2954_v42 = vmul.f32 %v6991_v7, %v2918_v6 }
 0x4dc   : > { %v2979_v56 = vadd.f32 %v6997_v55, %v2943_v50 }
 0x4de   : > { %v3011_v58 = vmax.f32 %v2979_v56, 0.0  ;;  %v2989_v56 = vadd.f32 %v6997_v55, %v2953_v2  ;;  %v2923_v2 = vld [vmem:[#allocation2 + $0xd0] sm:$0xff] }
 0x4e1   : > { %v2908_v24 = vld [vmem:[#allocation2 + $0x58] sm:$0xff] }
 0x4e2   : > { %v2944_v31 = vmul.f32 %v6991_v7, %v2908_v24 }
 0x4e4   : > { %v2980_v3 = vadd.f32 %v6997_v55, %v2944_v31 }
 0x4e6   : > { %v3012_v41 = vmax.f32 %v2980_v3, 0.0 }
 0x4e8   : > { %v3038_v14 = vpack.c.bf16 %v3012_v41, %v3011_v58  ;;  %v2990_v58 = vadd.f32 %v6997_v55, %v2954_v42 }
 0x4e9   : > { %v2795_v22 = vpop.permute.xlu0 %2794 }
 0x4ea   : > { %2878 = vst.msk [vmem:[#allocation2 + $0x68] sm:$0xff] %vm2864_vm12, %v2795_v22  ;;  %5495 = vmatmul.msk.bf16.gmra.mxu3 %vm453_vm2, %v3038_v14  ;;  %v3021_v14 = vmax.f32 %v2989_v56, 0.0  ;;  %v3022_v17 = vmax.f32 %v2990_v58, 0.0 }
 0x4f1   : > { %v2910_v46 = vld [vmem:[#allocation2 + $0x68] sm:$0xff] }
 0x4f2   : > { %v2946_v26 = vmul.f32 %v6991_v7, %v2910_v46  ;;  %v3043_v46 = vpack.c.bf16 %v3022_v17, %v3021_v14 }
 0x4f4   : > { %v2982_v54 = vadd.f32 %v6997_v55, %v2946_v26 }
 0x4f6   : > { %v3014_v15 = vmax.f32 %v2982_v54, 0.0  ;;  %v2919_v54 = vld [vmem:[#allocation2 + $0xb0] sm:$0xff] }
 0x4f7   : > { %v2955_v57 = vmul.f32 %v6991_v7, %v2919_v54 }
 0x4f8   : > { %v3039_v48 = vpack.c.bf16 %v3014_v15, %v3013_v18  ;;  %v2956_v15 = vmul.f32 %v6991_v7, %v2920_v53 }
 0x4f9   : > { %v2991_v38 = vadd.f32 %v6997_v55, %v2955_v57 }
 0x4fa   : > { %5496 = vmatmul.msk.bf16.gmra.mxu3 %vm453_vm2, %v3039_v48  ;;  %v2992_v5 = vadd.f32 %v6997_v55, %v2956_v15 }
 0x4fb   : > { %v3023_v9 = vmax.f32 %v2991_v38, 0.0 }
 0x4fc   : > { %v3024_v39 = vmax.f32 %v2992_v5, 0.0 }
 0x4fe   : > { %v3044_v0 = vpack.c.bf16 %v3024_v39, %v3023_v9 }
 0x50a   : > { %5497 = vmatmul.msk.bf16.gmra.mxu3 %vm453_vm2, %v3040_v13 }
 0x51a   : > { %5498 = vmatmul.msk.bf16.gmra.mxu3 %vm453_vm2, %v3041_v10 }
 0x51d   : > { %v3118_v47 = vpop.f32.mrf.mxu3 }
 0x51e   : > { %v3119_v34 = vadd.f32 %v7057_v11, %v3118_v47 }
 0x520   : > { %v3198_v25 = vmax.f32 %v3119_v34, 0.0 }
 0x522   : > { %3230 = vst.msk [vmem:[#allocation3 + $0x19] sm:$0xff] %vm453_vm2, %v3198_v25 }
 0x525   : > { %v3120_v20 = vpop.f32.mrf.mxu3 }
 0x526   : > { %v3121_v60 = vadd.f32 %v7057_v11, %v3120_v20 }
 0x528   : > { %v3199_v32 = vmax.f32 %v3121_v60, 0.0 }
 0x529   : > { %v3902_v28 = vld [vmem:[#allocation3 + $0x19] sm:$0xff] }
 0x52a   : > { %v3710_v33 = vld [vmem:[#allocation3 + $0x18] sm:$0xff]  ;;  %3231 = vst.msk [vmem:[#allocation3 + $0x21] sm:$0xff] %vm453_vm2, %v3199_v32  ;;  %3966 = vrot.lane.b32.xlu1 %v3902_v28, %s5619_s14  ;;  %3394 = vrot.lane.b32.xlu0 %v3902_v28, %s5617_s29  ;;  %v3026_v28 = vmax.f32 %v2994_v21, 0.0 }
 0x52b   : > { %3774 = vrot.lane.b32.xlu2 %v3710_v33, %s5620_s15  ;;  %5499 = vmatmul.msk.bf16.gmra.mxu3 %vm453_vm2, %v3042_v36  ;;  %3296 = vst.msk [vmem:[#allocation4 + $0x20] sm:$0xff] %vm453_vm2, %v3710_v33  ;;  %v3025_v36 = vmax.f32 %v2993_v37, 0.0  ;;  %v2927_v37 = vld [vmem:[#allocation2 + $0xf0] sm:$0xff] }
 0x52d   : > { %v3123_v43 = vpop.f32.mrf.mxu3  ;;  %v3045_v49 = vpack.c.bf16 %v3026_v28, %v3025_v36  ;;  %v2963_v36 = vmul.f32 %v6991_v7, %v2927_v37  ;;  %v5576_v37 = vld [vmem:[%s8195_s10 + $0x20] sm:$0xff] }
 0x52e   : > { %v3124_v40 = vadd.f32 %v7057_v11, %v3123_v43 }
 0x530   : > { %v3200_v16 = vmax.f32 %v3124_v40, 0.0 }
 0x531   : > { %v3329_v50 = vld [vmem:[#allocation3 + $0x21] sm:$0xff] }
 0x532   : > { %v3520_v24 = vld [vmem:[#allocation3 + $0x1a] sm:$0xff]  ;;  %v3521_v31 = vld [vmem:[#allocation3 + $0x22] sm:$0xff]  ;;  %3232 = vst.msk [vmem:[#allocation3 + $0x31] sm:$0xff] %vm453_vm2, %v3200_v16  ;;  %3396 = vrot.lane.b32.xlu1 %v3329_v50, %s5617_s29 }
 0x533   : > { %3586 = vrot.lane.b32.xlu2 %v3520_v24, %s5618_s30  ;;  %v3711_v3 = vld [vmem:[#allocation3 + $0x20] sm:$0xff]  ;;  %3588 = vrot.lane.b32.xlu0 %v3521_v31, %s5618_s30  ;;  %v2924_v16 = vld [vmem:[#allocation2 + $0xd8] sm:$0xff] }
 0x534   : > { %3297 = vst.msk [vmem:[#allocation4 + $0x30] sm:$0xff] %vm453_vm2, %v3711_v3  ;;  %v2960_v56 = vmul.f32 %v6991_v7, %v2924_v16 }
 0x535   : > { %v3125_v41 = vpop.f32.mrf.mxu3 }
 0x536   : > { %v3126_v22 = vadd.f32 %v7057_v11, %v3125_v41 }
 0x538   : > { %v3201_v4 = vmax.f32 %v3126_v22, 0.0 }
 0x539   : > { %v3712_v26 = vld [vmem:[#allocation3 + $0x30] sm:$0xff] }
 0x53a   : > { %3233 = vst.msk [vmem:[#allocation3 + $0x39] sm:$0xff] %vm453_vm2, %v3201_v4  ;;  %4160 = vrot.lane.b32.xlu1 %v3521_v31, %s5621_s20  ;;  %v3330_v61 = vld [vmem:[#allocation3 + $0x31] sm:$0xff]  ;;  %v2996_v4 = vadd.f32 %v6997_v55, %v2960_v56 }
 0x53b   : > { %3968 = vrot.lane.b32.xlu2 %v3329_v50, %s5619_s14  ;;  %3776 = vrot.lane.b32.xlu0 %v3711_v3, %s5620_s15  ;;  %3298 = vst.msk [vmem:[#allocation4 + $0x40] sm:$0xff] %vm453_vm2, %v3712_v26 }
 0x53c   : > { %5500 = vmatmul.msk.bf16.gmra.mxu3 %vm453_vm2, %v3043_v46  ;;  %v3028_v54 = vmax.f32 %v2996_v4, 0.0 }
 0x53d   : > { %v3128_v18 = vpop.f32.mrf.mxu3 }
 0x53e   : > { %v3129_v48 = vadd.f32 %v7057_v11, %v3128_v18 }
 0x540   : > { %v3202_v59 = vmax.f32 %v3129_v48, 0.0 }
 0x541   : > { %v7096_v51 = vld [vmem:[#allocation3 + $0x32] sm:$0xff]  ;;  %v7098_v29 = vld [vmem:[#allocation3 + $0x3a] sm:$0xff] }
 0x542   : > { %3234 = vst.msk [vmem:[#allocation3 + $0x49] sm:$0xff] %vm453_vm2, %v3202_v59  ;;  %3778 = vrot.lane.b32.xlu1 %v3712_v26, %s5620_s15  ;;  %v4287_v1 = vld [vmem:[#allocation3 + $0x38] sm:$0xff]  ;;  %v2926_v59 = vld [vmem:[#allocation2 + $0xe8] sm:$0xff] }
 0x543   : > { %3398 = vrot.lane.b32.xlu2 %v3330_v61, %s5617_s29  ;;  %4158 = vrot.lane.b32.xlu0 %v3520_v24, %s5621_s20  ;;  %4702 = vst.msk [vmem:[#allocation4 + $0x8] sm:$0xff] %vm453_vm2, %v7096_v51  ;;  %v3331_v35 = vld [vmem:[#allocation3 + $0x39] sm:$0xff]  ;;  %v2959_v24 = vmul.f32 %v6991_v7, %v2923_v2  ;;  %v2962_v38 = vmul.f32 %v6991_v7, %v2926_v59 }
 0x544   : > { %4703 = vst.msk [vmem:[#allocation4 + $0x18] sm:$0xff] %vm453_vm2, %v7098_v29 }
 0x545   : > { %v3130_v13 = vpop.f32.mrf.mxu3  ;;  %3299 = vst.msk [vmem:[#allocation4 + $0x50] sm:$0xff] %vm453_vm2, %v4287_v1  ;;  %v2995_v41 = vadd.f32 %v6997_v55, %v2959_v24 }
 0x546   : > { %v3131_v19 = vadd.f32 %v7057_v11, %v3130_v13 }
 0x548   : > { %v3203_v63 = vmax.f32 %v3131_v19, 0.0  ;;  %v2998_v19 = vadd.f32 %v6997_v55, %v2962_v38  ;;  %v5579_v38 = vld [vmem:[%s8195_s10 + $0x38] sm:$0xff] }
 0x549   : > { %v7111_v8 = vld [vmem:[#allocation3 + $0x48] sm:$0xff]  ;;  %4950 = vmatpush.bf16.msrb.mxu0 %v5579_v38 }
 0x54a   : > { %3235 = vst.msk [vmem:[#allocation3 + $0x51] sm:$0xff] %vm453_vm2, %v3203_v63  ;;  %4542 = vrot.lane.b32.xlu1 %v3330_v61, %s5622_s22  ;;  %v4735_v52 = vld [vmem:[#allocation4 + $0x8] sm:$0xff]  ;;  %v3332_v58 = vld [vmem:[#allocation3 + $0x49] sm:$0xff]  ;;  %v3030_v62 = vmax.f32 %v2998_v19, 0.0 }
 0x54b   : > { %4350 = vrot.lane.b32.xlu2 %v3712_v26, %s5623_s23  ;;  %3970 = vrot.lane.b32.xlu0 %v3330_v61, %s5619_s14  ;;  %v4737_v10 = vld [vmem:[#allocation4 + $0x18] sm:$0xff]  ;;  %3300 = vst.msk [vmem:[#allocation4 + $0x60] sm:$0xff] %vm453_vm2, %v7111_v8  ;;  %v3027_v26 = vmax.f32 %v2995_v41, 0.0 }
 0x54c   : > { %5501 = vmatmul.msk.bf16.gmra.mxu3 %vm453_vm2, %v3044_v0  ;;  %v4799_v30 = vpack.c.bf16 %v4737_v10, %v4735_v52 }
 0x54d   : > { %v3133_v47 = vpop.f32.mrf.mxu3  ;;  %v3046_v15 = vpack.c.bf16 %v3028_v54, %v3027_v26 }
 0x54e   : > { %5542 = vmatmul.msk.bf16.vlgmr.msrb.gmra.mxu2 %vm453_vm2, %v4799_v30  ;;  %v3134_v34 = vadd.f32 %v7057_v11, %v3133_v47 }
 0x550   : > { %v3204_v25 = vmax.f32 %v3134_v34, 0.0 }
 0x551   : > { %v7125_v23 = vld [vmem:[#allocation3 + $0x4a] sm:$0xff]  ;;  %v7127_v20 = vld [vmem:[#allocation3 + $0x52] sm:$0xff] }
 0x552   : > { %3236 = vst.msk [vmem:[#allocation3 + $0x61] sm:$0xff] %vm453_vm2, %v3204_v25  ;;  %3590 = vrot.lane.b32.xlu1 %v7096_v51, %s5618_s30  ;;  %v7134_v60 = vld [vmem:[#allocation3 + $0x50] sm:$0xff]  ;;  %v2928_v25 = vld [vmem:[#allocation2 + $0xf8] sm:$0xff] }
 0x553   : > { %3592 = vrot.lane.b32.xlu2 %v7098_v29, %s5618_s30  ;;  %3400 = vrot.lane.b32.xlu0 %v3331_v35, %s5617_s29  ;;  %4704 = vst.msk [vmem:[#allocation4 + $0x28] sm:$0xff] %vm453_vm2, %v7125_v23  ;;  %v3333_v47 = vld [vmem:[#allocation3 + $0x51] sm:$0xff]  ;;  %v2964_v28 = vmul.f32 %v6991_v7, %v2928_v25 }
 0x554   : > { %4705 = vst.msk [vmem:[#allocation4 + $0x38] sm:$0xff] %vm453_vm2, %v7127_v20 }
 0x555   : > { %v3135_v32 = vpop.f32.mrf.mxu3  ;;  %3301 = vst.msk [vmem:[#allocation4 + $0x70] sm:$0xff] %vm453_vm2, %v7134_v60 }
 0x556   : > { %v3136_v33 = vadd.f32 %v7057_v11, %v3135_v32 }
 0x558   : > { %v3205_v45 = vmax.f32 %v3136_v33, 0.0 }
 0x559   : > { %v7145_v6 = vld [vmem:[#allocation3 + $0x60] sm:$0xff] }
 0x55a   : > { %3237 = vst.msk [vmem:[#allocation3 + $0x69] sm:$0xff] %vm453_vm2, %v3205_v45  ;;  %3972 = vrot.lane.b32.xlu1 %v3331_v35, %s5619_s14  ;;  %v4739_v43 = vld [vmem:[#allocation4 + $0x28] sm:$0xff] }
 0x55b   : > { %3780 = vrot.lane.b32.xlu2 %v4287_v1, %s5620_s15  ;;  %4352 = vrot.lane.b32.xlu0 %v4287_v1, %s5623_s23  ;;  %v4741_v40 = vld [vmem:[#allocation4 + $0x38] sm:$0xff]  ;;  %3302 = vst.msk [vmem:[#allocation4 + $0x80] sm:$0xff] %vm453_vm2, %v7145_v6 }
 0x55c   : > { %5502 = vmatmul.msk.bf16.gmra.mxu3 %vm453_vm2, %v3045_v49  ;;  %v4801_v42 = vpack.c.bf16 %v4741_v40, %v4739_v43  ;;  %v3000_v49 = vadd.f32 %v6997_v55, %v2964_v28  ;;  %v2999_v40 = vadd.f32 %v6997_v55, %v2963_v36 }
 0x55d   : > { %v3138_v50 = vpop.f32.mrf.mxu3 }
 0x55e   : > { %5543 = vmatmul.msk.bf16.gmra.mxu2 %vm453_vm2, %v4801_v42  ;;  %v3139_v31 = vadd.f32 %v7057_v11, %v3138_v50  ;;  %v3032_v50 = vmax.f32 %v3000_v49, 0.0 }
 0x560   : > { %v3206_v3 = vmax.f32 %v3139_v31, 0.0 }
 0x561   : > { %v7159_v14 = vld [vmem:[#allocation3 + $0x62] sm:$0xff]  ;;  %v7161_v22 = vld [vmem:[#allocation3 + $0x6a] sm:$0xff] }
 0x562   : > { %3238 = vst.msk [vmem:[#allocation3 + $0x79] sm:$0xff] %vm453_vm2, %v3206_v3  ;;  %3402 = vrot.lane.b32.xlu1 %v3332_v58, %s5617_s29  ;;  %v7166_v17 = vld [vmem:[#allocation3 + $0x68] sm:$0xff] }
 0x563   : > { %4544 = vrot.lane.b32.xlu2 %v3331_v35, %s5622_s22  ;;  %4164 = vrot.lane.b32.xlu0 %v7098_v29, %s5621_s20  ;;  %4706 = vst.msk [vmem:[#allocation4 + $0x48] sm:$0xff] %vm453_vm2, %v7159_v14  ;;  %v2925_v29 = vld [vmem:[#allocation2 + $0xe0] sm:$0xff] }
 0x564   : > { %4707 = vst.msk [vmem:[#allocation4 + $0x58] sm:$0xff] %vm453_vm2, %v7161_v22  ;;  %v2961_v13 = vmul.f32 %v6991_v7, %v2925_v29  ;;  %v3334_v3 = vld [vmem:[#allocation3 + $0x61] sm:$0xff] }
 0x565   : > { %v3140_v46 = vpop.f32.mrf.mxu3  ;;  %3303 = vst.msk [vmem:[#allocation4 + $0x90] sm:$0xff] %vm453_vm2, %v7166_v17 }
 0x566   : > { %v3141_v53 = vadd.f32 %v7057_v11, %v3140_v46 }
 0x568   : > { %v3207_v18 = vmax.f32 %v3141_v53, 0.0 }
 0x569   : > { %v7178_v48 = vld [vmem:[#allocation3 + $0x78] sm:$0xff] }
 0x56a   : > { %3239 = vst.msk [vmem:[#allocation3 + $0x81] sm:$0xff] %vm453_vm2, %v3207_v18  ;;  %4354 = vrot.lane.b32.xlu1 %v7111_v8, %s5623_s23  ;;  %v4743_v57 = vld [vmem:[#allocation4 + $0x48] sm:$0xff] }
 0x56b   : > { %4162 = vrot.lane.b32.xlu2 %v7096_v51, %s5621_s20  ;;  %3782 = vrot.lane.b32.xlu0 %v7111_v8, %s5620_s15  ;;  %v4745_v61 = vld [vmem:[#allocation4 + $0x58] sm:$0xff]  ;;  %3304 = vst.msk [vmem:[#allocation4 + $0xa0] sm:$0xff] %vm453_vm2, %v7178_v48  ;;  %v2997_v8 = vadd.f32 %v6997_v55, %v2961_v13 }
 0x56c   : > { %5503 = vmatmul.msk.bf16.gmra.mxu3 %vm453_vm2, %v3046_v15  ;;  %v4803_v5 = vpack.c.bf16 %v4745_v61, %v4743_v57 }
 0x56d   : > { %v3143_v1 = vpop.f32.mrf.mxu3  ;;  %v3029_v30 = vmax.f32 %v2997_v8, 0.0 }
 0x56e   : > { %5544 = vmatmul.msk.bf16.gmra.mxu2 %vm453_vm2, %v4803_v5  ;;  %v3144_v51 = vadd.f32 %v7057_v11, %v3143_v1  ;;  %v3335_v5 = vld [vmem:[#allocation3 + $0x69] sm:$0xff] }
 0x56f   : > { %v3047_v12 = vpack.c.bf16 %v3030_v62, %v3029_v30  ;;  %v5578_v62 = vld [vmem:[%s8195_s10 + $0x30] sm:$0xff] }
 0x570   : > { %v3208_v39 = vmax.f32 %v3144_v51, 0.0  ;;  %4951 = vmatpush.bf16.msrb.mxu0 %v5578_v62 }
 0x571   : > { %v7195_v9 = vld [vmem:[#allocation3 + $0x7a] sm:$0xff]  ;;  %v7197_v63 = vld [vmem:[#allocation3 + $0x82] sm:$0xff] }
 0x572   : > { %3240 = vst.msk [vmem:[#allocation3 + $0x91] sm:$0xff] %vm453_vm2, %v3208_v39  ;;  %3596 = vrot.lane.b32.xlu1 %v7127_v20, %s5618_s30  ;;  %v7203_v0 = vld [vmem:[#allocation3 + $0x80] sm:$0xff] }
 0x573   : > { %3974 = vrot.lane.b32.xlu2 %v3332_v58, %s5619_s14  ;;  %4546 = vrot.lane.b32.xlu0 %v3332_v58, %s5622_s22  ;;  %4708 = vst.msk [vmem:[#allocation4 + $0x68] sm:$0xff] %vm453_vm2, %v7195_v9 }
 0x574   : > { %4709 = vst.msk [vmem:[#allocation4 + $0x78] sm:$0xff] %vm453_vm2, %v7197_v63 }
 0x575   : > { %v3145_v52 = vpop.f32.mrf.mxu3  ;;  %3305 = vst.msk [vmem:[#allocation4 + $0xb0] sm:$0xff] %vm453_vm2, %v7203_v0 }
 0x576   : > { %v3146_v10 = vadd.f32 %v7057_v11, %v3145_v52 }
 0x578   : > { %v3209_v44 = vmax.f32 %v3146_v10, 0.0 }
 0x579   : > { %v7214_v34 = vld [vmem:[#allocation3 + $0x90] sm:$0xff] }
 0x57a   : > { %3241 = vst.msk [vmem:[#allocation3 + $0x99] sm:$0xff] %vm453_vm2, %v3209_v44  ;;  %3784 = vrot.lane.b32.xlu1 %v7134_v60, %s5620_s15  ;;  %v4747_v27 = vld [vmem:[#allocation4 + $0x68] sm:$0xff] }
 0x57b   : > { %3404 = vrot.lane.b32.xlu2 %v3333_v47, %s5617_s29  ;;  %3594 = vrot.lane.b32.xlu0 %v7125_v23, %s5618_s30  ;;  %v4749_v21 = vld [vmem:[#allocation4 + $0x78] sm:$0xff]  ;;  %3306 = vst.msk [vmem:[#allocation4 + $0xc0] sm:$0xff] %vm453_vm2, %v7214_v34 }
 0x57c   : > { %5504 = vmatmul.msk.bf16.gmra.mxu3 %vm453_vm2, %v3047_v12  ;;  %v4805_v35 = vpack.c.bf16 %v4749_v21, %v4747_v27 }
 0x57d   : > { %v3148_v32 = vpop.f32.mrf.mxu3 }
 0x57e   : > { %5545 = vmatmul.msk.bf16.gmra.mxu2 %vm453_vm2, %v4805_v35  ;;  %v3149_v33 = vadd.f32 %v7057_v11, %v3148_v32 }
 0x580   : > { %v3210_v45 = vmax.f32 %v3149_v33, 0.0 }
 0x581   : > { %v7230_v43 = vld [vmem:[#allocation3 + $0x92] sm:$0xff]  ;;  %v7232_v2 = vld [vmem:[#allocation3 + $0x9a] sm:$0xff] }
 0x582   : > { %3242 = vst.msk [vmem:[#allocation3 + $0xa9] sm:$0xff] %vm453_vm2, %v3210_v45  ;;  %4548 = vrot.lane.b32.xlu1 %v3333_v47, %s5622_s22  ;;  %v7242_v7 = vld [vmem:[#allocation3 + $0x98] sm:$0xff] }
 0x583   : > { %4356 = vrot.lane.b32.xlu2 %v7134_v60, %s5623_s23  ;;  %3976 = vrot.lane.b32.xlu0 %v3333_v47, %s5619_s14  ;;  %4710 = vst.msk [vmem:[#allocation4 + $0x88] sm:$0xff] %vm453_vm2, %v7230_v43  ;;  %v3031_v60 = vmax.f32 %v2999_v40, 0.0  ;;  %v5577_v47 = vld [vmem:[%s8195_s10 + $0x28] sm:$0xff]  ;;  %v5575_v45 = vld [vmem:[%s8195_s10 + $0x18] sm:$0xff] }
 0x584   : > { %4711 = vst.msk [vmem:[#allocation4 + $0x98] sm:$0xff] %vm453_vm2, %v7232_v2  ;;  %4952 = vmatpush.bf16.msrb.mxu0 %v5577_v47 }
 0x585   : > { %v3775_v42 = vpop.permute.xlu2 %3774  ;;  %v3150_v16 = vpop.f32.mrf.mxu3  ;;  %3307 = vst.msk [vmem:[#allocation4 + $0xd0] sm:$0xff] %vm453_vm2, %v7242_v7  ;;  %v3048_v31 = vpack.c.bf16 %v3032_v50, %v3031_v60  ;;  %v3336_v60 = vld [vmem:[#allocation3 + $0x79] sm:$0xff] }
 0x586   : > { %3870 = vst.msk [vmem:[#allocation4] sm:$0xff] %vm1472_vm7, %v3775_v42  ;;  %v3151_v24 = vadd.f32 %v7057_v11, %v3150_v16 }
 0x588   : > { %v3211_v55 = vmax.f32 %v3151_v24, 0.0  ;;  %4953 = vmatpush.bf16.msrb.mxu0 %v5576_v37 }
 0x589   : > { %v7250_v56 = vld [vmem:[#allocation3 + $0xa8] sm:$0xff] }
 0x58a   : > { %3243 = vst.msk [vmem:[#allocation3 + $0xb1] sm:$0xff] %vm453_vm2, %v3211_v55  ;;  %4166 = vrot.lane.b32.xlu1 %v7125_v23, %s5621_s20  ;;  %v4751_v58 = vld [vmem:[#allocation4 + $0x88] sm:$0xff] }
 0x58b   : > { %4168 = vrot.lane.b32.xlu2 %v7127_v20, %s5621_s20  ;;  %3406 = vrot.lane.b32.xlu0 %v3334_v3, %s5617_s29  ;;  %v4753_v41 = vld [vmem:[#allocation4 + $0x98] sm:$0xff]  ;;  %3308 = vst.msk [vmem:[#allocation4 + $0xe0] sm:$0xff] %vm453_vm2, %v7250_v56 }
 0x58c   : > { %5505 = vmatmul.msk.bf16.gmra.mxu3 %vm453_vm2, %v3048_v31  ;;  %v4807_v4 = vpack.c.bf16 %v4753_v41, %v4751_v58  ;;  %4954 = vmatpush.bf16.msrb.mxu0 %v5575_v45 }
 0x58d   : > { %v3587_v46 = vpop.permute.xlu2 %3586  ;;  %v3153_v26 = vpop.f32.mrf.mxu3 }
 0x58e   : > { %5546 = vmatmul.msk.bf16.gmra.mxu2 %vm453_vm2, %v4807_v4  ;;  %v3154_v23 = vadd.f32 %v7057_v11, %v3153_v26  ;;  %v5573_v4 = vld [vmem:[%s8195_s10 + $0x8] sm:$0xff] }
 0x590   : > { %v3212_v53 = vmax.f32 %v3154_v23, 0.0 }
 0x591   : > { %v7263_v54 = vld [vmem:[#allocation3 + $0xaa] sm:$0xff]  ;;  %v7265_v20 = vld [vmem:[#allocation3 + $0xb2] sm:$0xff] }
 0x592   : > { %3244 = vst.msk [vmem:[#allocation3 + $0xc1] sm:$0xff] %vm453_vm2, %v3212_v53  ;;  %3978 = vrot.lane.b32.xlu1 %v3334_v3, %s5619_s14  ;;  %v7271_v18 = vld [vmem:[#allocation3 + $0xb0] sm:$0xff] }
 0x593   : > { %3786 = vrot.lane.b32.xlu2 %v7145_v6, %s5620_s15  ;;  %4358 = vrot.lane.b32.xlu0 %v7145_v6, %s5623_s23  ;;  %4712 = vst.msk [vmem:[#allocation4 + $0xa8] sm:$0xff] %vm453_vm2, %v7263_v54 }
 0x594   : > { %4713 = vst.msk [vmem:[#allocation4 + $0xb8] sm:$0xff] %vm453_vm2, %v7265_v20 }
 0x595   : > { %v7277_v15 = vpop.permute.xlu2 %3968  ;;  %v3155_v57 = vpop.f32.mrf.mxu3  ;;  %3309 = vst.msk [vmem:[#allocation4 + $0xf0] sm:$0xff] %vm453_vm2, %v7271_v18 }
 0x596   : > { %v3156_v59 = vadd.f32 %v7057_v11, %v3155_v57  ;;  %v5572_v57 = vld [vmem:[%s8195_s10] sm:$0xff] }
 0x598   : > { %v3213_v61 = vmax.f32 %v3156_v59, 0.0 }
 0x599   : > { %v7284_v29 = vld [vmem:[#allocation3 + $0xc0] sm:$0xff] }
 0x59a   : > { %3245 = vst.msk [vmem:[#allocation3 + $0xc9] sm:$0xff] %vm453_vm2, %v3213_v61  ;;  %3408 = vrot.lane.b32.xlu1 %v3335_v5, %s5617_s29  ;;  %v4755_v6 = vld [vmem:[#allocation4 + $0xa8] sm:$0xff] }
 0x59b   : > { %4550 = vrot.lane.b32.xlu2 %v3334_v3, %s5622_s22  ;;  %3600 = vrot.lane.b32.xlu0 %v7161_v22, %s5618_s30  ;;  %v4757_v1 = vld [vmem:[#allocation4 + $0xb8] sm:$0xff]  ;;  %3310 = vst.msk [vmem:[#allocation4 + $0x100] sm:$0xff] %vm453_vm2, %v7284_v29  ;;  %v5574_v3 = vld [vmem:[%s8195_s10 + $0x10] sm:$0xff] }
 0x59c   : > { %v3967_v51 = vpop.permute.xlu1 %3966  ;;  %v4809_v13 = vpack.c.bf16 %v4757_v1, %v4755_v6  ;;  %v3395_v19 = vpop.permute.xlu0 %3394  ;;  %4955 = vmatpush.bf16.msrb.mxu0 %v5574_v3 }
 0x59d   : > { %v3399_v39 = vpop.permute.xlu2 %3398  ;;  %4062 = vst.msk [vmem:[#allocation4] sm:$0xff] %vm1665_vm8, %v3967_v51  ;;  %v3158_v8 = vpop.f32.mrf.mxu3 }
 0x59e   : > { %3488 = vst.msk [vmem:[#allocation4 + $0x20] sm:$0xff] %vm1086_vm5, %v3395_v19  ;;  %5547 = vmatmul.msk.bf16.gmra.mxu2 %vm453_vm2, %v4809_v13  ;;  %v3159_v52 = vadd.f32 %v7057_v11, %v3158_v8 }
 0x59f   : > { %3680 = vst.msk [vmem:[#allocation4 + $0x20] sm:$0xff] %vm1279_vm6, %v3587_v46 }
 0x5a0   : > { %3490 = vst.msk [vmem:[#allocation4 + $0x40] sm:$0xff] %vm1086_vm5, %v3399_v39  ;;  %v3214_v10 = vmax.f32 %v3159_v52, 0.0  ;;  %4956 = vmatpush.bf16.msrb.mxu0 %v5573_v4  ;;  %v3337_v39 = vld [vmem:[#allocation3 + $0x81] sm:$0xff] }
 0x5a1   : > { %v7305_v30 = vld [vmem:[#allocation3 + $0xc2] sm:$0xff]  ;;  %v7307_v44 = vld [vmem:[#allocation3 + $0xca] sm:$0xff] }
 0x5a2   : > { %3246 = vst.msk [vmem:[#allocation3 + $0xd9] sm:$0xff] %vm453_vm2, %v3214_v10  ;;  %4360 = vrot.lane.b32.xlu1 %v7166_v17, %s5623_s23  ;;  %v7323_v25 = vld [vmem:[#allocation3 + $0xc8] sm:$0xff] }
 0x5a3   : > { %3598 = vrot.lane.b32.xlu2 %v7159_v14, %s5618_s30  ;;  %3788 = vrot.lane.b32.xlu0 %v7166_v17, %s5620_s15  ;;  %4714 = vst.msk [vmem:[#allocation4 + $0xc8] sm:$0xff] %vm453_vm2, %v7305_v30 }
 0x5a4   : > { %v3397_v12 = vpop.permute.xlu1 %3396  ;;  %4715 = vst.msk [vmem:[#allocation4 + $0xd8] sm:$0xff] %vm453_vm2, %v7307_v44  ;;  %4957 = vmatpush.bf16.msrb.mxu0 %v5572_v57 }
 0x5a5   : > { %v4351_v27 = vpop.permute.xlu2 %4350  ;;  %3489 = vst.msk [vmem:[#allocation4 + $0x30] sm:$0xff] %vm1086_vm5, %v3397_v12  ;;  %v3589_v21 = vpop.permute.xlu0 %3588 }
 0x5a6   : > { %v3160_v35 = vpop.f32.mrf.mxu3  ;;  %3681 = vst.msk [vmem:[#allocation4 + $0x30] sm:$0xff] %vm1279_vm6, %v3589_v21 }
 0x5a7   : > { %v3161_v17 = vadd.f32 %v7057_v11, %v3160_v35  ;;  %3311 = vst.msk [vmem:[#allocation4 + $0x110] sm:$0xff] %vm453_vm2, %v7323_v25 }
 0x5a9   : > { %v3215_v32 = vmax.f32 %v3161_v17, 0.0  ;;  %v7333_v28 = vld [vmem:[#allocation3 + $0xd8] sm:$0xff] }
 0x5aa   : > { %4172 = vrot.lane.b32.xlu1 %v7161_v22, %s5621_s20  ;;  %v4759_v33 = vld [vmem:[#allocation4 + $0xc8] sm:$0xff]  ;;  %3312 = vst.msk [vmem:[#allocation4 + $0x120] sm:$0xff] %vm453_vm2, %v7333_v28 }
 0x5ab   : > { %3247 = vst.msk [vmem:[#allocation3 + $0xe1] sm:$0xff] %vm453_vm2, %v3215_v32  ;;  %3980 = vrot.lane.b32.xlu2 %v3335_v5, %s5619_s14  ;;  %4552 = vrot.lane.b32.xlu0 %v3335_v5, %s5622_s22  ;;  %v4761_v36 = vld [vmem:[#allocation4 + $0xd8] sm:$0xff] }
 0x5ac   : > { %v4161_v49 = vpop.permute.xlu1 %4160  ;;  %v4811_v40 = vpack.c.bf16 %v4761_v36, %v4759_v33 }
 0x5ad   : > { %v7345_v42 = vpop.permute.xlu2 %3592  ;;  %v3777_v16 = vpop.permute.xlu0 %3776 }
 0x5ae   : > { %3871 = vst.msk [vmem:[#allocation4 + $0x10] sm:$0xff] %vm1472_vm7, %v3777_v16  ;;  %5548 = vmatmul.msk.bf16.gmra.mxu2 %vm453_vm2, %v4811_v40  ;;  %v3163_v22 = vpop.f32.mrf.mxu3 }
 0x5af   : > { %4063 = vst.msk [vmem:[#allocation4 + $0x10] sm:$0xff] %vm1665_vm8, %v7277_v15  ;;  %v3164_v50 = vadd.f32 %v7057_v11, %v3163_v22 }
 0x5b0   : > { %4255 = vst.msk [vmem:[#allocation4 + $0x10] sm:$0xff] %vm1858_vm9, %v4161_v49 }
 0x5b1   : > { %v3216_v24 = vmax.f32 %v3164_v50, 0.0 }
 0x5b2   : > { %v7353_v55 = vld [vmem:[#allocation3 + $0xda] sm:$0xff]  ;;  %v7355_v31 = vld [vmem:[#allocation3 + $0xe2] sm:$0xff]  ;;  %3790 = vrot.lane.b32.xlu1 %v7178_v48, %s5620_s15 }
 0x5b3   : > { %3410 = vrot.lane.b32.xlu2 %v3336_v60, %s5617_s29  ;;  %4716 = vst.msk [vmem:[#allocation4 + $0xe8] sm:$0xff] %vm453_vm2, %v7353_v55  ;;  %4170 = vrot.lane.b32.xlu0 %v7159_v14, %s5621_s20  ;;  %v7375_v23 = vld [vmem:[#allocation3 + $0xe0] sm:$0xff] }
 0x5b4   : > { %3248 = vst.msk [vmem:[#allocation3 + $0xf1] sm:$0xff] %vm453_vm2, %v3216_v24  ;;  %v3779_v58 = vpop.permute.xlu1 %3778 }
 0x5b5   : > { %v3781_v41 = vpop.permute.xlu2 %3780  ;;  %4717 = vst.msk [vmem:[#allocation4 + $0xf8] sm:$0xff] %vm453_vm2, %v7355_v31  ;;  %v4159_v46 = vpop.permute.xlu0 %4158 }
 0x5b6   : > { %3872 = vst.msk [vmem:[#allocation4 + $0x20] sm:$0xff] %vm1472_vm7, %v3779_v58  ;;  %v3165_v26 = vpop.f32.mrf.mxu3 }
 0x5b7   : > { %4254 = vst.msk [vmem:[#allocation4] sm:$0xff] %vm1858_vm9, %v4159_v46  ;;  %v3166_v14 = vadd.f32 %v7057_v11, %v3165_v26 }
 0x5b8   : > { %4446 = vst.msk [vmem:[#allocation4] sm:$0xff] %vm2052_vm10, %v4351_v27 }
 0x5b9   : > { %3873 = vst.msk [vmem:[#allocation4 + $0x30] sm:$0xff] %vm1472_vm7, %v3781_v41  ;;  %v3217_v53 = vmax.f32 %v3166_v14, 0.0 }
 0x5ba   : > { %v4763_v15 = vld [vmem:[#allocation4 + $0xe8] sm:$0xff]  ;;  %3313 = vst.msk [vmem:[#allocation4 + $0x130] sm:$0xff] %vm453_vm2, %v7375_v23  ;;  %4554 = vrot.lane.b32.xlu1 %v3336_v60, %s5622_s22 }
 0x5bb   : > { %4362 = vrot.lane.b32.xlu2 %v7178_v48, %s5623_s23  ;;  %v7388_v59 = vld [vmem:[#allocation3 + $0xf0] sm:$0xff]  ;;  %3249 = vst.msk [vmem:[#allocation3 + $0xf9] sm:$0xff] %vm453_vm2, %v3217_v53  ;;  %3982 = vrot.lane.b32.xlu0 %v3336_v60, %s5619_s14 }
 0x5bc   : > { %v4765_v61 = vld [vmem:[#allocation4 + $0xf8] sm:$0xff]  ;;  %v4543_v5 = vpop.permute.xlu1 %4542  ;;  %3314 = vst.msk [vmem:[#allocation4 + $0x140] sm:$0xff] %vm453_vm2, %v7388_v59 }
 0x5bd   : > { %v4813_v6 = vpack.c.bf16 %v4765_v61, %v4763_v15  ;;  %v4545_v1 = vpop.permute.xlu2 %4544  ;;  %v3971_v38 = vpop.permute.xlu0 %3970  ;;  %4638 = vst.msk [vmem:[#allocation4] sm:$0xff] %vm2245_vm11, %v4543_v5 }
 0x5be   : > { %4064 = vst.msk [vmem:[#allocation4 + $0x20] sm:$0xff] %vm1665_vm8, %v3971_v38 }
 0x5bf   : > { %5549 = vmatmul.msk.bf16.gmra.mxu2 %vm453_vm2, %v4813_v6  ;;  %v3168_v48 = vpop.f32.mrf.mxu3 }
 0x5c0   : > { %v3169_v51 = vadd.f32 %v7057_v11, %v3168_v48 }
 0x5c2   : > { %v3218_v13 = vmax.f32 %v3169_v51, 0.0  ;;  %3602 = vrot.lane.b32.xlu1 %v7195_v9, %s5618_s30  ;;  %v7402_v19 = vld [vmem:[#allocation3 + $0xf2] sm:$0xff]  ;;  %v7410_v47 = vld [vmem:[#allocation3 + $0xfa] sm:$0xff] }
 0x5c3   : > { %3604 = vrot.lane.b32.xlu2 %v7197_v63, %s5618_s30  ;;  %3412 = vrot.lane.b32.xlu0 %v3337_v39, %s5617_s29  ;;  %4718 = vst.msk [vmem:[#allocation4 + $0x108] sm:$0xff] %vm453_vm2, %v7402_v19  ;;  %v7415_v27 = vld [vmem:[#allocation3 + $0xf8] sm:$0xff] }
 0x5c4   : > { %3250 = vst.msk [vmem:[#allocation3 + $0x109] sm:$0xff] %vm453_vm2, %v3218_v13  ;;  %v3591_v8 = vpop.permute.xlu1 %3590  ;;  %v4734_v58 = vld [vmem:[#allocation4] sm:$0xff] }
 0x5c5   : > { %v4163_v52 = vpop.permute.xlu2 %4162  ;;  %v3401_v62 = vpop.permute.xlu0 %3400  ;;  %3682 = vst.msk [vmem:[#allocation4 + $0x40] sm:$0xff] %vm1279_vm6, %v3591_v8 }
 0x5c6   : > { %3491 = vst.msk [vmem:[#allocation4 + $0x50] sm:$0xff] %vm1086_vm5, %v3401_v62 }
 0x5c7   : > { %v3170_v10 = vpop.f32.mrf.mxu3  ;;  %3683 = vst.msk [vmem:[#allocation4 + $0x50] sm:$0xff] %vm1279_vm6, %v7345_v42 }
 0x5c8   : > { %v3171_v12 = vadd.f32 %v7057_v11, %v3170_v10  ;;  %4256 = vst.msk [vmem:[#allocation4 + $0x20] sm:$0xff] %vm1858_vm9, %v4163_v52 }
 0x5c9   : > { %4719 = vst.msk [vmem:[#allocation4 + $0x118] sm:$0xff] %vm453_vm2, %v7410_v47 }
 0x5ca   : > { %v3219_v21 = vmax.f32 %v3171_v12, 0.0  ;;  %3984 = vrot.lane.b32.xlu1 %v3337_v39, %s5619_s14  ;;  %3315 = vst.msk [vmem:[#allocation4 + $0x150] sm:$0xff] %vm453_vm2, %v7415_v27  ;;  %v4767_v33 = vld [vmem:[#allocation4 + $0x108] sm:$0xff] }
 0x5cb   : > { %3792 = vrot.lane.b32.xlu2 %v7203_v0, %s5620_s15  ;;  %v7423_v35 = vld [vmem:[#allocation3 + $0x108] sm:$0xff]  ;;  %4364 = vrot.lane.b32.xlu0 %v7203_v0, %s5623_s23  ;;  %v3338_v0 = vld [vmem:[#allocation3 + $0x91] sm:$0xff]  ;;  %v3339_v12 = vld [vmem:[#allocation3 + $0x99] sm:$0xff] }
 0x5cc   : > { %3251 = vst.msk [vmem:[#allocation3 + $0x111] sm:$0xff] %vm453_vm2, %v3219_v21  ;;  %v3973_v17 = vpop.permute.xlu1 %3972 }
 0x5cd   : > { %v3975_v37 = vpop.permute.xlu2 %3974  ;;  %3316 = vst.msk [vmem:[#allocation4 + $0x160] sm:$0xff] %vm453_vm2, %v7423_v35  ;;  %v4353_v32 = vpop.permute.xlu0 %4352 }
 0x5ce   : > { %4065 = vst.msk [vmem:[#allocation4 + $0x30] sm:$0xff] %vm1665_vm8, %v3973_v17 }
 0x5cf   : > { %4447 = vst.msk [vmem:[#allocation4 + $0x10] sm:$0xff] %vm2052_vm10, %v4353_v32  ;;  %v3173_v36 = vpop.f32.mrf.mxu3 }
 0x5d0   : > { %4639 = vst.msk [vmem:[#allocation4 + $0x10] sm:$0xff] %vm2245_vm11, %v4545_v1  ;;  %v3174_v45 = vadd.f32 %v7057_v11, %v3173_v36  ;;  %v4769_v49 = vld [vmem:[#allocation4 + $0x118] sm:$0xff] }
 0x5d1   : > { %v4815_v40 = vpack.c.bf16 %v4769_v49, %v4767_v33 }
 0x5d2   : > { %v3220_v42 = vmax.f32 %v3174_v45, 0.0  ;;  %3414 = vrot.lane.b32.xlu1 %v3338_v0, %s5617_s29 }
 0x5d3   : > { %4556 = vrot.lane.b32.xlu2 %v3337_v39, %s5622_s22  ;;  %v7438_v16 = vld [vmem:[#allocation3 + $0x10a] sm:$0xff]  ;;  %5550 = vmatmul.msk.bf16.gmra.mxu2 %vm453_vm2, %v4815_v40  ;;  %v7447_v60 = vld [vmem:[#allocation3 + $0x112] sm:$0xff] }
 0x5d4   : > { %3252 = vst.msk [vmem:[#allocation3 + $0x121] sm:$0xff] %vm453_vm2, %v3220_v42  ;;  %4176 = vrot.lane.b32.xlu0 %v7197_v63, %s5621_s20  ;;  %v3403_v22 = vpop.permute.xlu1 %3402  ;;  %v7450_v4 = vld [vmem:[#allocation3 + $0x110] sm:$0xff] }
 0x5d5   : > { %v3405_v50 = vpop.permute.xlu2 %3404  ;;  %4720 = vst.msk [vmem:[#allocation4 + $0x128] sm:$0xff] %vm453_vm2, %v7438_v16  ;;  %v4165_v24 = vpop.permute.xlu0 %4164 }
 0x5d6   : > { %3492 = vst.msk [vmem:[#allocation4 + $0x60] sm:$0xff] %vm1086_vm5, %v3403_v22 }
 0x5d7   : > { %4257 = vst.msk [vmem:[#allocation4 + $0x30] sm:$0xff] %vm1858_vm9, %v4165_v24  ;;  %v3175_v3 = vpop.f32.mrf.mxu3  ;;  %v4736_v41 = vld [vmem:[#allocation4 + $0x10] sm:$0xff] }
 0x5d8   : > { %3493 = vst.msk [vmem:[#allocation4 + $0x70] sm:$0xff] %vm1086_vm5, %v3405_v50  ;;  %v3176_v63 = vadd.f32 %v7057_v11, %v3175_v3  ;;  %v4798_v46 = vpack.c.bf16 %v4736_v41, %v4734_v58  ;;  %v7529_v58 = vld [vmem:[%s8194_s9] ss:$0 sm:$0xff] }
 0x5d9   : > { %4721 = vst.msk [vmem:[#allocation4 + $0x138] sm:$0xff] %vm453_vm2, %v7447_v60 }
 0x5da   : > { %v3221_v26 = vmax.f32 %v3176_v63, 0.0  ;;  %4958 = vmatmul.bf16.vlgmr.msrb.gmra.mxu0 %v4798_v46  ;;  %3317 = vst.msk [vmem:[#allocation4 + $0x170] sm:$0xff] %vm453_vm2, %v7450_v4  ;;  %4366 = vrot.lane.b32.xlu1 %v7214_v34, %s5623_s23  ;;  %v3340_v46 = vld [vmem:[#allocation3 + $0xa9] sm:$0xff] }
 0x5db   : > { %4174 = vrot.lane.b32.xlu2 %v7195_v9, %s5621_s20  ;;  %v7462_v14 = vld [vmem:[#allocation3 + $0x120] sm:$0xff] }
 0x5dc   : > { %3253 = vst.msk [vmem:[#allocation3 + $0x129] sm:$0xff] %vm453_vm2, %v3221_v26  ;;  %3794 = vrot.lane.b32.xlu0 %v7214_v34, %s5620_s15  ;;  %v4355_v53 = vpop.permute.xlu1 %4354  ;;  %v4771_v61 = vld [vmem:[#allocation4 + $0x128] sm:$0xff] }
 0x5dd   : > { %v4357_v15 = vpop.permute.xlu2 %4356  ;;  %3318 = vst.msk [vmem:[#allocation4 + $0x180] sm:$0xff] %vm453_vm2, %v7462_v14  ;;  %v3783_v57 = vpop.permute.xlu0 %3782 }
 0x5de   : > { %4448 = vst.msk [vmem:[#allocation4 + $0x20] sm:$0xff] %vm2052_vm10, %v4355_v53 }
 0x5df   : > { %3874 = vst.msk [vmem:[#allocation4 + $0x40] sm:$0xff] %vm1472_vm7, %v3783_v57  ;;  %v3178_v5 = vpop.f32.mrf.mxu3 }
 0x5e0   : > { %4066 = vst.msk [vmem:[#allocation4 + $0x40] sm:$0xff] %vm1665_vm8, %v3975_v37  ;;  %v4773_v9 = vld [vmem:[#allocation4 + $0x138] sm:$0xff]  ;;  %v3179_v6 = vadd.f32 %v7057_v11, %v3178_v5 }
 0x5e1   : > { %v4817_v1 = vpack.c.bf16 %v4773_v9, %v4771_v61  ;;  %4449 = vst.msk [vmem:[#allocation4 + $0x30] sm:$0xff] %vm2052_vm10, %v4357_v15 }
 0x5e2   : > { %v3222_v34 = vmax.f32 %v3179_v6, 0.0  ;;  %3608 = vrot.lane.b32.xlu1 %v7232_v2, %s5618_s30 }
 0x5e3   : > { %3986 = vrot.lane.b32.xlu2 %v3338_v0, %s5619_s14  ;;  %v7477_v38 = vld [vmem:[#allocation3 + $0x122] sm:$0xff]  ;;  %5551 = vmatmul.msk.bf16.gmra.mxu2 %vm453_vm2, %v4817_v1  ;;  %v7482_v13 = vld [vmem:[#allocation3 + $0x12a] sm:$0xff] }
 0x5e4   : > { %3254 = vst.msk [vmem:[#allocation3 + $0x139] sm:$0xff] %vm453_vm2, %v3222_v34  ;;  %4558 = vrot.lane.b32.xlu0 %v3338_v0, %s5622_s22  ;;  %v3597_v48 = vpop.permute.xlu1 %3596  ;;  %v7487_v8 = vld [vmem:[#allocation3 + $0x128] sm:$0xff] }
 0x5e5   : > { %v4169_v51 = vpop.permute.xlu2 %4168  ;;  %4722 = vst.msk [vmem:[#allocation4 + $0x148] sm:$0xff] %vm453_vm2, %v7477_v38  ;;  %v4547_v39 = vpop.permute.xlu0 %4546 }
 0x5e6   : > { %3685 = vst.msk [vmem:[#allocation4 + $0x70] sm:$0xff] %vm1279_vm6, %v3597_v48  ;;  %v7550_v48 = vpop.f32.mrf.mxu2 }
 0x5e7   : > { %4640 = vst.msk [vmem:[#allocation4 + $0x20] sm:$0xff] %vm2245_vm11, %v4547_v39  ;;  %v3180_v52 = vpop.f32.mrf.mxu3 }
 0x5e8   : > { %v3181_v62 = vadd.f32 %v7057_v11, %v3180_v52  ;;  %4723 = vst.msk [vmem:[#allocation4 + $0x158] sm:$0xff] %vm453_vm2, %v7482_v13 }
 0x5e9   : > { %3319 = vst.msk [vmem:[#allocation4 + $0x190] sm:$0xff] %vm453_vm2, %v7487_v8 }
 0x5ea   : > { %v3223_v10 = vmax.f32 %v3181_v62, 0.0  ;;  %3796 = vrot.lane.b32.xlu1 %v7242_v7, %s5620_s15 }
 0x5eb   : > { %3416 = vrot.lane.b32.xlu2 %v3339_v12, %s5617_s29  ;;  %v7498_v21 = vld [vmem:[#allocation3 + $0x138] sm:$0xff] }
 0x5ec   : > { %3255 = vst.msk [vmem:[#allocation3 + $0x141] sm:$0xff] %vm453_vm2, %v3223_v10  ;;  %3606 = vrot.lane.b32.xlu0 %v7230_v43, %s5618_s30  ;;  %v3785_v17 = vpop.permute.xlu1 %3784  ;;  %v4775_v37 = vld [vmem:[#allocation4 + $0x148] sm:$0xff] }
 0x5ed   : > { %v3787_v32 = vpop.permute.xlu2 %3786  ;;  %3320 = vst.msk [vmem:[#allocation4 + $0x1a0] sm:$0xff] %vm453_vm2, %v7498_v21  ;;  %v3595_v33 = vpop.permute.xlu0 %3594 }
 0x5ee   : > { %3875 = vst.msk [vmem:[#allocation4 + $0x50] sm:$0xff] %vm1472_vm7, %v3785_v17  ;;  %v4738_v57 = vld [vmem:[#allocation4 + $0x20] sm:$0xff] }
 0x5ef   : > { %3684 = vst.msk [vmem:[#allocation4 + $0x60] sm:$0xff] %vm1279_vm6, %v3595_v33  ;;  %v4777_v36 = vld [vmem:[#allocation4 + $0x158] sm:$0xff]  ;;  %v3183_v45 = vpop.f32.mrf.mxu3  ;;  %v3341_v33 = vld [vmem:[#allocation3 + $0xb1] sm:$0xff] }
 0x5f0   : > { %v4819_v49 = vpack.c.bf16 %v4777_v36, %v4775_v37  ;;  %3876 = vst.msk [vmem:[#allocation4 + $0x60] sm:$0xff] %vm1472_vm7, %v3787_v32  ;;  %v3184_v40 = vadd.f32 %v7057_v11, %v3183_v45  ;;  %v7573_v45 = vpop.f32.mrf.mxu2 }
 0x5f2   : > { %v3224_v42 = vmax.f32 %v3184_v40, 0.0  ;;  %4560 = vrot.lane.b32.xlu1 %v3339_v12, %s5622_s22 }
 0x5f3   : > { %4368 = vrot.lane.b32.xlu2 %v7242_v7, %s5623_s23  ;;  %v7512_v0 = vld [vmem:[#allocation3 + $0x13a] sm:$0xff]  ;;  %5552 = vmatmul.msk.bf16.gmra.mxu2 %vm453_vm2, %v4819_v49  ;;  %v7520_v24 = vld [vmem:[#allocation3 + $0x142] sm:$0xff] }
 0x5f4   : > { %3256 = vst.msk [vmem:[#allocation3 + $0x151] sm:$0xff] %vm453_vm2, %v3224_v42  ;;  %3988 = vrot.lane.b32.xlu0 %v3339_v12, %s5619_s14  ;;  %v4549_v22 = vpop.permute.xlu1 %4548  ;;  %v7523_v3 = vld [vmem:[#allocation3 + $0x140] sm:$0xff] }
 0x5f5   : > { %v4551_v50 = vpop.permute.xlu2 %4550  ;;  %4724 = vst.msk [vmem:[#allocation4 + $0x168] sm:$0xff] %vm453_vm2, %v7512_v0  ;;  %v3977_v11 = vpop.permute.xlu0 %3976 }
 0x5f6   : > { %4641 = vst.msk [vmem:[#allocation4 + $0x30] sm:$0xff] %vm2245_vm11, %v4549_v22 }
 0x5f7   : > { %4067 = vst.msk [vmem:[#allocation4 + $0x50] sm:$0xff] %vm1665_vm8, %v3977_v11  ;;  %v3185_v7 = vpop.f32.mrf.mxu3 }
 0x5f8   : > { %4259 = vst.msk [vmem:[#allocation4 + $0x50] sm:$0xff] %vm1858_vm9, %v4169_v51  ;;  %v3186_v41 = vadd.f32 %v7529_v58, %v3185_v7 }
 0x5f9   : > { %4725 = vst.msk [vmem:[#allocation4 + $0x178] sm:$0xff] %vm453_vm2, %v7520_v24 }
 0x5fa   : > { %v3225_v63 = vmax.f32 %v3186_v41, 0.0  ;;  %3321 = vst.msk [vmem:[#allocation4 + $0x1b0] sm:$0xff] %vm453_vm2, %v7523_v3  ;;  %4178 = vrot.lane.b32.xlu1 %v7230_v43, %s5621_s20 }
 0x5fb   : > { %4180 = vrot.lane.b32.xlu2 %v7232_v2, %s5621_s20  ;;  %v7540_v26 = vld [vmem:[#allocation3 + $0x150] sm:$0xff] }
 0x5fc   : > { %3257 = vst.msk [vmem:[#allocation3 + $0x159] sm:$0xff] %vm453_vm2, %v3225_v63  ;;  %3418 = vrot.lane.b32.xlu0 %v3340_v46, %s5617_s29  ;;  %v4167_v53 = vpop.permute.xlu1 %4166  ;;  %v4779_v5 = vld [vmem:[#allocation4 + $0x168] sm:$0xff] }
 0x5fd   : > { %v3599_v15 = vpop.permute.xlu2 %3598  ;;  %v4740_v61 = vld [vmem:[#allocation4 + $0x30] sm:$0xff]  ;;  %3322 = vst.msk [vmem:[#allocation4 + $0x1c0] sm:$0xff] %vm453_vm2, %v7540_v26  ;;  %v3407_v43 = vpop.permute.xlu0 %3406 }
 0x5fe   : > { %4258 = vst.msk [vmem:[#allocation4 + $0x40] sm:$0xff] %vm1858_vm9, %v4167_v53  ;;  %v4800_v9 = vpack.c.bf16 %v4740_v61, %v4738_v57  ;;  %v7593_v57 = vpop.f32.mrf.mxu2 }
 0x5ff   : > { %3494 = vst.msk [vmem:[#allocation4 + $0x80] sm:$0xff] %vm1086_vm5, %v3407_v43  ;;  %v3188_v2 = vpop.f32.mrf.mxu3 }
 0x600   : > { %v4781_v6 = vld [vmem:[#allocation4 + $0x178] sm:$0xff]  ;;  %3686 = vst.msk [vmem:[#allocation4 + $0x80] sm:$0xff] %vm1279_vm6, %v3599_v15  ;;  %v3189_v1 = vadd.f32 %v7529_v58, %v3188_v2  ;;  %4963 = vmatmul.bf16.gmra.mxu0 %v4800_v9 }
 0x601   : > { %v4821_v34 = vpack.c.bf16 %v4781_v6, %v4779_v5 }
 0x602   : > { %v3226_v51 = vmax.f32 %v3189_v1, 0.0  ;;  %3990 = vrot.lane.b32.xlu1 %v3340_v46, %s5619_s14 }
 0x603   : > { %3798 = vrot.lane.b32.xlu2 %v7250_v56, %s5620_s15  ;;  %v4694_v39 = vld [vmem:[#allocation3 + $0x152] sm:$0xff]  ;;  %5553 = vmatmul.msk.bf16.gmra.mxu2 %vm453_vm2, %v4821_v34  ;;  %v4695_v12 = vld [vmem:[#allocation3 + $0x15a] sm:$0xff] }
 0x604   : > { %3258 = vst.msk [vmem:[#allocation3 + $0x169] sm:$0xff] %vm453_vm2, %v3226_v51  ;;  %4370 = vrot.lane.b32.xlu0 %v7250_v56, %s5623_s23  ;;  %v3979_v52 = vpop.permute.xlu1 %3978  ;;  %v7562_v37 = vld [vmem:[#allocation3 + $0x158] sm:$0xff] }
 0x605   : > { %v3981_v62 = vpop.permute.xlu2 %3980  ;;  %4726 = vst.msk [vmem:[#allocation4 + $0x188] sm:$0xff] %vm453_vm2, %v4694_v39  ;;  %v4359_v10 = vpop.permute.xlu0 %4358 }
 0x606   : > { %4068 = vst.msk [vmem:[#allocation4 + $0x60] sm:$0xff] %vm1665_vm8, %v3979_v52  ;;  %v7614_v51 = vpop.f32.mrf.mxu2 }
 0x607   : > { %4450 = vst.msk [vmem:[#allocation4 + $0x40] sm:$0xff] %vm2052_vm10, %v4359_v10  ;;  %v3190_v17 = vpop.f32.mrf.mxu3 }
 0x608   : > { %4642 = vst.msk [vmem:[#allocation4 + $0x40] sm:$0xff] %vm2245_vm11, %v4551_v50  ;;  %v3191_v32 = vadd.f32 %v7529_v58, %v3190_v17 }
 0x609   : > { %4727 = vst.msk [vmem:[#allocation4 + $0x198] sm:$0xff] %vm453_vm2, %v4695_v12 }
 0x60a   : > { %v3227_v56 = vmax.f32 %v3191_v32, 0.0  ;;  %3323 = vst.msk [vmem:[#allocation4 + $0x1d0] sm:$0xff] %vm453_vm2, %v7562_v37  ;;  %3420 = vrot.lane.b32.xlu1 %v3341_v33, %s5617_s29 }
 0x60b   : > { %4562 = vrot.lane.b32.xlu2 %v3340_v46, %s5622_s22  ;;  %v7571_v36 = vld [vmem:[#allocation3 + $0x168] sm:$0xff] }
 0x60c   : > { %3259 = vst.msk [vmem:[#allocation3 + $0x171] sm:$0xff] %vm453_vm2, %v3227_v56  ;;  %3612 = vrot.lane.b32.xlu0 %v7265_v20, %s5618_s30  ;;  %v3409_v49 = vpop.permute.xlu1 %3408  ;;  %v4783_v22 = vld [vmem:[#allocation4 + $0x188] sm:$0xff] }
 0x60d   : > { %v3411_v40 = vpop.permute.xlu2 %3410  ;;  %3324 = vst.msk [vmem:[#allocation4 + $0x1e0] sm:$0xff] %vm453_vm2, %v7571_v36  ;;  %v3601_v42 = vpop.permute.xlu0 %3600 }
 0x60e   : > { %3495 = vst.msk [vmem:[#allocation4 + $0x90] sm:$0xff] %vm1086_vm5, %v3409_v49 }
 0x60f   : > { %3687 = vst.msk [vmem:[#allocation4 + $0x90] sm:$0xff] %vm1279_vm6, %v3601_v42  ;;  %v3193_v50 = vpop.f32.mrf.mxu3  ;;  %v4742_v56 = vld [vmem:[#allocation4 + $0x40] sm:$0xff] }
 0x610   : > { %v4785_v11 = vld [vmem:[#allocation4 + $0x198] sm:$0xff]  ;;  %3496 = vst.msk [vmem:[#allocation4 + $0xa0] sm:$0xff] %vm1086_vm5, %v3411_v40  ;;  %v3194_v7 = vadd.f32 %v7529_v58, %v3193_v50 }
 0x611   : > { %v4823_v41 = vpack.c.bf16 %v4785_v11, %v4783_v22 }
 0x612   : > { %v3228_v63 = vmax.f32 %v3194_v7, 0.0  ;;  %4372 = vrot.lane.b32.xlu1 %v7271_v18, %s5623_s23 }
 0x613   : > { %3610 = vrot.lane.b32.xlu2 %v7263_v54, %s5618_s30  ;;  %v4696_v46 = vld [vmem:[#allocation3 + $0x16a] sm:$0xff]  ;;  %5554 = vmatmul.msk.bf16.gmra.mxu2 %vm453_vm2, %v4823_v41  ;;  %v7596_v43 = vld [vmem:[#allocation3 + $0x172] sm:$0xff] }
 0x614   : > { %3260 = vst.msk [vmem:[#allocation3 + $0x181] sm:$0xff] %vm453_vm2, %v3228_v63  ;;  %3800 = vrot.lane.b32.xlu0 %v7271_v18, %s5620_s15  ;;  %v4361_v53 = vpop.permute.xlu1 %4360  ;;  %v7599_v9 = vld [vmem:[#allocation3 + $0x170] sm:$0xff] }
 0x615   : > { %v4363_v15 = vpop.permute.xlu2 %4362  ;;  %4728 = vst.msk [vmem:[#allocation4 + $0x1a8] sm:$0xff] %vm453_vm2, %v4696_v46  ;;  %v3789_v61 = vpop.permute.xlu0 %3788  ;;  %v3343_v41 = vld [vmem:[#allocation3 + $0xc9] sm:$0xff] }
 0x616   : > { %4451 = vst.msk [vmem:[#allocation4 + $0x50] sm:$0xff] %vm2052_vm10, %v4361_v53 }
 0x617   : > { %3877 = vst.msk [vmem:[#allocation4 + $0x70] sm:$0xff] %vm1472_vm7, %v3789_v61  ;;  %v3195_v5 = vpop.f32.mrf.mxu3 }
 0x618   : > { %4069 = vst.msk [vmem:[#allocation4 + $0x70] sm:$0xff] %vm1665_vm8, %v3981_v62  ;;  %v3196_v18 = vadd.f32 %v7529_v58, %v3195_v5  ;;  %v3342_v62 = vld [vmem:[#allocation3 + $0xc1] sm:$0xff] }
 0x619   : > { %4729 = vst.msk [vmem:[#allocation4 + $0x1b8] sm:$0xff] %vm453_vm2, %v7596_v43 }
 0x61a   : > { %v3229_v2 = vmax.f32 %v3196_v18, 0.0  ;;  %3325 = vst.msk [vmem:[#allocation4 + $0x1f0] sm:$0xff] %vm453_vm2, %v7599_v9  ;;  %4184 = vrot.lane.b32.xlu1 %v7265_v20, %s5621_s20  ;;  %v3344_v18 = vld [vmem:[#allocation3 + $0xd9] sm:$0xff] }
 0x61b   : > { %3992 = vrot.lane.b32.xlu2 %v3341_v33, %s5619_s14 }
 0x61c   : > { %3261 = vst.msk [vmem:[#allocation3 + $0x189] sm:$0xff] %vm453_vm2, %v3229_v2  ;;  %4564 = vrot.lane.b32.xlu0 %v3341_v33, %s5622_s22  ;;  %v4173_v6 = vpop.permute.xlu1 %4172  ;;  %v4787_v34 = vld [vmem:[#allocation4 + $0x1a8] sm:$0xff] }
 0x61d   : > { %v3605_v1 = vpop.permute.xlu2 %3604  ;;  %4261 = vst.msk [vmem:[#allocation4 + $0x70] sm:$0xff] %vm1858_vm9, %v4173_v6  ;;  %v4553_v58 = vpop.permute.xlu0 %4552 }
 0x61e   : > { %4643 = vst.msk [vmem:[#allocation4 + $0x50] sm:$0xff] %vm2245_vm11, %v4553_v58 }
 0x620   : > { %v4789_v39 = vld [vmem:[#allocation4 + $0x1b8] sm:$0xff] }
 0x621   : > { %v4825_v52 = vpack.c.bf16 %v4789_v39, %v4787_v34 }
 0x622   : > { %3802 = vrot.lane.b32.xlu1 %v7284_v29, %s5620_s15 }
 0x623   : > { %3422 = vrot.lane.b32.xlu2 %v3342_v62, %s5617_s29  ;;  %v4698_v20 = vld [vmem:[#allocation3 + $0x182] sm:$0xff]  ;;  %v4699_v10 = vld [vmem:[#allocation3 + $0x18a] sm:$0xff]  ;;  %5555 = vmatmul.msk.bf16.gmra.mxu2 %vm453_vm2, %v4825_v52 }
 0x624   : > { %4182 = vrot.lane.b32.xlu0 %v7263_v54, %s5621_s20  ;;  %4730 = vst.msk [vmem:[#allocation4 + $0x1c8] sm:$0xff] %vm453_vm2, %v4698_v20  ;;  %v3791_v12 = vpop.permute.xlu1 %3790  ;;  %v7628_v54 = vpop.f32.mrf.mxu2  ;;  %v3345_v20 = vld [vmem:[#allocation3 + $0xe1] sm:$0xff] }
 0x625   : > { %v3793_v17 = vpop.permute.xlu2 %3792  ;;  %4731 = vst.msk [vmem:[#allocation4 + $0x1d8] sm:$0xff] %vm453_vm2, %v4699_v10  ;;  %v4171_v32 = vpop.permute.xlu0 %4170  ;;  %v4744_v33 = vld [vmem:[#allocation4 + $0x50] sm:$0xff] }
 0x626   : > { %3878 = vst.msk [vmem:[#allocation4 + $0x80] sm:$0xff] %vm1472_vm7, %v3791_v12  ;;  %v4802_v49 = vpack.c.bf16 %v4744_v33, %v4742_v56 }
 0x627   : > { %4260 = vst.msk [vmem:[#allocation4 + $0x60] sm:$0xff] %vm1858_vm9, %v4171_v32 }
 0x628   : > { %4452 = vst.msk [vmem:[#allocation4 + $0x60] sm:$0xff] %vm2052_vm10, %v4363_v15  ;;  %4968 = vmatmul.bf16.gmra.mxu0 %v4802_v49  ;;  %v3346_v49 = vld [vmem:[#allocation3 + $0xf1] sm:$0xff] }
 0x629   : > { %3879 = vst.msk [vmem:[#allocation4 + $0x90] sm:$0xff] %vm1472_vm7, %v3793_v17 }
 0x62a   : > { %4566 = vrot.lane.b32.xlu1 %v3342_v62, %s5622_s22 }
 0x62b   : > { %4374 = vrot.lane.b32.xlu2 %v7284_v29, %s5623_s23  ;;  %v4791_v42 = vld [vmem:[#allocation4 + $0x1c8] sm:$0xff] }
 0x62c   : > { %3994 = vrot.lane.b32.xlu0 %v3342_v62, %s5619_s14  ;;  %v4555_v40 = vpop.permute.xlu1 %4554  ;;  %v4793_v22 = vld [vmem:[#allocation4 + $0x1d8] sm:$0xff]  ;;  %v7640_v29 = vpop.f32.mrf.mxu2 }
 0x62d   : > { %v4557_v50 = vpop.permute.xlu2 %4556  ;;  %v3983_v11 = vpop.permute.xlu0 %3982  ;;  %4644 = vst.msk [vmem:[#allocation4 + $0x60] sm:$0xff] %vm2245_vm11, %v4555_v40  ;;  %v4827_v7 = vpack.c.bf16 %v4793_v22, %v4791_v42 }
 0x62e   : > { %4070 = vst.msk [vmem:[#allocation4 + $0x80] sm:$0xff] %vm1665_vm8, %v3983_v11 }
 0x632   : > { %3614 = vrot.lane.b32.xlu1 %v7305_v30, %s5618_s30 }
 0x633   : > { %3616 = vrot.lane.b32.xlu2 %v7307_v44, %s5618_s30  ;;  %5556 = vmatmul.msk.bf16.gmra.mxu2 %vm453_vm2, %v4827_v7 }
 0x634   : > { %3424 = vrot.lane.b32.xlu0 %v3343_v41, %s5617_s29  ;;  %v3603_v63 = vpop.permute.xlu1 %3602 }
 0x635   : > { %v4175_v46 = vpop.permute.xlu2 %4174  ;;  %v3413_v53 = vpop.permute.xlu0 %3412  ;;  %3688 = vst.msk [vmem:[#allocation4 + $0xa0] sm:$0xff] %vm1279_vm6, %v3603_v63 }
 0x636   : > { %3497 = vst.msk [vmem:[#allocation4 + $0xb0] sm:$0xff] %vm1086_vm5, %v3413_v53 }
 0x637   : > { %3689 = vst.msk [vmem:[#allocation4 + $0xb0] sm:$0xff] %vm1279_vm6, %v3605_v1  ;;  %v4746_v1 = vld [vmem:[#allocation4 + $0x60] sm:$0xff] }
 0x638   : > { %4262 = vst.msk [vmem:[#allocation4 + $0x80] sm:$0xff] %vm1858_vm9, %v4175_v46 }
 0x63a   : > { %3996 = vrot.lane.b32.xlu1 %v3343_v41, %s5619_s14 }
 0x63b   : > { %3804 = vrot.lane.b32.xlu2 %v7323_v25, %s5620_s15 }
 0x63c   : > { %4376 = vrot.lane.b32.xlu0 %v7323_v25, %s5623_s23  ;;  %v3985_v15 = vpop.permute.xlu1 %3984 }
 0x63d   : > { %v3987_v61 = vpop.permute.xlu2 %3986  ;;  %v4365_v5 = vpop.permute.xlu0 %4364  ;;  %4071 = vst.msk [vmem:[#allocation4 + $0x90] sm:$0xff] %vm1665_vm8, %v3985_v15 }
 0x63e   : > { %4453 = vst.msk [vmem:[#allocation4 + $0x70] sm:$0xff] %vm2052_vm10, %v4365_v5 }
 0x63f   : > { %4645 = vst.msk [vmem:[#allocation4 + $0x70] sm:$0xff] %vm2245_vm11, %v4557_v50 }
 0x642   : > { %3426 = vrot.lane.b32.xlu1 %v3344_v18, %s5617_s29 }
 0x643   : > { %4568 = vrot.lane.b32.xlu2 %v3343_v41, %s5622_s22  ;;  %v3347_v41 = vld [vmem:[#allocation3 + $0xf9] sm:$0xff] }
 0x644   : > { %4188 = vrot.lane.b32.xlu0 %v7307_v44, %s5621_s20  ;;  %v3415_v2 = vpop.permute.xlu1 %3414 }
 0x645   : > { %v3417_v6 = vpop.permute.xlu2 %3416  ;;  %3498 = vst.msk [vmem:[#allocation4 + $0xc0] sm:$0xff] %vm1086_vm5, %v3415_v2  ;;  %v3348_v2 = vld [vmem:[#allocation3 + $0x109] sm:$0xff] }
 0x646   : > { %v4177_v25 = vpop.permute.xlu0 %4176  ;;  %v4748_v58 = vld [vmem:[#allocation4 + $0x70] sm:$0xff]  ;;  %3499 = vst.msk [vmem:[#allocation4 + $0xd0] sm:$0xff] %vm1086_vm5, %v3417_v6 }
 0x647   : > { %4263 = vst.msk [vmem:[#allocation4 + $0x90] sm:$0xff] %vm1858_vm9, %v4177_v25  ;;  %v4804_v34 = vpack.c.bf16 %v4748_v58, %v4746_v1 }
 0x649   : > { %4973 = vmatmul.bf16.gmra.mxu0 %v4804_v34 }
 0x64a   : > { %4378 = vrot.lane.b32.xlu1 %v7333_v28, %s5623_s23 }
 0x64b   : > { %4186 = vrot.lane.b32.xlu2 %v7305_v30, %s5621_s20 }
 0x64c   : > { %3806 = vrot.lane.b32.xlu0 %v7333_v28, %s5620_s15  ;;  %v4367_v44 = vpop.permute.xlu1 %4366 }
 0x64d   : > { %v4369_v39 = vpop.permute.xlu2 %4368  ;;  %4454 = vst.msk [vmem:[#allocation4 + $0x80] sm:$0xff] %vm2052_vm10, %v4367_v44 }
 0x64e   : > { %v3795_v52 = vpop.permute.xlu0 %3794  ;;  %4455 = vst.msk [vmem:[#allocation4 + $0x90] sm:$0xff] %vm2052_vm10, %v4369_v39 }
 0x64f   : > { %3880 = vst.msk [vmem:[#allocation4 + $0xa0] sm:$0xff] %vm1472_vm7, %v3795_v52  ;;  %v3349_v52 = vld [vmem:[#allocation3 + $0x111] sm:$0xff] }
 0x650   : > { %4072 = vst.msk [vmem:[#allocation4 + $0xa0] sm:$0xff] %vm1665_vm8, %v3987_v61 }
 0x652   : > { %3620 = vrot.lane.b32.xlu1 %v7355_v31, %s5618_s30 }
 0x653   : > { %3998 = vrot.lane.b32.xlu2 %v3344_v18, %s5619_s14 }
 0x654   : > { %4570 = vrot.lane.b32.xlu0 %v3344_v18, %s5622_s22  ;;  %v3609_v30 = vpop.permute.xlu1 %3608 }
 0x655   : > { %v4181_v28 = vpop.permute.xlu2 %4180  ;;  %3691 = vst.msk [vmem:[#allocation4 + $0xd0] sm:$0xff] %vm1279_vm6, %v3609_v30 }
 0x656   : > { %v4559_v62 = vpop.permute.xlu0 %4558 }
 0x657   : > { %4646 = vst.msk [vmem:[#allocation4 + $0x80] sm:$0xff] %vm2245_vm11, %v4559_v62 }
 0x65a   : > { %3808 = vrot.lane.b32.xlu1 %v7375_v23, %s5620_s15 }
 0x65b   : > { %3428 = vrot.lane.b32.xlu2 %v3345_v20, %s5617_s29 }
 0x65c   : > { %3618 = vrot.lane.b32.xlu0 %v7353_v55, %s5618_s30  ;;  %v3797_v10 = vpop.permute.xlu1 %3796 }
 0x65d   : > { %v3799_v12 = vpop.permute.xlu2 %3798  ;;  %3881 = vst.msk [vmem:[#allocation4 + $0xb0] sm:$0xff] %vm1472_vm7, %v3797_v10 }
 0x65e   : > { %v3607_v17 = vpop.permute.xlu0 %3606  ;;  %v4750_v42 = vld [vmem:[#allocation4 + $0x80] sm:$0xff] }
 0x65f   : > { %3690 = vst.msk [vmem:[#allocation4 + $0xc0] sm:$0xff] %vm1279_vm6, %v3607_v17 }
 0x660   : > { %3882 = vst.msk [vmem:[#allocation4 + $0xc0] sm:$0xff] %vm1472_vm7, %v3799_v12  ;;  %v3350_v12 = vld [vmem:[#allocation3 + $0x121] sm:$0xff] }
 0x662   : > { %4572 = vrot.lane.b32.xlu1 %v3345_v20, %s5622_s22 }
 0x663   : > { %4380 = vrot.lane.b32.xlu2 %v7375_v23, %s5623_s23 }
 0x664   : > { %4000 = vrot.lane.b32.xlu0 %v3345_v20, %s5619_s14  ;;  %v4561_v32 = vpop.permute.xlu1 %4560 }
 0x665   : > { %v4563_v56 = vpop.permute.xlu2 %4562  ;;  %4647 = vst.msk [vmem:[#allocation4 + $0x90] sm:$0xff] %vm2245_vm11, %v4561_v32 }
 0x666   : > { %v3989_v33 = vpop.permute.xlu0 %3988 }
 0x667   : > { %4073 = vst.msk [vmem:[#allocation4 + $0xb0] sm:$0xff] %vm1665_vm8, %v3989_v33 }
 0x668   : > { %4265 = vst.msk [vmem:[#allocation4 + $0xb0] sm:$0xff] %vm1858_vm9, %v4181_v28 }
 0x66a   : > { %4190 = vrot.lane.b32.xlu1 %v7353_v55, %s5621_s20 }
 0x66b   : > { %4192 = vrot.lane.b32.xlu2 %v7355_v31, %s5621_s20 }
 0x66c   : > { %3430 = vrot.lane.b32.xlu0 %v3346_v49, %s5617_s29  ;;  %v4179_v23 = vpop.permute.xlu1 %4178  ;;  %v4752_v22 = vld [vmem:[#allocation4 + $0x90] sm:$0xff] }
 0x66d   : > { %v3611_v40 = vpop.permute.xlu2 %3610  ;;  %4264 = vst.msk [vmem:[#allocation4 + $0xa0] sm:$0xff] %vm1858_vm9, %v4179_v23  ;;  %v4806_v11 = vpack.c.bf16 %v4752_v22, %v4750_v42  ;;  %v3351_v22 = vld [vmem:[#allocation3 + $0x129] sm:$0xff] }
 0x66e   : > { %v3419_v50 = vpop.permute.xlu0 %3418 }
 0x66f   : > { %3500 = vst.msk [vmem:[#allocation4 + $0xe0] sm:$0xff] %vm1086_vm5, %v3419_v50  ;;  %4978 = vmatmul.bf16.gmra.mxu0 %v4806_v11 }
 0x670   : > { %3692 = vst.msk [vmem:[#allocation4 + $0xe0] sm:$0xff] %vm1279_vm6, %v3611_v40 }
 0x672   : > { %4002 = vrot.lane.b32.xlu1 %v3346_v49, %s5619_s14 }
 0x673   : > { %3810 = vrot.lane.b32.xlu2 %v7388_v59, %s5620_s15 }
 0x674   : > { %4382 = vrot.lane.b32.xlu0 %v7388_v59, %s5623_s23  ;;  %v3991_v55 = vpop.permute.xlu1 %3990 }
 0x675   : > { %v3993_v31 = vpop.permute.xlu2 %3992  ;;  %4074 = vst.msk [vmem:[#allocation4 + $0xc0] sm:$0xff] %vm1665_vm8, %v3991_v55 }
 0x676   : > { %v4371_v7 = vpop.permute.xlu0 %4370 }
 0x677   : > { %4456 = vst.msk [vmem:[#allocation4 + $0xa0] sm:$0xff] %vm2052_vm10, %v4371_v7 }
 0x678   : > { %4648 = vst.msk [vmem:[#allocation4 + $0xa0] sm:$0xff] %vm2245_vm11, %v4563_v56 }
 0x67a   : > { %3432 = vrot.lane.b32.xlu1 %v3347_v41, %s5617_s29 }
 0x67b   : > { %4574 = vrot.lane.b32.xlu2 %v3346_v49, %s5622_s22 }
 0x67c   : > { %3624 = vrot.lane.b32.xlu0 %v7410_v47, %s5618_s30  ;;  %v3421_v63 = vpop.permute.xlu1 %3420 }
 0x67d   : > { %3501 = vst.msk [vmem:[#allocation4 + $0xf0] sm:$0xff] %vm1086_vm5, %v3421_v63  ;;  %v3423_v46 = vpop.permute.xlu2 %3422  ;;  %v3352_v63 = vld [vmem:[#allocation3 + $0x139] sm:$0xff] }
 0x67e   : > { %v3613_v59 = vpop.permute.xlu0 %3612  ;;  %3502 = vst.msk [vmem:[#allocation4 + $0x100] sm:$0xff] %vm1086_vm5, %v3423_v46 }
 0x67f   : > { %3693 = vst.msk [vmem:[#allocation4 + $0xf0] sm:$0xff] %vm1279_vm6, %v3613_v59  ;;  %v4754_v1 = vld [vmem:[#allocation4 + $0xa0] sm:$0xff] }
 0x682   : > { %4384 = vrot.lane.b32.xlu1 %v7415_v27, %s5623_s23 }
 0x683   : > { %3622 = vrot.lane.b32.xlu2 %v7402_v19, %s5618_s30 }
 0x684   : > { %3812 = vrot.lane.b32.xlu0 %v7415_v27, %s5620_s15  ;;  %v4373_v53 = vpop.permute.xlu1 %4372 }
 0x685   : > { %4457 = vst.msk [vmem:[#allocation4 + $0xb0] sm:$0xff] %vm2052_vm10, %v4373_v53  ;;  %v4375_v61 = vpop.permute.xlu2 %4374 }
 0x686   : > { %v3801_v15 = vpop.permute.xlu0 %3800 }
 0x687   : > { %3883 = vst.msk [vmem:[#allocation4 + $0xd0] sm:$0xff] %vm1472_vm7, %v3801_v15 }
 0x688   : > { %4075 = vst.msk [vmem:[#allocation4 + $0xd0] sm:$0xff] %vm1665_vm8, %v3993_v31 }
 0x68a   : > { %4196 = vrot.lane.b32.xlu1 %v7410_v47, %s5621_s20 }
 0x68b   : > { %4004 = vrot.lane.b32.xlu2 %v3347_v41, %s5619_s14 }
 0x68c   : > { %4576 = vrot.lane.b32.xlu0 %v3347_v41, %s5622_s22  ;;  %v4185_v5 = vpop.permute.xlu1 %4184 }
 0x68d   : > { %4267 = vst.msk [vmem:[#allocation4 + $0xd0] sm:$0xff] %vm1858_vm9, %v4185_v5  ;;  %v3617_v18 = vpop.permute.xlu2 %3616 }
 0x68e   : > { %v4565_v27 = vpop.permute.xlu0 %4564 }
 0x68f   : > { %4649 = vst.msk [vmem:[#allocation4 + $0xb0] sm:$0xff] %vm2245_vm11, %v4565_v27  ;;  %v3353_v27 = vld [vmem:[#allocation3 + $0x141] sm:$0xff] }
 0x692   : > { %3814 = vrot.lane.b32.xlu1 %v7423_v35, %s5620_s15 }
 0x693   : > { %3434 = vrot.lane.b32.xlu2 %v3348_v2, %s5617_s29 }
 0x694   : > { %4194 = vrot.lane.b32.xlu0 %v7402_v19, %s5621_s20  ;;  %v3803_v47 = vpop.permute.xlu1 %3802 }
 0x695   : > { %3884 = vst.msk [vmem:[#allocation4 + $0xe0] sm:$0xff] %vm1472_vm7, %v3803_v47  ;;  %v3805_v25 = vpop.permute.xlu2 %3804 }
 0x696   : > { %v4183_v6 = vpop.permute.xlu0 %4182  ;;  %v4756_v58 = vld [vmem:[#allocation4 + $0xb0] sm:$0xff]  ;;  %3885 = vst.msk [vmem:[#allocation4 + $0xf0] sm:$0xff] %vm1472_vm7, %v3805_v25 }
 0x697   : > { %4266 = vst.msk [vmem:[#allocation4 + $0xc0] sm:$0xff] %vm1858_vm9, %v4183_v6  ;;  %v4808_v34 = vpack.c.bf16 %v4756_v58, %v4754_v1  ;;  %v4119_v25 = vld [vmem:[#allocation3 + $0x142] sm:$0xff]  ;;  %v3354_v58 = vld [vmem:[#allocation3 + $0x151] sm:$0xff] }
 0x698   : > { %4458 = vst.msk [vmem:[#allocation4 + $0xc0] sm:$0xff] %vm2052_vm10, %v4375_v61 }
 0x699   : > { %4983 = vmatmul.bf16.gmra.mxu0 %v4808_v34  ;;  %v4118_v34 = vld [vmem:[#allocation3 + $0x13a] sm:$0xff] }
 0x69a   : > { %4578 = vrot.lane.b32.xlu1 %v3348_v2, %s5622_s22 }
 0x69b   : > { %4386 = vrot.lane.b32.xlu2 %v7423_v35, %s5623_s23 }
 0x69c   : > { %4006 = vrot.lane.b32.xlu0 %v3348_v2, %s5619_s14  ;;  %v4567_v19 = vpop.permute.xlu1 %4566 }
 0x69d   : > { %4650 = vst.msk [vmem:[#allocation4 + $0xc0] sm:$0xff] %vm2245_vm11, %v4567_v19  ;;  %v4569_v39 = vpop.permute.xlu2 %4568  ;;  %v7842_v19 = vpop.f32.mrf.mxu0 }
 0x69e   : > { %v3995_v44 = vpop.permute.xlu0 %3994 }
 0x69f   : > { %4076 = vst.msk [vmem:[#allocation4 + $0xe0] sm:$0xff] %vm1665_vm8, %v3995_v44 }
 0x6a2   : > { %3626 = vrot.lane.b32.xlu1 %v7438_v16, %s5618_s30 }
 0x6a3   : > { %3628 = vrot.lane.b32.xlu2 %v7447_v60, %s5618_s30 }
 0x6a4   : > { %3436 = vrot.lane.b32.xlu0 %v3349_v52, %s5617_s29  ;;  %v3615_v30 = vpop.permute.xlu1 %3614  ;;  %v4758_v56 = vld [vmem:[#allocation4 + $0xc0] sm:$0xff] }
 0x6a5   : > { %3694 = vst.msk [vmem:[#allocation4 + $0x100] sm:$0xff] %vm1279_vm6, %v3615_v30  ;;  %v4187_v28 = vpop.permute.xlu2 %4186 }
 0x6a6   : > { %v3425_v35 = vpop.permute.xlu0 %3424  ;;  %4268 = vst.msk [vmem:[#allocation4 + $0xe0] sm:$0xff] %vm1858_vm9, %v4187_v28 }
 0x6a7   : > { %3503 = vst.msk [vmem:[#allocation4 + $0x110] sm:$0xff] %vm1086_vm5, %v3425_v35 }
 0x6a8   : > { %3695 = vst.msk [vmem:[#allocation4 + $0x110] sm:$0xff] %vm1279_vm6, %v3617_v18 }
 0x6aa   : > { %4008 = vrot.lane.b32.xlu1 %v3349_v52, %s5619_s14 }
 0x6ab   : > { %3816 = vrot.lane.b32.xlu2 %v7450_v4, %s5620_s15 }
 0x6ac   : > { %4388 = vrot.lane.b32.xlu0 %v7450_v4, %s5623_s23  ;;  %v3997_v62 = vpop.permute.xlu1 %3996 }
 0x6ad   : > { %4077 = vst.msk [vmem:[#allocation4 + $0xf0] sm:$0xff] %vm1665_vm8, %v3997_v62  ;;  %v3999_v10 = vpop.permute.xlu2 %3998 }
 0x6ae   : > { %v4377_v20 = vpop.permute.xlu0 %4376 }
 0x6af   : > { %4459 = vst.msk [vmem:[#allocation4 + $0xd0] sm:$0xff] %vm2052_vm10, %v4377_v20  ;;  %v7853_v20 = vpop.f32.mrf.mxu0 }
 0x6b0   : > { %4651 = vst.msk [vmem:[#allocation4 + $0xd0] sm:$0xff] %vm2245_vm11, %v4569_v39 }
 0x6b2   : > { %3438 = vrot.lane.b32.xlu1 %v3350_v12, %s5617_s29 }
 0x6b3   : > { %4580 = vrot.lane.b32.xlu2 %v3349_v52, %s5622_s22 }
 0x6b4   : > { %4200 = vrot.lane.b32.xlu0 %v7447_v60, %s5621_s20  ;;  %v3427_v17 = vpop.permute.xlu1 %3426 }
 0x6b5   : > { %3504 = vst.msk [vmem:[#allocation4 + $0x120] sm:$0xff] %vm1086_vm5, %v3427_v17  ;;  %v3429_v32 = vpop.permute.xlu2 %3428  ;;  %v3546_v17 = vld [vmem:[#allocation3 + $0x152] sm:$0xff] }
 0x6b6   : > { %v4189_v4 = vpop.permute.xlu0 %4188  ;;  %3505 = vst.msk [vmem:[#allocation4 + $0x130] sm:$0xff] %vm1086_vm5, %v3429_v32  ;;  %v3355_v32 = vld [vmem:[#allocation3 + $0x159] sm:$0xff] }
 0x6b7   : > { %4269 = vst.msk [vmem:[#allocation4 + $0xf0] sm:$0xff] %vm1858_vm9, %v4189_v4  ;;  %v4760_v33 = vld [vmem:[#allocation4 + $0xd0] sm:$0xff] }
 0x6b8   : > { %v4810_v49 = vpack.c.bf16 %v4760_v33, %v4758_v56  ;;  %v3547_v4 = vld [vmem:[#allocation3 + $0x15a] sm:$0xff]  ;;  %v7860_v56 = vpop.f32.mrf.mxu0 }
 0x6ba   : > { %4988 = vmatmul.bf16.gmra.mxu0 %v4810_v49  ;;  %4390 = vrot.lane.b32.xlu1 %v7462_v14, %s5623_s23 }
 0x6bb   : > { %4198 = vrot.lane.b32.xlu2 %v7438_v16, %s5621_s20 }
 0x6bc   : > { %3818 = vrot.lane.b32.xlu0 %v7462_v14, %s5620_s15  ;;  %v4379_v60 = vpop.permute.xlu1 %4378 }
 0x6bd   : > { %4460 = vst.msk [vmem:[#allocation4 + $0xe0] sm:$0xff] %vm2052_vm10, %v4379_v60  ;;  %v4381_v40 = vpop.permute.xlu2 %4380  ;;  %v7866_v60 = vld [vmem:[#allocation3 + $0x169] sm:$0xff] }
 0x6be   : > { %v3807_v23 = vpop.permute.xlu0 %3806  ;;  %4461 = vst.msk [vmem:[#allocation4 + $0xf0] sm:$0xff] %vm2052_vm10, %v4381_v40 }
 0x6bf   : > { %3886 = vst.msk [vmem:[#allocation4 + $0x100] sm:$0xff] %vm1472_vm7, %v3807_v23 }
 0x6c0   : > { %4078 = vst.msk [vmem:[#allocation4 + $0x100] sm:$0xff] %vm1665_vm8, %v3999_v10 }
 0x6c2   : > { %3632 = vrot.lane.b32.xlu1 %v7482_v13, %s5618_s30 }
 0x6c3   : > { %4010 = vrot.lane.b32.xlu2 %v3350_v12, %s5619_s14 }
 0x6c4   : > { %4582 = vrot.lane.b32.xlu0 %v3350_v12, %s5622_s22  ;;  %v3621_v16 = vpop.permute.xlu1 %3620 }
 0x6c5   : > { %3697 = vst.msk [vmem:[#allocation4 + $0x130] sm:$0xff] %vm1279_vm6, %v3621_v16  ;;  %v4193_v42 = vpop.permute.xlu2 %4192 }
 0x6c6   : > { %v4571_v14 = vpop.permute.xlu0 %4570 }
 0x6c7   : > { %4652 = vst.msk [vmem:[#allocation4 + $0xe0] sm:$0xff] %vm2245_vm11, %v4571_v14  ;;  %v7876_v14 = vpop.f32.mrf.mxu0 }
 0x6ca   : > { %3820 = vrot.lane.b32.xlu1 %v7487_v8, %s5620_s15 }
 0x6cb   : > { %3440 = vrot.lane.b32.xlu2 %v3351_v22, %s5617_s29 }
 0x6cc   : > { %3630 = vrot.lane.b32.xlu0 %v7477_v38, %s5618_s30  ;;  %v3809_v50 = vpop.permute.xlu1 %3808 }
 0x6cd   : > { %3887 = vst.msk [vmem:[#allocation4 + $0x110] sm:$0xff] %vm1472_vm7, %v3809_v50  ;;  %v3811_v55 = vpop.permute.xlu2 %3810 }
 0x6ce   : > { %v3619_v11 = vpop.permute.xlu0 %3618  ;;  %v4762_v59 = vld [vmem:[#allocation4 + $0xe0] sm:$0xff] }
 0x6cf   : > { %3696 = vst.msk [vmem:[#allocation4 + $0x120] sm:$0xff] %vm1279_vm6, %v3619_v11 }
 0x6d0   : > { %3888 = vst.msk [vmem:[#allocation4 + $0x120] sm:$0xff] %vm1472_vm7, %v3811_v55  ;;  %v7886_v55 = vpop.f32.mrf.mxu0 }
 0x6d2   : > { %4584 = vrot.lane.b32.xlu1 %v3351_v22, %s5622_s22 }
 0x6d3   : > { %4392 = vrot.lane.b32.xlu2 %v7487_v8, %s5623_s23 }
 0x6d4   : > { %4012 = vrot.lane.b32.xlu0 %v3351_v22, %s5619_s14  ;;  %v4573_v31 = vpop.permute.xlu1 %4572 }
 0x6d5   : > { %4653 = vst.msk [vmem:[#allocation4 + $0xf0] sm:$0xff] %vm2245_vm11, %v4573_v31  ;;  %v4575_v41 = vpop.permute.xlu2 %4574 }
 0x6d6   : > { %v4001_v7 = vpop.permute.xlu0 %4000 }
 0x6d7   : > { %4079 = vst.msk [vmem:[#allocation4 + $0x110] sm:$0xff] %vm1665_vm8, %v4001_v7  ;;  %v7889_v7 = vpop.f32.mrf.mxu2 }
 0x6d8   : > { %4271 = vst.msk [vmem:[#allocation4 + $0x110] sm:$0xff] %vm1858_vm9, %v4193_v42 }
 0x6da   : > { %4202 = vrot.lane.b32.xlu1 %v7477_v38, %s5621_s20 }
 0x6db   : > { %4204 = vrot.lane.b32.xlu2 %v7482_v13, %s5621_s20 }
 0x6dc   : > { %3442 = vrot.lane.b32.xlu0 %v3352_v63, %s5617_s29  ;;  %v4191_v8 = vpop.permute.xlu1 %4190  ;;  %v4764_v46 = vld [vmem:[#allocation4 + $0xf0] sm:$0xff] }
 0x6dd   : > { %4270 = vst.msk [vmem:[#allocation4 + $0x100] sm:$0xff] %vm1858_vm9, %v4191_v8  ;;  %v4812_v15 = vpack.c.bf16 %v4764_v46, %v4762_v59  ;;  %v3623_v61 = vpop.permute.xlu2 %3622  ;;  %v7899_v46 = vpop.f32.mrf.mxu0 }
 0x6de   : > { %v3431_v53 = vpop.permute.xlu0 %3430 }
 0x6df   : > { %3506 = vst.msk [vmem:[#allocation4 + $0x140] sm:$0xff] %vm1086_vm5, %v3431_v53  ;;  %4993 = vmatmul.bf16.gmra.mxu0 %v4812_v15  ;;  %v7904_v53 = vpop.f32.mrf.mxu2 }
 0x6e0   : > { %3698 = vst.msk [vmem:[#allocation4 + $0x140] sm:$0xff] %vm1279_vm6, %v3623_v61 }
 0x6e2   : > { %4014 = vrot.lane.b32.xlu1 %v3352_v63, %s5619_s14 }
 0x6e3   : > { %3822 = vrot.lane.b32.xlu2 %v7498_v21, %s5620_s15 }
 0x6e4   : > { %4394 = vrot.lane.b32.xlu0 %v7498_v21, %s5623_s23  ;;  %v4003_v38 = vpop.permute.xlu1 %4002 }
 0x6e5   : > { %4080 = vst.msk [vmem:[#allocation4 + $0x120] sm:$0xff] %vm1665_vm8, %v4003_v38  ;;  %v4005_v5 = vpop.permute.xlu2 %4004 }
 0x6e6   : > { %v4383_v13 = vpop.permute.xlu0 %4382 }
 0x6e7   : > { %4462 = vst.msk [vmem:[#allocation4 + $0x100] sm:$0xff] %vm2052_vm10, %v4383_v13  ;;  %v7908_v13 = vpop.f32.mrf.mxu0 }
 0x6e8   : > { %4654 = vst.msk [vmem:[#allocation4 + $0x100] sm:$0xff] %vm2245_vm11, %v4575_v41  ;;  %v3548_v41 = vld [vmem:[#allocation3 + $0x16a] sm:$0xff] }
 0x6ea   : > { %3444 = vrot.lane.b32.xlu1 %v3353_v27, %s5617_s29 }
 0x6eb   : > { %4586 = vrot.lane.b32.xlu2 %v3352_v63, %s5622_s22 }
 0x6ec   : > { %3636 = vrot.lane.b32.xlu0 %v7520_v24, %s5618_s30  ;;  %v3433_v18 = vpop.permute.xlu1 %3432 }
 0x6ed   : > { %3507 = vst.msk [vmem:[#allocation4 + $0x150] sm:$0xff] %vm1086_vm5, %v3433_v18  ;;  %v3435_v2 = vpop.permute.xlu2 %3434 }
 0x6ee   : > { %v3625_v21 = vpop.permute.xlu0 %3624  ;;  %3508 = vst.msk [vmem:[#allocation4 + $0x160] sm:$0xff] %vm1086_vm5, %v3435_v2  ;;  %v7915_v2 = vpop.f32.mrf.mxu2 }
 0x6ef   : > { %3699 = vst.msk [vmem:[#allocation4 + $0x150] sm:$0xff] %vm1279_vm6, %v3625_v21  ;;  %v4766_v52 = vld [vmem:[#allocation4 + $0x100] sm:$0xff] }
 0x6f2   : > { %4396 = vrot.lane.b32.xlu1 %v7523_v3, %s5623_s23 }
 0x6f3   : > { %3634 = vrot.lane.b32.xlu2 %v7512_v0, %s5618_s30 }
 0x6f4   : > { %3824 = vrot.lane.b32.xlu0 %v7523_v3, %s5620_s15  ;;  %v4385_v47 = vpop.permute.xlu1 %4384 }
 0x6f5   : > { %4463 = vst.msk [vmem:[#allocation4 + $0x110] sm:$0xff] %vm2052_vm10, %v4385_v47  ;;  %v4387_v6 = vpop.permute.xlu2 %4386 }
 0x6f6   : > { %v3813_v24 = vpop.permute.xlu0 %3812 }
 0x6f7   : > { %3889 = vst.msk [vmem:[#allocation4 + $0x130] sm:$0xff] %vm1472_vm7, %v3813_v24 }
 0x6f8   : > { %4081 = vst.msk [vmem:[#allocation4 + $0x130] sm:$0xff] %vm1665_vm8, %v4005_v5  ;;  %v3740_v5 = vld [vmem:[#allocation3 + $0x180] sm:$0xff] }
 0x6fa   : > { %4208 = vrot.lane.b32.xlu1 %v4119_v25, %s5621_s20 }
 0x6fb   : > { %4016 = vrot.lane.b32.xlu2 %v3353_v27, %s5619_s14 }
 0x6fc   : > { %4588 = vrot.lane.b32.xlu0 %v3353_v27, %s5622_s22  ;;  %v4197_v0 = vpop.permute.xlu1 %4196  ;;  %v3741_v27 = vld [vmem:[#allocation3 + $0x188] sm:$0xff] }
 0x6fd   : > { %4273 = vst.msk [vmem:[#allocation4 + $0x130] sm:$0xff] %vm1858_vm9, %v4197_v0  ;;  %v3629_v1 = vpop.permute.xlu2 %3628  ;;  %v7929_v0 = vpop.f32.mrf.mxu2 }
 0x6fe   : > { %v4577_v3 = vpop.permute.xlu0 %4576 }
 0x6ff   : > { %4655 = vst.msk [vmem:[#allocation4 + $0x110] sm:$0xff] %vm2245_vm11, %v4577_v3 }
 0x702   : > { %3826 = vrot.lane.b32.xlu1 %v7540_v26, %s5620_s15 }
 0x703   : > { %3446 = vrot.lane.b32.xlu2 %v3354_v58, %s5617_s29 }
 0x704   : > { %4206 = vrot.lane.b32.xlu0 %v4118_v34, %s5621_s20  ;;  %v3815_v44 = vpop.permute.xlu1 %3814 }
 0x705   : > { %3890 = vst.msk [vmem:[#allocation4 + $0x140] sm:$0xff] %vm1472_vm7, %v3815_v44  ;;  %v3817_v35 = vpop.permute.xlu2 %3816 }
 0x706   : > { %v4195_v39 = vpop.permute.xlu0 %4194  ;;  %v4768_v30 = vld [vmem:[#allocation4 + $0x110] sm:$0xff]  ;;  %3891 = vst.msk [vmem:[#allocation4 + $0x150] sm:$0xff] %vm1472_vm7, %v3817_v35 }
 0x707   : > { %4272 = vst.msk [vmem:[#allocation4 + $0x120] sm:$0xff] %vm1858_vm9, %v4195_v39  ;;  %v4814_v28 = vpack.c.bf16 %v4768_v30, %v4766_v52  ;;  %v4123_v52 = vld [vmem:[#allocation3 + $0x172] sm:$0xff]  ;;  %v7940_v30 = vpop.f32.mrf.mxu2 }
 0x708   : > { %4464 = vst.msk [vmem:[#allocation4 + $0x120] sm:$0xff] %vm2052_vm10, %v4387_v6 }
 0x709   : > { %4998 = vmatmul.bf16.gmra.mxu0 %v4814_v28 }
 0x70a   : > { %4590 = vrot.lane.b32.xlu1 %v3354_v58, %s5622_s22 }
 0x70b   : > { %4398 = vrot.lane.b32.xlu2 %v7540_v26, %s5623_s23 }
 0x70c   : > { %4018 = vrot.lane.b32.xlu0 %v3354_v58, %s5619_s14  ;;  %v4579_v62 = vpop.permute.xlu1 %4578 }
 0x70d   : > { %4656 = vst.msk [vmem:[#allocation4 + $0x120] sm:$0xff] %vm2245_vm11, %v4579_v62  ;;  %v4581_v12 = vpop.permute.xlu2 %4580 }
 0x70e   : > { %v4007_v10 = vpop.permute.xlu0 %4006 }
 0x70f   : > { %4082 = vst.msk [vmem:[#allocation4 + $0x140] sm:$0xff] %vm1665_vm8, %v4007_v10 }
 0x712   : > { %3638 = vrot.lane.b32.xlu1 %v3546_v17, %s5618_s30 }
 0x713   : > { %3640 = vrot.lane.b32.xlu2 %v3547_v4, %s5618_s30 }
 0x714   : > { %3448 = vrot.lane.b32.xlu0 %v3355_v32, %s5617_s29  ;;  %v3627_v26 = vpop.permute.xlu1 %3626  ;;  %v4770_v50 = vld [vmem:[#allocation4 + $0x120] sm:$0xff] }
 0x715   : > { %3700 = vst.msk [vmem:[#allocation4 + $0x160] sm:$0xff] %vm1279_vm6, %v3627_v26  ;;  %v4199_v49 = vpop.permute.xlu2 %4198 }
 0x716   : > { %v3437_v33 = vpop.permute.xlu0 %3436  ;;  %4274 = vst.msk [vmem:[#allocation4 + $0x140] sm:$0xff] %vm1858_vm9, %v4199_v49 }
 0x717   : > { %3509 = vst.msk [vmem:[#allocation4 + $0x170] sm:$0xff] %vm1086_vm5, %v3437_v33 }
 0x718   : > { %3701 = vst.msk [vmem:[#allocation4 + $0x170] sm:$0xff] %vm1279_vm6, %v3629_v1 }
 0x71a   : > { %3450 = vrot.lane.b32.xlu1 %v7866_v60, %s5617_s29 }
 0x71b   : > { %3828 = vrot.lane.b32.xlu2 %v7562_v37, %s5620_s15 }
 0x71c   : > { %4400 = vrot.lane.b32.xlu0 %v7562_v37, %s5623_s23  ;;  %v4009_v23 = vpop.permute.xlu1 %4008 }
 0x71d   : > { %4083 = vst.msk [vmem:[#allocation4 + $0x150] sm:$0xff] %vm1665_vm8, %v4009_v23  ;;  %v4011_v16 = vpop.permute.xlu2 %4010  ;;  %v4124_v23 = vld [vmem:[#allocation3 + $0x182] sm:$0xff] }
 0x71e   : > { %v4389_v40 = vpop.permute.xlu0 %4388 }
 0x71f   : > { %4465 = vst.msk [vmem:[#allocation4 + $0x130] sm:$0xff] %vm2052_vm10, %v4389_v40 }
 0x720   : > { %4657 = vst.msk [vmem:[#allocation4 + $0x130] sm:$0xff] %vm2245_vm11, %v4581_v12  ;;  %v3932_v12 = vld [vmem:[#allocation3 + $0x181] sm:$0xff] }
 0x722   : > { %3644 = vrot.lane.b32.xlu1 %v7596_v43, %s5618_s30  ;;  %v3357_v43 = vld [vmem:[#allocation3 + $0x171] sm:$0xff] }
 0x723   : > { %4592 = vrot.lane.b32.xlu2 %v3355_v32, %s5622_s22 }
 0x724   : > { %3830 = vrot.lane.b32.xlu0 %v7571_v36, %s5620_s15  ;;  %v3439_v37 = vpop.permute.xlu1 %3438 }
 0x725   : > { %3510 = vst.msk [vmem:[#allocation4 + $0x180] sm:$0xff] %vm1086_vm5, %v3439_v37  ;;  %v3441_v22 = vpop.permute.xlu2 %3440 }
 0x726   : > { %v4201_v42 = vpop.permute.xlu0 %4200  ;;  %3511 = vst.msk [vmem:[#allocation4 + $0x190] sm:$0xff] %vm1086_vm5, %v3441_v22 }
 0x727   : > { %4275 = vst.msk [vmem:[#allocation4 + $0x150] sm:$0xff] %vm1858_vm9, %v4201_v42  ;;  %v4772_v11 = vld [vmem:[#allocation4 + $0x130] sm:$0xff] }
 0x728   : > { %v4816_v31 = vpack.c.bf16 %v4772_v11, %v4770_v50  ;;  %v4508_v50 = vld [vmem:[#allocation3 + $0x199] sm:$0xff] }
 0x729   : > { %v4316_v11 = vld [vmem:[#allocation3 + $0x198] sm:$0xff] }
 0x72a   : > { %5003 = vmatmul.bf16.gmra.mxu0 %v4816_v31  ;;  %3832 = vrot.lane.b32.xlu1 %v7599_v9, %s5620_s15  ;;  %v4317_v31 = vld [vmem:[#allocation3 + $0x1a0] sm:$0xff] }
 0x72b   : > { %3452 = vrot.lane.b32.xlu2 %v3357_v43, %s5617_s29 }
 0x72c   : > { %3642 = vrot.lane.b32.xlu0 %v3548_v41, %s5618_s30  ;;  %v4391_v63 = vpop.permute.xlu1 %4390 }
 0x72d   : > { %4466 = vst.msk [vmem:[#allocation4 + $0x140] sm:$0xff] %vm2052_vm10, %v4391_v63  ;;  %v4393_v59 = vpop.permute.xlu2 %4392 }
 0x72e   : > { %v3819_v8 = vpop.permute.xlu0 %3818  ;;  %4467 = vst.msk [vmem:[#allocation4 + $0x150] sm:$0xff] %vm2052_vm10, %v4393_v59  ;;  %v4509_v59 = vld [vmem:[#allocation3 + $0x1a1] sm:$0xff] }
 0x72f   : > { %3892 = vst.msk [vmem:[#allocation4 + $0x160] sm:$0xff] %vm1472_vm7, %v3819_v8 }
 0x730   : > { %4084 = vst.msk [vmem:[#allocation4 + $0x160] sm:$0xff] %vm1665_vm8, %v4011_v16 }
 0x732   : > { %4020 = vrot.lane.b32.xlu1 %v3355_v32, %s5619_s14 }
 0x733   : > { %4210 = vrot.lane.b32.xlu2 %v3546_v17, %s5621_s20  ;;  %v4507_v17 = vld [vmem:[#allocation3 + $0x189] sm:$0xff] }
 0x734   : > { %4212 = vrot.lane.b32.xlu0 %v3547_v4, %s5621_s20  ;;  %v3633_v15 = vpop.permute.xlu1 %3632  ;;  %v7953_v4 = vpop.f32.mrf.mxu2 }
 0x735   : > { %3703 = vst.msk [vmem:[#allocation4 + $0x190] sm:$0xff] %vm1279_vm6, %v3633_v15  ;;  %v4205_v38 = vpop.permute.xlu2 %4204  ;;  %v5051_v15 = vadd.f32 %v7573_v45, %v7853_v20  ;;  %v5056_v20 = vadd.f32 %v7614_v51, %v7876_v14  ;;  %v5064_v14 = vadd.f32 %v7889_v7, %v7908_v13 }
 0x736   : > { %v4583_v61 = vpop.permute.xlu0 %4582 }
 0x737   : > { %4658 = vst.msk [vmem:[#allocation4 + $0x140] sm:$0xff] %vm2245_vm11, %v4583_v61 }
 0x73a   : > { %4402 = vrot.lane.b32.xlu1 %v7571_v36, %s5623_s23  ;;  %v7922_v36 = vpop.f32.mrf.mxu0 }
 0x73b   : > { %3834 = vrot.lane.b32.xlu2 %v3740_v5, %s5620_s15  ;;  %v5066_v51 = vadd.f32 %v7904_v53, %v7922_v36 }
 0x73c   : > { %3836 = vrot.lane.b32.xlu0 %v3741_v27, %s5620_s15  ;;  %v3821_v18 = vpop.permute.xlu1 %3820  ;;  %v7965_v42 = vpop.f32.mrf.mxu2  ;;  %s8072_s15 = scalar_lea.vmem %s8196_s11, %s5560_s21 }
 0x73d   : > { %3893 = vst.msk [vmem:[#allocation4 + $0x170] sm:$0xff] %vm1472_vm7, %v3821_v18  ;;  %v3823_v47 = vpop.permute.xlu2 %3822 }
 0x73e   : > { %v3631_v21 = vpop.permute.xlu0 %3630  ;;  %v4774_v1 = vld [vmem:[#allocation4 + $0x140] sm:$0xff] }
 0x73f   : > { %3702 = vst.msk [vmem:[#allocation4 + $0x180] sm:$0xff] %vm1279_vm6, %v3631_v21 }
 0x740   : > { %3894 = vst.msk [vmem:[#allocation4 + $0x180] sm:$0xff] %vm1472_vm7, %v3823_v47 }
 0x742   : > { %4596 = vrot.lane.b32.xlu1 %v3357_v43, %s5622_s22 }
 0x743   : > { %4404 = vrot.lane.b32.xlu2 %v7599_v9, %s5623_s23  ;;  %v7934_v9 = vpop.f32.mrf.mxu0 }
 0x744   : > { %4594 = vrot.lane.b32.xlu0 %v7866_v60, %s5622_s22  ;;  %v4585_v24 = vpop.permute.xlu1 %4584  ;;  %v5080_v61 = vpop.f32.mrf.mxu2  ;;  %v5069_v7 = vadd.f32 %v7915_v2, %v7934_v9 }
 0x745   : > { %4659 = vst.msk [vmem:[#allocation4 + $0x150] sm:$0xff] %vm2245_vm11, %v4585_v24  ;;  %v4587_v25 = vpop.permute.xlu2 %4586 }
 0x746   : > { %v4013_v6 = vpop.permute.xlu0 %4012 }
 0x747   : > { %4085 = vst.msk [vmem:[#allocation4 + $0x170] sm:$0xff] %vm1665_vm8, %v4013_v6 }
 0x748   : > { %4277 = vst.msk [vmem:[#allocation4 + $0x170] sm:$0xff] %vm1858_vm9, %v4205_v38  ;;  %v5049_v38 = vadd.f32 %v7550_v48, %v7842_v19  ;;  %v5054_v48 = vadd.f32 %v7593_v57, %v7860_v56  ;;  %v5059_v19 = vadd.f32 %v7628_v54, %v7886_v55  ;;  %v5061_v56 = vadd.f32 %v7640_v29, %v7899_v46 }
 0x74a   : > { %4214 = vrot.lane.b32.xlu1 %v3548_v41, %s5621_s20 }
 0x74b   : > { %4022 = vrot.lane.b32.xlu2 %v7866_v60, %s5619_s14  ;;  %v7945_v28 = vpop.f32.mrf.mxu0  ;;  %v4125_v60 = vld [vmem:[#allocation3 + $0x18a] sm:$0xff] }
 0x74c   : > { %4024 = vrot.lane.b32.xlu0 %v3357_v43, %s5619_s14  ;;  %v4203_v3 = vpop.permute.xlu1 %4202  ;;  %v4776_v58 = vld [vmem:[#allocation4 + $0x150] sm:$0xff]  ;;  %v5083_v6 = vpop.f32.mrf.mxu2  ;;  %v5071_v53 = vadd.f32 %v7929_v0, %v7945_v28 }
 0x74d   : > { %4276 = vst.msk [vmem:[#allocation4 + $0x160] sm:$0xff] %vm1858_vm9, %v4203_v3  ;;  %v4818_v44 = vpack.c.bf16 %v4776_v58, %v4774_v1  ;;  %v3635_v39 = vpop.permute.xlu2 %3634 }
 0x74e   : > { %v3443_v34 = vpop.permute.xlu0 %3442 }
 0x74f   : > { %3512 = vst.msk [vmem:[#allocation4 + $0x1a0] sm:$0xff] %vm1086_vm5, %v3443_v34  ;;  %5008 = vmatmul.bf16.gmra.mxu0 %v4818_v44 }
 0x750   : > { %3704 = vst.msk [vmem:[#allocation4 + $0x1a0] sm:$0xff] %vm1279_vm6, %v3635_v39 }
 0x752   : > { %4408 = vrot.lane.b32.xlu1 %v3741_v27, %s5623_s23 }
 0x753   : > { %4216 = vrot.lane.b32.xlu2 %v4123_v52, %s5621_s20  ;;  %v7955_v26 = vpop.f32.mrf.mxu0 }
 0x754   : > { %4406 = vrot.lane.b32.xlu0 %v3740_v5, %s5623_s23  ;;  %v4015_v35 = vpop.permute.xlu1 %4014  ;;  %v5085_v1 = vpop.f32.mrf.mxu2  ;;  %v5074_v46 = vadd.f32 %v7940_v30, %v7955_v26 }
 0x755   : > { %4086 = vst.msk [vmem:[#allocation4 + $0x180] sm:$0xff] %vm1665_vm8, %v4015_v35  ;;  %v4017_v10 = vpop.permute.xlu2 %4016 }
 0x756   : > { %v4395_v62 = vpop.permute.xlu0 %4394 }
 0x757   : > { %4468 = vst.msk [vmem:[#allocation4 + $0x160] sm:$0xff] %vm2052_vm10, %v4395_v62 }
 0x758   : > { %4660 = vst.msk [vmem:[#allocation4 + $0x160] sm:$0xff] %vm2245_vm11, %v4587_v25 }
 0x75a   : > { %4026 = vrot.lane.b32.xlu1 %v3932_v12, %s5619_s14 }
 0x75b   : > { %4598 = vrot.lane.b32.xlu2 %v3932_v12, %s5622_s22  ;;  %v7967_v22 = vpop.f32.mrf.mxu0 }
 0x75c   : > { %4600 = vrot.lane.b32.xlu0 %v4507_v17, %s5622_s22  ;;  %v3445_v32 = vpop.permute.xlu1 %3444  ;;  %v5088_v9 = vpop.f32.mrf.mxu2  ;;  %v5076_v0 = vadd.f32 %v7953_v4, %v7967_v22 }
 0x75d   : > { %3513 = vst.msk [vmem:[#allocation4 + $0x1b0] sm:$0xff] %vm1086_vm5, %v3445_v32  ;;  %v3447_v49 = vpop.permute.xlu2 %3446 }
 0x75e   : > { %v3637_v33 = vpop.permute.xlu0 %3636  ;;  %3514 = vst.msk [vmem:[#allocation4 + $0x1c0] sm:$0xff] %vm1086_vm5, %v3447_v49 }
 0x75f   : > { %3705 = vst.msk [vmem:[#allocation4 + $0x1b0] sm:$0xff] %vm1279_vm6, %v3637_v33  ;;  %v4778_v18 = vld [vmem:[#allocation4 + $0x160] sm:$0xff] }
 0x762   : > { %4220 = vrot.lane.b32.xlu1 %v4125_v60, %s5621_s20 }
 0x763   : > { %4028 = vrot.lane.b32.xlu2 %v4507_v17, %s5619_s14  ;;  %v7975_v8 = vpop.f32.mrf.mxu0 }
 0x764   : > { %4218 = vrot.lane.b32.xlu0 %v4124_v23, %s5621_s20  ;;  %v4397_v40 = vpop.permute.xlu1 %4396  ;;  %v5079_v39 = vadd.f32 %v7965_v42, %v7975_v8  ;;  %v5090_v32 = vpop.f32.mrf.mxu2 }
 0x765   : > { %4469 = vst.msk [vmem:[#allocation4 + $0x170] sm:$0xff] %vm2052_vm10, %v4397_v40  ;;  %v4399_v37 = vpop.permute.xlu2 %4398 }
 0x766   : > { %v3825_v16 = vpop.permute.xlu0 %3824 }
 0x767   : > { %3895 = vst.msk [vmem:[#allocation4 + $0x190] sm:$0xff] %vm1472_vm7, %v3825_v16 }
 0x768   : > { %4087 = vst.msk [vmem:[#allocation4 + $0x190] sm:$0xff] %vm1665_vm8, %v4017_v10 }
 0x76a   : > { %4602 = vrot.lane.b32.xlu1 %v4508_v50, %s5622_s22 }
 0x76b   : > { %4410 = vrot.lane.b32.xlu2 %v4316_v11, %s5623_s23  ;;  %v4991_v24 = vpop.f32.mrf.mxu0 }
 0x76c   : > { %4412 = vrot.lane.b32.xlu0 %v4317_v31, %s5623_s23  ;;  %v4209_v43 = vpop.permute.xlu1 %4208  ;;  %v5081_v44 = vadd.f32 %v5080_v61, %v4991_v24  ;;  %v5093_v16 = vpop.f32.mrf.mxu2 }
 0x76d   : > { %4279 = vst.msk [vmem:[#allocation4 + $0x190] sm:$0xff] %vm1858_vm9, %v4209_v43  ;;  %v3641_v63 = vpop.permute.xlu2 %3640 }
 0x76e   : > { %v4589_v41 = vpop.permute.xlu0 %4588 }
 0x76f   : > { %4661 = vst.msk [vmem:[#allocation4 + $0x170] sm:$0xff] %vm2245_vm11, %v4589_v41 }
 0x772   : > { %5162 = vrot.lane.b32.xlu1 %v5051_v15, %s5617_s29 }
 0x773   : > { %4604 = vrot.lane.b32.xlu2 %v4509_v59, %s5622_s22  ;;  %v4994_v55 = vpop.f32.mrf.mxu0 }
 0x774   : > { %5160 = vrot.lane.b32.xlu0 %v5049_v38, %s5617_s29  ;;  %v3827_v5 = vpop.permute.xlu1 %3826  ;;  %v5084_v17 = vadd.f32 %v5083_v6, %v4994_v55  ;;  %v5095_v43 = vpop.f32.mrf.mxu2 }
 0x775   : > { %3896 = vst.msk [vmem:[#allocation4 + $0x1a0] sm:$0xff] %vm1472_vm7, %v3827_v5  ;;  %v3829_v47 = vpop.permute.xlu2 %3828 }
 0x776   : > { %v4207_v27 = vpop.permute.xlu0 %4206  ;;  %v4780_v21 = vld [vmem:[#allocation4 + $0x170] sm:$0xff]  ;;  %3897 = vst.msk [vmem:[#allocation4 + $0x1b0] sm:$0xff] %vm1472_vm7, %v3829_v47 }
 0x777   : > { %4278 = vst.msk [vmem:[#allocation4 + $0x180] sm:$0xff] %vm1858_vm9, %v4207_v27  ;;  %v4820_v45 = vpack.c.bf16 %v4780_v21, %v4778_v18 }
 0x778   : > { %4470 = vst.msk [vmem:[#allocation4 + $0x180] sm:$0xff] %vm2052_vm10, %v4399_v37 }
 0x779   : > { %5013 = vmatmul.bf16.gmra.mxu0 %v4820_v45 }
 0x77a   : > { %5168 = vrot.lane.b32.xlu1 %v5059_v19, %s5617_s29  ;;  %v4797_v19 = vld [vmem:[#allocation4 + $0x1f8] sm:$0xff] }
 0x77b   : > { %5164 = vrot.lane.b32.xlu2 %v5054_v48, %s5617_s29  ;;  %v4996_v13 = vpop.f32.mrf.mxu0  ;;  %v4795_v48 = vld [vmem:[#allocation4 + $0x1e8] sm:$0xff] }
 0x77c   : > { %5166 = vrot.lane.b32.xlu0 %v5056_v20, %s5617_s29  ;;  %v4591_v25 = vpop.permute.xlu1 %4590  ;;  %v5086_v26 = vadd.f32 %v5085_v1, %v4996_v13  ;;  %v4829_v20 = vpack.c.bf16 %v4797_v19, %v4795_v48 }
 0x77d   : > { %4662 = vst.msk [vmem:[#allocation4 + $0x180] sm:$0xff] %vm2245_vm11, %v4591_v25  ;;  %v4593_v54 = vpop.permute.xlu2 %4592 }
 0x77e   : > { %v4019_v57 = vpop.permute.xlu0 %4018  ;;  %5557 = vmatmul.msk.bf16.gmra.mxu2 %vm453_vm2, %v4829_v20 }
 0x77f   : > { %4088 = vst.msk [vmem:[#allocation4 + $0x1a0] sm:$0xff] %vm1665_vm8, %v4019_v57  ;;  %v5098_v57 = vpop.f32.mrf.mxu2 }
 0x782   : > { %5174 = vrot.lane.b32.xlu1 %v5066_v51, %s5617_s29 }
 0x783   : > { %5170 = vrot.lane.b32.xlu2 %v5061_v56, %s5617_s29 }
 0x784   : > { %5172 = vrot.lane.b32.xlu0 %v5064_v14, %s5617_s29  ;;  %v3639_v3 = vpop.permute.xlu1 %3638  ;;  %v4782_v62 = vld [vmem:[#allocation4 + $0x180] sm:$0xff] }
 0x785   : > { %3706 = vst.msk [vmem:[#allocation4 + $0x1c0] sm:$0xff] %vm1279_vm6, %v3639_v3  ;;  %v3453_v29 = vpop.permute.xlu2 %3452 }
 0x786   : > { %v3449_v58 = vpop.permute.xlu0 %3448  ;;  %3517 = vst.msk [vmem:[#allocation4 + $0x1f0] sm:$0xff] %vm1086_vm5, %v3453_v29  ;;  %v4999_v52 = vpop.f32.mrf.mxu0 }
 0x787   : > { %3515 = vst.msk [vmem:[#allocation4 + $0x1d0] sm:$0xff] %vm1086_vm5, %v3449_v58  ;;  %v5089_v4 = vadd.f32 %v5088_v9, %v4999_v52  ;;  %v5100_v3 = vpop.f32.mrf.mxu2 }
 0x788   : > { %3707 = vst.msk [vmem:[#allocation4 + $0x1d0] sm:$0xff] %vm1279_vm6, %v3641_v63 }
 0x78a   : > { %5180 = vrot.lane.b32.xlu1 %v5074_v46, %s5617_s29 }
 0x78b   : > { %5176 = vrot.lane.b32.xlu2 %v5069_v7, %s5617_s29 }
 0x78c   : > { %5178 = vrot.lane.b32.xlu0 %v5071_v53, %s5617_s29  ;;  %v3451_v36 = vpop.permute.xlu1 %3450 }
 0x78d   : > { %3516 = vst.msk [vmem:[#allocation4 + $0x1e0] sm:$0xff] %vm1086_vm5, %v3451_v36  ;;  %v4211_v2 = vpop.permute.xlu2 %4210 }
 0x78e   : > { %v4401_v34 = vpop.permute.xlu0 %4400  ;;  %4280 = vst.msk [vmem:[#allocation4 + $0x1a0] sm:$0xff] %vm1858_vm9, %v4211_v2  ;;  %v5001_v49 = vpop.f32.mrf.mxu0 }
 0x78f   : > { %4471 = vst.msk [vmem:[#allocation4 + $0x190] sm:$0xff] %vm2052_vm10, %v4401_v34  ;;  %v5091_v40 = vadd.f32 %v5090_v32, %v5001_v49 }
 0x790   : > { %4663 = vst.msk [vmem:[#allocation4 + $0x190] sm:$0xff] %vm2245_vm11, %v4593_v54 }
 0x792   : > { %5186 = vrot.lane.b32.xlu1 %v5081_v44, %s5617_s29 }
 0x793   : > { %5182 = vrot.lane.b32.xlu2 %v5076_v0, %s5617_s29 }
 0x794   : > { %5184 = vrot.lane.b32.xlu0 %v5079_v39, %s5617_s29  ;;  %v3645_v30 = vpop.permute.xlu1 %3644 }
 0x795   : > { %3709 = vst.msk [vmem:[#allocation4 + $0x1f0] sm:$0xff] %vm1279_vm6, %v3645_v30  ;;  %v3835_v28 = vpop.permute.xlu2 %3834 }
 0x796   : > { %v3831_v35 = vpop.permute.xlu0 %3830 }
 0x797   : > { %3898 = vst.msk [vmem:[#allocation4 + $0x1c0] sm:$0xff] %vm1472_vm7, %v3831_v35  ;;  %v4784_v10 = vld [vmem:[#allocation4 + $0x190] sm:$0xff] }
 0x798   : > { %v4822_v12 = vpack.c.bf16 %v4784_v10, %v4782_v62 }
 0x79a   : > { %5018 = vmatmul.bf16.gmra.mxu0 %v4822_v12  ;;  %5192 = vrot.lane.b32.xlu1 %v5089_v4, %s5617_s29 }
 0x79b   : > { %5188 = vrot.lane.b32.xlu2 %v5084_v17, %s5617_s29 }
 0x79c   : > { %5190 = vrot.lane.b32.xlu0 %v5086_v26, %s5617_s29  ;;  %v3833_v33 = vpop.permute.xlu1 %3832 }
 0x79d   : > { %3899 = vst.msk [vmem:[#allocation4 + $0x1d0] sm:$0xff] %vm1472_vm7, %v3833_v33  ;;  %v4405_v23 = vpop.permute.xlu2 %4404  ;;  %v5103_v33 = vpop.f32.mrf.mxu2 }
 0x79e   : > { %v3643_v60 = vpop.permute.xlu0 %3642 }
 0x79f   : > { %3708 = vst.msk [vmem:[#allocation4 + $0x1e0] sm:$0xff] %vm1279_vm6, %v3643_v60 }
 0x7a0   : > { %3900 = vst.msk [vmem:[#allocation4 + $0x1e0] sm:$0xff] %vm1472_vm7, %v3835_v28 }
 0x7a3   : > { %5194 = vrot.lane.b32.xlu2 %v5091_v40, %s5617_s29 }
 0x7a4   : > { %v4021_v37 = vpop.permute.xlu1 %4020 }
 0x7a5   : > { %4089 = vst.msk [vmem:[#allocation4 + $0x1b0] sm:$0xff] %vm1665_vm8, %v4021_v37  ;;  %v4023_v22 = vpop.permute.xlu2 %4022 }
 0x7a6   : > { %v4213_v42 = vpop.permute.xlu0 %4212  ;;  %4090 = vst.msk [vmem:[#allocation4 + $0x1c0] sm:$0xff] %vm1665_vm8, %v4023_v22 }
 0x7a7   : > { %4281 = vst.msk [vmem:[#allocation4 + $0x1b0] sm:$0xff] %vm1858_vm9, %v4213_v42  ;;  %v5004_v50 = vpop.f32.mrf.mxu0 }
 0x7a8   : > { %4473 = vst.msk [vmem:[#allocation4 + $0x1b0] sm:$0xff] %vm2052_vm10, %v4405_v23  ;;  %v5094_v11 = vadd.f32 %v5093_v16, %v5004_v50  ;;  %v5105_v50 = vpop.f32.mrf.mxu2 }
 0x7aa   : > { %5196 = vrot.lane.b32.xlu0 %v5094_v11, %s5617_s29 }
 0x7ac   : > { %v4403_v31 = vpop.permute.xlu1 %4402 }
 0x7ad   : > { %4472 = vst.msk [vmem:[#allocation4 + $0x1a0] sm:$0xff] %vm2052_vm10, %v4403_v31  ;;  %v4217_v63 = vpop.permute.xlu2 %4216 }
 0x7ae   : > { %v3837_v41 = vpop.permute.xlu0 %3836 }
 0x7af   : > { %3901 = vst.msk [vmem:[#allocation4 + $0x1f0] sm:$0xff] %vm1472_vm7, %v3837_v41  ;;  %v5006_v8 = vpop.f32.mrf.mxu0 }
 0x7b0   : > { %v5096_v59 = vadd.f32 %v5095_v43, %v5006_v8  ;;  %v5108_v19 = vpop.f32.mrf.mxu2 }
 0x7b2   : > { %5198 = vrot.lane.b32.xlu1 %v5096_v59, %s5617_s29 }
 0x7b4   : > { %v4597_v15 = vpop.permute.xlu1 %4596 }
 0x7b5   : > { %4665 = vst.msk [vmem:[#allocation4 + $0x1b0] sm:$0xff] %vm2245_vm11, %v4597_v15  ;;  %v4599_v38 = vpop.permute.xlu2 %4598 }
 0x7b6   : > { %v4595_v61 = vpop.permute.xlu0 %4594 }
 0x7b7   : > { %4664 = vst.msk [vmem:[#allocation4 + $0x1a0] sm:$0xff] %vm2245_vm11, %v4595_v61 }
 0x7bc   : > { %v4215_v5 = vpop.permute.xlu1 %4214  ;;  %v4788_v27 = vld [vmem:[#allocation4 + $0x1b0] sm:$0xff] }
 0x7bd   : > { %4282 = vst.msk [vmem:[#allocation4 + $0x1c0] sm:$0xff] %vm1858_vm9, %v4215_v5  ;;  %v4029_v47 = vpop.permute.xlu2 %4028 }
 0x7be   : > { %v4025_v18 = vpop.permute.xlu0 %4024  ;;  %v4786_v21 = vld [vmem:[#allocation4 + $0x1a0] sm:$0xff]  ;;  %4093 = vst.msk [vmem:[#allocation4 + $0x1f0] sm:$0xff] %vm1665_vm8, %v4029_v47 }
 0x7bf   : > { %4091 = vst.msk [vmem:[#allocation4 + $0x1d0] sm:$0xff] %vm1665_vm8, %v4025_v18  ;;  %v4824_v45 = vpack.c.bf16 %v4788_v27, %v4786_v21 }
 0x7c0   : > { %4283 = vst.msk [vmem:[#allocation4 + $0x1d0] sm:$0xff] %vm1858_vm9, %v4217_v63 }
 0x7c1   : > { %5023 = vmatmul.bf16.gmra.mxu0 %v4824_v45 }
 0x7c4   : > { %v4409_v24 = vpop.permute.xlu1 %4408 }
 0x7c5   : > { %4475 = vst.msk [vmem:[#allocation4 + $0x1d0] sm:$0xff] %vm2052_vm10, %v4409_v24  ;;  %v4411_v25 = vpop.permute.xlu2 %4410 }
 0x7c6   : > { %v4407_v6 = vpop.permute.xlu0 %4406 }
 0x7c7   : > { %4474 = vst.msk [vmem:[#allocation4 + $0x1c0] sm:$0xff] %vm2052_vm10, %v4407_v6 }
 0x7c8   : > { %4666 = vst.msk [vmem:[#allocation4 + $0x1c0] sm:$0xff] %vm2245_vm11, %v4599_v38 }
 0x7cc   : > { %v4027_v54 = vpop.permute.xlu1 %4026  ;;  %v5009_v56 = vpop.f32.mrf.mxu0 }
 0x7cd   : > { %4092 = vst.msk [vmem:[#allocation4 + $0x1e0] sm:$0xff] %vm1665_vm8, %v4027_v54  ;;  %v5099_v14 = vadd.f32 %v5098_v57, %v5009_v56  ;;  %v4605_v55 = vpop.permute.xlu2 %4604  ;;  %v5110_v54 = vpop.f32.mrf.mxu2 }
 0x7ce   : > { %v4601_v51 = vpop.permute.xlu0 %4600 }
 0x7cf   : > { %4667 = vst.msk [vmem:[#allocation4 + $0x1d0] sm:$0xff] %vm2245_vm11, %v4601_v51  ;;  %5200 = vrot.lane.b32.xlu2 %v5099_v14, %s5617_s29  ;;  %v4790_v46 = vld [vmem:[#allocation4 + $0x1c0] sm:$0xff] }
 0x7d4   : > { %v4221_v1 = vpop.permute.xlu1 %4220  ;;  %v5011_v58 = vpop.f32.mrf.mxu0 }
 0x7d5   : > { %4285 = vst.msk [vmem:[#allocation4 + $0x1f0] sm:$0xff] %vm1858_vm9, %v4221_v1  ;;  %v5101_v7 = vadd.f32 %v5100_v3, %v5011_v58  ;;  %v5165_v13 = vpop.permute.xlu2 %5164 }
 0x7d6   : > { %v4219_v29 = vpop.permute.xlu0 %4218  ;;  %v4792_v53 = vld [vmem:[#allocation4 + $0x1d0] sm:$0xff]  ;;  %5259 = vst.msk [vmem:[#allocation2 + $0x10] sm:$0xff] %vm5256_vm13, %v5165_v13 }
 0x7d7   : > { %4284 = vst.msk [vmem:[#allocation4 + $0x1e0] sm:$0xff] %vm1858_vm9, %v4219_v29  ;;  %v4826_v36 = vpack.c.bf16 %v4792_v53, %v4790_v46  ;;  %5202 = vrot.lane.b32.xlu0 %v5101_v7, %s5617_s29  ;;  %v5113_v29 = vpop.f32.mrf.mxu2 }
 0x7d8   : > { %4476 = vst.msk [vmem:[#allocation4 + $0x1e0] sm:$0xff] %vm2052_vm10, %v4411_v25 }
 0x7d9   : > { %5028 = vmatmul.bf16.gmra.mxu0 %v4826_v36 }
 0x7dc   : > { %v4603_v34 = vpop.permute.xlu1 %4602 }
 0x7dd   : > { %4668 = vst.msk [vmem:[#allocation4 + $0x1e0] sm:$0xff] %vm2245_vm11, %v4603_v34  ;;  %v5171_v9 = vpop.permute.xlu2 %5170  ;;  %v5291_v0 = vld [vmem:[#allocation2 + $0x10] sm:$0xff] }
 0x7de   : > { %v4413_v2 = vpop.permute.xlu0 %4412  ;;  %5324 = vst.msk [vmem:[%s8072_s15 + $0x10] sm:$0xff] %vm5321_vm14, %v5291_v0 }
 0x7df   : > { %4477 = vst.msk [vmem:[#allocation4 + $0x1f0] sm:$0xff] %vm2052_vm10, %v4413_v2  ;;  %v5115_v53 = vpop.f32.mrf.mxu2 }
 0x7e0   : > { %4669 = vst.msk [vmem:[#allocation4 + $0x1f0] sm:$0xff] %vm2245_vm11, %v4605_v55 }
 0x7e1   : > { %5262 = vst.msk [vmem:[#allocation2 + $0x28] sm:$0xff] %vm5256_vm13, %v5171_v9 }
 0x7e4   : > { %v5163_v44 = vpop.permute.xlu1 %5162  ;;  %v4794_v39 = vld [vmem:[#allocation4 + $0x1e0] sm:$0xff] }
 0x7e5   : > { %5258 = vst.msk [vmem:[#allocation2 + $0x8] sm:$0xff] %vm5256_vm13, %v5163_v44  ;;  %v5177_v30 = vpop.permute.xlu2 %5176 }
 0x7e6   : > { %v5161_v52 = vpop.permute.xlu0 %5160  ;;  %5265 = vst.msk [vmem:[#allocation2 + $0x40] sm:$0xff] %vm5256_vm13, %v5177_v30 }
 0x7e7   : > { %5257 = vst.msk [vmem:[#allocation2] sm:$0xff] %vm5256_vm13, %v5161_v52  ;;  %v4796_v35 = vld [vmem:[#allocation4 + $0x1f0] sm:$0xff]  ;;  %v5118_v9 = vpop.f32.mrf.mxu2 }
 0x7e8   : > { %v4828_v28 = vpack.c.bf16 %v4796_v35, %v4794_v39  ;;  %v5294_v62 = vld [vmem:[#allocation2 + $0x28] sm:$0xff] }
 0x7e9   : > { %5327 = vst.msk [vmem:[%s8072_s15 + $0x28] sm:$0xff] %vm5321_vm14, %v5294_v62 }
 0x7ea   : > { %5033 = vmatmul.bf16.gmra.mxu0 %v4828_v28 }
 0x7ec   : > { %v5290_v10 = vld [vmem:[#allocation2 + $0x8] sm:$0xff]  ;;  %v5169_v12 = vpop.permute.xlu1 %5168 }
 0x7ed   : > { %5323 = vst.msk [vmem:[%s8072_s15 + $0x8] sm:$0xff] %vm5321_vm14, %v5290_v10  ;;  %v5297_v32 = vld [vmem:[#allocation2 + $0x40] sm:$0xff]  ;;  %v5183_v26 = vpop.permute.xlu2 %5182 }
 0x7ee   : > { %v5289_v17 = vld [vmem:[#allocation2] sm:$0xff]  ;;  %v5167_v4 = vpop.permute.xlu0 %5166  ;;  %5330 = vst.msk [vmem:[%s8072_s15 + $0x40] sm:$0xff] %vm5321_vm14, %v5297_v32 }
 0x7ef   : > { %5322 = vst.msk [vmem:[%s8072_s15] sm:$0xff] %vm5321_vm14, %v5289_v17  ;;  %v5120_v52 = vpop.f32.mrf.mxu2 }
 0x7f0   : > { %5260 = vst.msk [vmem:[#allocation2 + $0x18] sm:$0xff] %vm5256_vm13, %v5167_v4 }
 0x7f1   : > { %5261 = vst.msk [vmem:[#allocation2 + $0x20] sm:$0xff] %vm5256_vm13, %v5169_v12 }
 0x7f2   : > { %5268 = vst.msk [vmem:[#allocation2 + $0x58] sm:$0xff] %vm5256_vm13, %v5183_v26 }
 0x7f4   : > { %v5175_v49 = vpop.permute.xlu1 %5174 }
 0x7f5   : > { %5264 = vst.msk [vmem:[#allocation2 + $0x38] sm:$0xff] %vm5256_vm13, %v5175_v49  ;;  %v5189_v16 = vpop.permute.xlu2 %5188 }
 0x7f6   : > { %v5173_v60 = vpop.permute.xlu0 %5172  ;;  %v5014_v23 = vpop.f32.mrf.mxu0  ;;  %5271 = vst.msk [vmem:[#allocation2 + $0x70] sm:$0xff] %vm5256_vm13, %v5189_v16 }
 0x7f7   : > { %5263 = vst.msk [vmem:[#allocation2 + $0x30] sm:$0xff] %vm5256_vm13, %v5173_v60  ;;  %v5104_v40 = vadd.f32 %v5103_v33, %v5014_v23  ;;  %v5292_v37 = vld [vmem:[#allocation2 + $0x18] sm:$0xff] }
 0x7f8   : > { %5325 = vst.msk [vmem:[%s8072_s15 + $0x18] sm:$0xff] %vm5321_vm14, %v5292_v37  ;;  %v5293_v42 = vld [vmem:[#allocation2 + $0x20] sm:$0xff] }
 0x7f9   : > { %5204 = vrot.lane.b32.xlu1 %v5104_v40, %s5617_s29  ;;  %5326 = vst.msk [vmem:[%s8072_s15 + $0x20] sm:$0xff] %vm5321_vm14, %v5293_v42  ;;  %v5300_v22 = vld [vmem:[#allocation2 + $0x58] sm:$0xff] }
 0x7fa   : > { %5333 = vst.msk [vmem:[%s8072_s15 + $0x58] sm:$0xff] %vm5321_vm14, %v5300_v22 }
 0x7fc   : > { %v5296_v11 = vld [vmem:[#allocation2 + $0x38] sm:$0xff]  ;;  %v5181_v31 = vpop.permute.xlu1 %5180 }
 0x7fd   : > { %5329 = vst.msk [vmem:[%s8072_s15 + $0x38] sm:$0xff] %vm5321_vm14, %v5296_v11  ;;  %v5303_v8 = vld [vmem:[#allocation2 + $0x70] sm:$0xff]  ;;  %v5195_v15 = vpop.permute.xlu2 %5194 }
 0x7fe   : > { %v5295_v43 = vld [vmem:[#allocation2 + $0x30] sm:$0xff]  ;;  %v5179_v41 = vpop.permute.xlu0 %5178  ;;  %v5016_v63 = vpop.f32.mrf.mxu0  ;;  %5336 = vst.msk [vmem:[%s8072_s15 + $0x70] sm:$0xff] %vm5321_vm14, %v5303_v8 }
 0x7ff   : > { %5328 = vst.msk [vmem:[%s8072_s15 + $0x30] sm:$0xff] %vm5321_vm14, %v5295_v43  ;;  %v5106_v59 = vadd.f32 %v5105_v50, %v5016_v63 }
 0x800   : > { %5266 = vst.msk [vmem:[#allocation2 + $0x48] sm:$0xff] %vm5256_vm13, %v5179_v41 }
 0x801   : > { %5206 = vrot.lane.b32.xlu2 %v5106_v59, %s5617_s29  ;;  %5267 = vst.msk [vmem:[#allocation2 + $0x50] sm:$0xff] %vm5256_vm13, %v5181_v31  ;;  %v5123_v62 = vpop.f32.mrf.mxu2 }
 0x802   : > { %5274 = vst.msk [vmem:[#allocation2 + $0x88] sm:$0xff] %vm5256_vm13, %v5195_v15 }
 0x804   : > { %v5187_v61 = vpop.permute.xlu1 %5186 }
 0x805   : > { %5270 = vst.msk [vmem:[#allocation2 + $0x68] sm:$0xff] %vm5256_vm13, %v5187_v61 }
 0x806   : > { %v5185_v38 = vpop.permute.xlu0 %5184 }
 0x807   : > { %5269 = vst.msk [vmem:[#allocation2 + $0x60] sm:$0xff] %vm5256_vm13, %v5185_v38  ;;  %v5298_v5 = vld [vmem:[#allocation2 + $0x48] sm:$0xff] }
 0x808   : > { %5331 = vst.msk [vmem:[%s8072_s15 + $0x48] sm:$0xff] %vm5321_vm14, %v5298_v5  ;;  %v5299_v27 = vld [vmem:[#allocation2 + $0x50] sm:$0xff] }
 0x809   : > { %5332 = vst.msk [vmem:[%s8072_s15 + $0x50] sm:$0xff] %vm5321_vm14, %v5299_v27  ;;  %v5306_v18 = vld [vmem:[#allocation2 + $0x88] sm:$0xff]  ;;  %v5125_v4 = vpop.f32.mrf.mxu2 }
 0x80a   : > { %5339 = vst.msk [vmem:[%s8072_s15 + $0x88] sm:$0xff] %vm5321_vm14, %v5306_v18 }
 0x80c   : > { %v5302_v21 = vld [vmem:[#allocation2 + $0x68] sm:$0xff]  ;;  %v5193_v48 = vpop.permute.xlu1 %5192 }
 0x80d   : > { %5335 = vst.msk [vmem:[%s8072_s15 + $0x68] sm:$0xff] %vm5321_vm14, %v5302_v21 }
 0x80e   : > { %v5301_v47 = vld [vmem:[#allocation2 + $0x60] sm:$0xff]  ;;  %v5191_v45 = vpop.permute.xlu0 %5190  ;;  %5273 = vst.msk [vmem:[#allocation2 + $0x80] sm:$0xff] %vm5256_vm13, %v5193_v48 }
 0x80f   : > { %5334 = vst.msk [vmem:[%s8072_s15 + $0x60] sm:$0xff] %vm5321_vm14, %v5301_v47 }
 0x810   : > { %5272 = vst.msk [vmem:[#allocation2 + $0x78] sm:$0xff] %vm5256_vm13, %v5191_v45 }
 0x815   : > { %v5305_v6 = vld [vmem:[#allocation2 + $0x80] sm:$0xff] }
 0x816   : > { %5338 = vst.msk [vmem:[%s8072_s15 + $0x80] sm:$0xff] %vm5321_vm14, %v5305_v6 }
 0x817   : > { %v5304_v20 = vld [vmem:[#allocation2 + $0x78] sm:$0xff]  ;;  %v5019_v24 = vpop.f32.mrf.mxu0 }
 0x818   : > { %5337 = vst.msk [vmem:[%s8072_s15 + $0x78] sm:$0xff] %vm5321_vm14, %v5304_v20  ;;  %v5109_v25 = vadd.f32 %v5108_v19, %v5019_v24 }
 0x81a   : > { %5208 = vrot.lane.b32.xlu0 %v5109_v25, %s5617_s29 }
 0x81c   : > { %v5197_v57 = vpop.permute.xlu0 %5196 }
 0x81d   : > { %5275 = vst.msk [vmem:[#allocation2 + $0x90] sm:$0xff] %vm5256_vm13, %v5197_v57 }
 0x81f   : > { %v5021_v56 = vpop.f32.mrf.mxu0 }
 0x820   : > { %v5111_v51 = vadd.f32 %v5110_v54, %v5021_v56 }
 0x822   : > { %5210 = vrot.lane.b32.xlu1 %v5111_v51, %s5617_s29 }
 0x824   : > { %v5307_v14 = vld [vmem:[#allocation2 + $0x90] sm:$0xff]  ;;  %v5199_v55 = vpop.permute.xlu1 %5198 }
 0x825   : > { %5340 = vst.msk [vmem:[%s8072_s15 + $0x90] sm:$0xff] %vm5321_vm14, %v5307_v14 }
 0x826   : > { %5276 = vst.msk [vmem:[#allocation2 + $0x98] sm:$0xff] %vm5256_vm13, %v5199_v55 }
 0x829   : > { %v5201_v3 = vpop.permute.xlu2 %5200 }
 0x82a   : > { %5277 = vst.msk [vmem:[#allocation2 + $0xa0] sm:$0xff] %vm5256_vm13, %v5201_v3 }
 0x82d   : > { %v5308_v1 = vld [vmem:[#allocation2 + $0x98] sm:$0xff] }
 0x82e   : > { %5341 = vst.msk [vmem:[%s8072_s15 + $0x98] sm:$0xff] %vm5321_vm14, %v5308_v1 }
 0x831   : > { %v5309_v58 = vld [vmem:[#allocation2 + $0xa0] sm:$0xff] }
 0x832   : > { %5342 = vst.msk [vmem:[%s8072_s15 + $0xa0] sm:$0xff] %vm5321_vm14, %v5309_v58 }
 0x83e   : > { %v5024_v7 = vpop.f32.mrf.mxu0 }
 0x83f   : > { %v5114_v46 = vadd.f32 %v5113_v29, %v5024_v7 }
 0x841   : > { %5212 = vrot.lane.b32.xlu2 %v5114_v46, %s5617_s29 }
 0x846   : > { %v5026_v13 = vpop.f32.mrf.mxu0 }
 0x847   : > { %v5116_v36 = vadd.f32 %v5115_v53, %v5026_v13 }
 0x849   : > { %5214 = vrot.lane.b32.xlu0 %v5116_v36, %s5617_s29  ;;  %v5203_v34 = vpop.permute.xlu0 %5202 }
 0x84a   : > { %5278 = vst.msk [vmem:[#allocation2 + $0xa8] sm:$0xff] %vm5256_vm13, %v5203_v34 }
 0x851   : > { %v5310_v2 = vld [vmem:[#allocation2 + $0xa8] sm:$0xff] }
 0x852   : > { %5343 = vst.msk [vmem:[%s8072_s15 + $0xa8] sm:$0xff] %vm5321_vm14, %v5310_v2 }
 0x856   : > { %v5029_v0 = vpop.f32.mrf.mxu0 }
 0x857   : > { %v5119_v44 = vadd.f32 %v5118_v9, %v5029_v0 }
 0x859   : > { %5216 = vrot.lane.b32.xlu1 %v5119_v44, %s5617_s29 }
 0x85b   : > { %v5207_v39 = vpop.permute.xlu2 %5206 }
 0x85c   : > { %5280 = vst.msk [vmem:[#allocation2 + $0xb8] sm:$0xff] %vm5256_vm13, %v5207_v39 }
 0x85e   : > { %v5031_v30 = vpop.f32.mrf.mxu0 }
 0x85f   : > { %v5121_v35 = vadd.f32 %v5120_v52, %v5031_v30 }
 0x861   : > { %5218 = vrot.lane.b32.xlu2 %v5121_v35, %s5617_s29 }
 0x863   : > { %v5312_v28 = vld [vmem:[#allocation2 + $0xb8] sm:$0xff] }
 0x864   : > { %5345 = vst.msk [vmem:[%s8072_s15 + $0xb8] sm:$0xff] %vm5321_vm14, %v5312_v28 }
 0x867   : > { %v5034_v10 = vpop.f32.mrf.mxu0 }
 0x868   : > { %v5124_v12 = vadd.f32 %v5123_v62, %v5034_v10 }
 0x86a   : > { %5220 = vrot.lane.b32.xlu0 %v5124_v12, %s5617_s29 }
 0x86b   : > { %v5205_v17 = vpop.permute.xlu1 %5204 }
 0x86c   : > { %5279 = vst.msk [vmem:[#allocation2 + $0xb0] sm:$0xff] %vm5256_vm13, %v5205_v17 }
 0x86f   : > { %v5036_v32 = vpop.f32.mrf.mxu0 }
 0x870   : > { %v5126_v26 = vadd.f32 %v5125_v4, %v5036_v32 }
 0x872   : > { %5222 = vrot.lane.b32.xlu1 %v5126_v26, %s5617_s29 }
 0x873   : > { %v5311_v33 = vld [vmem:[#allocation2 + $0xb0] sm:$0xff] }
 0x874   : > { %5344 = vst.msk [vmem:[%s8072_s15 + $0xb0] sm:$0xff] %vm5321_vm14, %v5311_v33 }
 0x88c   : > { %v5209_v49 = vpop.permute.xlu0 %5208 }
 0x88d   : > { %5281 = vst.msk [vmem:[#allocation2 + $0xc0] sm:$0xff] %vm5256_vm13, %v5209_v49 }
 0x894   : > { %v5313_v60 = vld [vmem:[#allocation2 + $0xc0] sm:$0xff]  ;;  %v5211_v23 = vpop.permute.xlu1 %5210 }
 0x895   : > { %5346 = vst.msk [vmem:[%s8072_s15 + $0xc0] sm:$0xff] %vm5321_vm14, %v5313_v60 }
 0x896   : > { %5282 = vst.msk [vmem:[#allocation2 + $0xc8] sm:$0xff] %vm5256_vm13, %v5211_v23 }
 0x89b   : > { %v5213_v40 = vpop.permute.xlu2 %5212 }
 0x89c   : > { %5283 = vst.msk [vmem:[#allocation2 + $0xd0] sm:$0xff] %vm5256_vm13, %v5213_v40 }
 0x89d   : > { %v5314_v16 = vld [vmem:[#allocation2 + $0xc8] sm:$0xff] }
 0x89e   : > { %5347 = vst.msk [vmem:[%s8072_s15 + $0xc8] sm:$0xff] %vm5321_vm14, %v5314_v16 }
 0x8a3   : > { %v5315_v37 = vld [vmem:[#allocation2 + $0xd0] sm:$0xff] }
 0x8a4   : > { %5348 = vst.msk [vmem:[%s8072_s15 + $0xd0] sm:$0xff] %vm5321_vm14, %v5315_v37 }
 0x8bb   : > { %v5215_v42 = vpop.permute.xlu0 %5214  ;;  %v5219_v22 = vpop.permute.xlu2 %5218 }
 0x8bc   : > { %5284 = vst.msk [vmem:[#allocation2 + $0xd8] sm:$0xff] %vm5256_vm13, %v5215_v42 }
 0x8bd   : > { %5286 = vst.msk [vmem:[#allocation2 + $0xe8] sm:$0xff] %vm5256_vm13, %v5219_v22 }
 0x8c3   : > { %v5316_v50 = vld [vmem:[#allocation2 + $0xd8] sm:$0xff] }
 0x8c4   : > { %5349 = vst.msk [vmem:[%s8072_s15 + $0xd8] sm:$0xff] %vm5321_vm14, %v5316_v50  ;;  %v5318_v11 = vld [vmem:[#allocation2 + $0xe8] sm:$0xff] }
 0x8c5   : > { %5351 = vst.msk [vmem:[%s8072_s15 + $0xe8] sm:$0xff] %vm5321_vm14, %v5318_v11 }
 0x8cb   : > { %v5217_v31 = vpop.permute.xlu1 %5216 }
 0x8cc   : > { %5285 = vst.msk [vmem:[#allocation2 + $0xe0] sm:$0xff] %vm5256_vm13, %v5217_v31 }
 0x8d3   : > { %v5317_v43 = vld [vmem:[#allocation2 + $0xe0] sm:$0xff] }
 0x8d4   : > { %5350 = vst.msk [vmem:[%s8072_s15 + $0xe0] sm:$0xff] %vm5321_vm14, %v5317_v43 }
 0x8dc   : > { %v5221_v41 = vpop.permute.xlu0 %5220 }
 0x8dd   : > { %5287 = vst.msk [vmem:[#allocation2 + $0xf0] sm:$0xff] %vm5256_vm13, %v5221_v41 }
 0x8e4   : > { %v5319_v63 = vld [vmem:[#allocation2 + $0xf0] sm:$0xff]  ;;  %v5223_v8 = vpop.permute.xlu1 %5222 }
 0x8e5   : > { %5352 = vst.msk [vmem:[%s8072_s15 + $0xf0] sm:$0xff] %vm5321_vm14, %v5319_v63 }
 0x8e6   : > { %5288 = vst.msk [vmem:[#allocation2 + $0xf8] sm:$0xff] %vm5256_vm13, %v5223_v8 }
 0x8ed   : > { %v5320_v59 = vld [vmem:[#allocation2 + $0xf8] sm:$0xff] }
 0x8ee   : > { %5353 = vst.msk [vmem:[%s8072_s15 + $0xf8] sm:$0xff] %vm5321_vm14, %v5320_v59 }
 0x8ef PF: > { %s21_s17 = sadd.s32 1, %s5614_s17  }
 0x8f0   : > { %p18_p4 = scmp.ge.s32.totalorder %s21_s17, 4  }
 0x8f2   :  { %20 = sbr.rel (!%p18_p4) target bundleno = 1 (0x1), region = 97 }

</bundles_post_ra>
